<compile_context>
chip_gen: v6e
topology: v6e:2x2x1
jax: 0.10.0
libtpu: 0.0.40
codegen_flags: <defaults>
</compile_context>

<pallas_src>
import functools

import jax
import jax.numpy as jnp
from jax.experimental import pallas as pl
from jax.experimental.pallas import tpu as pltpu

BN_EPS = 1e-5
CPAD = 128   # lane-dense channel padding for conv outputs
NPAD = 128   # lane-dense padding for the final logits


# ---------------------------------------------------------------------------
# Pallas kernels
# ---------------------------------------------------------------------------
def _conv_gemm_kernel(a_ref, w_ref, b_ref, o_ref):
    # o = SiLU(a @ w + b); a/w are bf16, accumulate + epilogue in f32.
    acc = jnp.dot(a_ref[...], w_ref[...], preferred_element_type=jnp.float32)
    z = acc + b_ref[...]
    z = z * jax.nn.sigmoid(z)
    o_ref[...] = z.astype(o_ref.dtype)


def conv_gemm(patches, w, b, *, tm=128):
    """patches (M, K), w (K, N) bf16, b (1, N) f32 -> (M, N) bf16."""
    M, K = patches.shape
    K2, N = w.shape
    assert K == K2
    TM = tm if M >= tm else M
    grid = (pl.cdiv(M, TM),)
    return pl.pallas_call(
        _conv_gemm_kernel,
        out_shape=jax.ShapeDtypeStruct((M, N), jnp.bfloat16),
        grid=grid,
        in_specs=[pl.BlockSpec((TM, K), lambda i: (i, 0)),
                  pl.BlockSpec((K, N), lambda i: (0, 0)),
                  pl.BlockSpec((1, N), lambda i: (0, 0))],
        out_specs=pl.BlockSpec((TM, N), lambda i: (i, 0)),
        compiler_params=pltpu.CompilerParams(
            dimension_semantics=("parallel",)),
    )(patches.astype(jnp.bfloat16), w, b)


def _tail_kernel(a1_ref, a2_ref, w1_ref, b1_ref, w2_ref, b2_ref, o_ref):
    # Fused: x = a1 + a2; h = SiLU(x @ w1 + b1); o = h @ w2 + b2.
    x = a1_ref[...].astype(jnp.float32) + a2_ref[...].astype(jnp.float32)
    h = jnp.dot(x.astype(jnp.bfloat16), w1_ref[...],
                preferred_element_type=jnp.float32) + b1_ref[...]
    h = h * jax.nn.sigmoid(h)                       # SiLU, f32 epilogue
    # TODO(synk): Dropout(p=0.2) is identity in inference mode; omitted.
    out = jnp.dot(h.astype(jnp.bfloat16), w2_ref[...],
                  preferred_element_type=jnp.float32) + b2_ref[...]
    o_ref[...] = out.astype(o_ref.dtype)


def fused_tail(a1, a2, w1, b1, w2, b2):
    M = a1.shape[0]
    N = w2.shape[1]
    vmem = pl.BlockSpec(memory_space=pltpu.MemorySpace.VMEM)
    return pl.pallas_call(
        _tail_kernel,
        out_shape=jax.ShapeDtypeStruct((M, N), jnp.float32),
        in_specs=[vmem] * 6,
        out_specs=vmem,
    )(a1, a2, w1, b1, w2, b2)


# ---------------------------------------------------------------------------
# Glue (im2col / pool / pad) — NHWC, channel on the lane axis
# ---------------------------------------------------------------------------
def im2col_nhwc(x, k, stride):
    """x (B, H, W, C) -> (B*OH*OW, k*k*C), K ordered (kh, kw, c)."""
    B, H, W, C = x.shape
    OH = (H - k) // stride + 1
    OW = (W - k) // stride + 1
    cols = []
    for i in range(k):
        for j in range(k):
            cols.append(x[:, i:i + stride * OH:stride,
                          j:j + stride * OW:stride, :])        # (B, OH, OW, C)
    patches = jnp.concatenate(cols, axis=-1)                   # (B, OH, OW, k*k*C)
    return patches.reshape(B * OH * OW, k * k * C), OH, OW


def maxpool2_nhwc(x):
    B, H, W, C = x.shape
    Ho, Wo = H // 2, W // 2
    x = x[:, :2 * Ho, :2 * Wo, :].reshape(B, Ho, 2, Wo, 2, C)
    return jnp.max(x, axis=(2, 4))


# ---------------------------------------------------------------------------
# Parameter init (deterministic, synthetic) — mirrors the PyTorch module
# ---------------------------------------------------------------------------
def conv_bn_init(key, cin, cout):
    ks = jax.random.split(key, 6)
    return dict(
        w=jax.random.normal(ks[0], (cout, cin, 3, 3), jnp.float32) * 0.1,
        b=jax.random.normal(ks[1], (cout,), jnp.float32) * 0.1,
        gamma=jax.random.uniform(ks[2], (cout,), jnp.float32, 0.5, 1.5),
        beta=jax.random.normal(ks[3], (cout,), jnp.float32) * 0.1,
        mean=jax.random.normal(ks[4], (cout,), jnp.float32) * 0.1,
        var=jax.random.uniform(ks[5], (cout,), jnp.float32, 0.5, 1.5),
    )


def fc_init(key, fin, fout):
    k1, k2 = jax.random.split(key)
    return dict(
        w=jax.random.normal(k1, (fout, fin), jnp.float32) * (1.0 / fin) ** 0.5,
        b=jax.random.normal(k2, (fout,), jnp.float32) * 0.1,
    )


def init_params(key, num_classes, img_size):
    flatten_dim = 64 * ((img_size - 2) // 4) * ((img_size - 2) // 4)
    ks = jax.random.split(key, 6)
    return dict(
        conv1=conv_bn_init(ks[0], 1, 32),
        conv2=conv_bn_init(ks[1], 32, 64),
        conv1_s2=conv_bn_init(ks[2], 1, 32),
        conv2_s2=conv_bn_init(ks[3], 32, 64),
        fc1=fc_init(ks[4], flatten_dim, 512),
        fc2=fc_init(ks[5], 512, num_classes),
    )


# ---------------------------------------------------------------------------
# Host-side weight preparation (BN fold, layout permutation, lane padding)
# ---------------------------------------------------------------------------
def _prep_conv(p, cin_pad, cout_pad):
    cout, cin = p["w"].shape[:2]
    s = p["gamma"] / jnp.sqrt(p["var"] + BN_EPS)               # BN scale
    t = (p["b"] - p["mean"]) * s + p["beta"]                   # fused bias
    w = jnp.transpose(p["w"], (2, 3, 1, 0)) * s                # (3,3,cin,cout), scale folded
    w_pad = jnp.zeros((3, 3, cin_pad, cout_pad), jnp.float32)
    w_pad = w_pad.at[:, :, :cin, :cout].set(w)
    b_pad = jnp.zeros((cout_pad,), jnp.float32).at[:cout].set(t)
    return dict(w=w_pad.reshape(9 * cin_pad, cout_pad).astype(jnp.bfloat16),
                b=b_pad.reshape(1, cout_pad))


def prepare(params, num_classes, img_size):
    S = (img_size - 2) // 4                    # spatial size at the flatten point
    prep = dict(
        conv1=_prep_conv(params["conv1"], 1, CPAD),
        conv2=_prep_conv(params["conv2"], CPAD, CPAD),
        conv1_s2=_prep_conv(params["conv1_s2"], 1, CPAD),
        conv2_s2=_prep_conv(params["conv2_s2"], CPAD, CPAD),
    )
    # fc1: reorder columns from PyTorch NCHW .view(B,-1) order to the
    # padded-NHWC flatten order used here (zero rows for padded channels).
    creal = 64
    h_i, w_i, c_i = jnp.meshgrid(jnp.arange(S), jnp.arange(S),
                                 jnp.arange(creal), indexing="ij")
    dst = ((h_i * S + w_i) * CPAD + c_i).reshape(-1)           # padded-NHWC index
    src = (c_i * S * S + h_i * S + w_i).reshape(-1)            # NCHW flat index
    w1 = jnp.zeros((S * S * CPAD, 512), jnp.float32)
    w1 = w1.at[dst].set(params["fc1"]["w"].T[src])
    prep["fc1_w"] = w1.astype(jnp.bfloat16)
    prep["fc1_b"] = params["fc1"]["b"].reshape(1, 512).astype(jnp.float32)
    # fc2 padded to 128 output lanes (sliced back after the kernel).
    w2 = jnp.zeros((512, NPAD), jnp.float32)
    w2 = w2.at[:, :num_classes].set(params["fc2"]["w"].T)
    b2 = jnp.zeros((1, NPAD), jnp.float32).at[0, :num_classes].set(params["fc2"]["b"])
    prep["fc2_w"] = w2.astype(jnp.bfloat16)
    prep["fc2_b"] = b2
    return prep


# ---------------------------------------------------------------------------
# Forward pass (matches Net.forward, inference mode)
# ---------------------------------------------------------------------------
def net_forward(prep, x, num_classes):
    B = x.shape[0]
    xh = jnp.transpose(x, (0, 2, 3, 1)).astype(jnp.bfloat16)   # NCHW -> NHWC once
    # Branch 1: conv(s1)+bn+silu -> pool -> conv(s1)+bn+silu -> pool -> pad
    p, oh, ow = im2col_nhwc(xh, 3, 1)
    y = conv_gemm(p, prep["conv1"]["w"], prep["conv1"]["b"]).reshape(B, oh, ow, CPAD)
    y = maxpool2_nhwc(y)
    p, oh, ow = im2col_nhwc(y, 3, 1)
    y = conv_gemm(p, prep["conv2"]["w"], prep["conv2"]["b"]).reshape(B, oh, ow, CPAD)
    y = maxpool2_nhwc(y)
    x1 = jnp.pad(y, ((0, 0), (0, 1), (0, 1), (0, 0)))          # F.pad(x1,(0,1,0,1))
    # Branch 2: strided convs
    p, oh, ow = im2col_nhwc(xh, 3, 2)
    y = conv_gemm(p, prep["conv1_s2"]["w"], prep["conv1_s2"]["b"]).reshape(B, oh, ow, CPAD)
    p, oh, ow = im2col_nhwc(y, 3, 2)
    x2 = conv_gemm(p, prep["conv2_s2"]["w"], prep["conv2_s2"]["b"]).reshape(B, oh, ow, CPAD)
    # Fused tail: branch add + fc1 + SiLU + (dropout=identity) + fc2
    a1 = x1.reshape(B, -1)
    a2 = x2.reshape(B, -1)
    out = fused_tail(a1, a2, prep["fc1_w"], prep["fc1_b"],
                     prep["fc2_w"], prep["fc2_b"])
    return out[:, :num_classes]


if __name__ == "__main__":
    key = jax.random.PRNGKey(0)
    k_params, k_x = jax.random.split(key)

    batch, img_size, num_classes = 2, 16, 10
    params = init_params(k_params, num_classes, img_size)
    x = jax.random.normal(k_x, (batch, 1, img_size, img_size), jnp.float32)

    prep = prepare(params, num_classes, img_size)       # one-time host prep
    fwd = jax.jit(functools.partial(net_forward, num_classes=num_classes))
    out = jax.block_until_ready(fwd(prep, x))

    assert out.shape == (batch, num_classes), out.shape
    assert bool(jnp.all(jnp.isfinite(out)))
    print("KERNEL_OK")
</pallas_src>

<mosaic_0001>
module attributes {stable_mosaic.version = 11 : i64} {
  func.func @_conv_gemm_kernel(%arg0: i32, %arg1: memref<98x9xbf16, #tpu.memory_space<vmem>>, %arg2: memref<9x128xbf16, #tpu.memory_space<vmem>>, %arg3: memref<1x128xf32, #tpu.memory_space<vmem>>, %arg4: memref<98x128xbf16, #tpu.memory_space<vmem>>) attributes {dimension_semantics = [#tpu.dimension_semantics<parallel>], iteration_bounds = array<i64: 1>, scalar_prefetch = 0 : i64, scratch_operands = 0 : i64, tpu.core_type = #tpu.core_type<tc>, window_params = [{transform_indices = @transform_0, window_bounds = array<i64: 98, 9>}, {pipeline_mode = #tpu.pipeline_mode<synchronous>, transform_indices = @transform_1, window_bounds = array<i64: 9, 128>}, {pipeline_mode = #tpu.pipeline_mode<synchronous>, transform_indices = @transform_2, window_bounds = array<i64: 1, 128>}, {transform_indices = @transform_3, window_bounds = array<i64: 98, 128>}]} {
    %c0 = arith.constant 0 : index
    %c0_0 = arith.constant 0 : index
    %0 = vector.load %arg1[%c0, %c0_0] : memref<98x9xbf16, #tpu.memory_space<vmem>>, vector<98x9xbf16>
    %c0_1 = arith.constant 0 : index
    %c0_2 = arith.constant 0 : index
    %1 = vector.load %arg2[%c0_1, %c0_2] : memref<9x128xbf16, #tpu.memory_space<vmem>>, vector<9x128xbf16>
    %cst = arith.constant dense<0.000000e+00> : vector<98x128xf32>
    %2 = tpu.matmul %0, %1, %cst {dimension_numbers = #tpu.dot_dimension_numbers<[1], [0], [0], [1], [0, 0, 1, 1], [], []>} : vector<98x9xbf16>, vector<9x128xbf16>, vector<98x128xf32> -> vector<98x128xf32>
    %c0_3 = arith.constant 0 : index
    %c0_4 = arith.constant 0 : index
    %3 = vector.load %arg3[%c0_3, %c0_4] : memref<1x128xf32, #tpu.memory_space<vmem>>, vector<1x128xf32>
    %4 = vector.broadcast %3 : vector<1x128xf32> to vector<98x128xf32>
    %5 = arith.addf %2, %4 : vector<98x128xf32>
    %6 = arith.negf %5 : vector<98x128xf32>
    %7 = math.exp %6 : vector<98x128xf32>
    %cst_5 = arith.constant 1.000000e+00 : f32
    %8 = vector.broadcast %cst_5 : f32 to vector<98x128xf32>
    %9 = arith.addf %8, %7 : vector<98x128xf32>
    %10 = arith.divf %8, %9 : vector<98x128xf32>
    %11 = arith.mulf %5, %10 : vector<98x128xf32>
    %12 = arith.truncf %11 : vector<98x128xf32> to vector<98x128xbf16>
    %c0_6 = arith.constant 0 : index
    %c0_7 = arith.constant 0 : index
    %13 = vector.load %arg4[%c0_6, %c0_7] : memref<98x128xbf16, #tpu.memory_space<vmem>>, vector<98x128xbf16>
    tpu.vector_store %arg4[%c0_6, %c0_7], %12 {strides = array<i32>} : memref<98x128xbf16, #tpu.memory_space<vmem>>, vector<98x128xbf16>,
    return
  }
  func.func @transform_0(%arg0: i32) -> (i32, i32) {
    %c0_i32 = arith.constant 0 : i32
    %c0_i32_0 = arith.constant 0 : i32
    return %arg0, %c0_i32 : i32, i32
  }
  func.func @transform_1(%arg0: i32) -> (i32, i32) {
    %c0_i32 = arith.constant 0 : i32
    %c0_i32_0 = arith.constant 0 : i32
    %c0_i32_1 = arith.constant 0 : i32
    return %c0_i32, %c0_i32_0 : i32, i32
  }
  func.func @transform_2(%arg0: i32) -> (i32, i32) {
    %c0_i32 = arith.constant 0 : i32
    %c0_i32_0 = arith.constant 0 : i32
    %c0_i32_1 = arith.constant 0 : i32
    return %c0_i32, %c0_i32_0 : i32, i32
  }
  func.func @transform_3(%arg0: i32) -> (i32, i32) {
    %c0_i32 = arith.constant 0 : i32
    %c0_i32_0 = arith.constant 0 : i32
    return %arg0, %c0_i32 : i32, i32
  }
}

module attributes {stable_mosaic.version = 11 : i64} {
  func.func @_conv_gemm_kernel(%arg0: i32, %arg1: memref<18x1152xbf16, #tpu.memory_space<vmem>>, %arg2: memref<1152x128xbf16, #tpu.memory_space<vmem>>, %arg3: memref<1x128xf32, #tpu.memory_space<vmem>>, %arg4: memref<18x128xbf16, #tpu.memory_space<vmem>>) attributes {dimension_semantics = [#tpu.dimension_semantics<parallel>], iteration_bounds = array<i64: 1>, scalar_prefetch = 0 : i64, scratch_operands = 0 : i64, tpu.core_type = #tpu.core_type<tc>, window_params = [{transform_indices = @transform_0, window_bounds = array<i64: 18, 1152>}, {pipeline_mode = #tpu.pipeline_mode<synchronous>, transform_indices = @transform_1, window_bounds = array<i64: 1152, 128>}, {pipeline_mode = #tpu.pipeline_mode<synchronous>, transform_indices = @transform_2, window_bounds = array<i64: 1, 128>}, {transform_indices = @transform_3, window_bounds = array<i64: 18, 128>}]} {
    %c0 = arith.constant 0 : index
    %c0_0 = arith.constant 0 : index
    %0 = vector.load %arg1[%c0, %c0_0] : memref<18x1152xbf16, #tpu.memory_space<vmem>>, vector<18x1152xbf16>
    %c0_1 = arith.constant 0 : index
    %c0_2 = arith.constant 0 : index
    %1 = vector.load %arg2[%c0_1, %c0_2] : memref<1152x128xbf16, #tpu.memory_space<vmem>>, vector<1152x128xbf16>
    %cst = arith.constant dense<0.000000e+00> : vector<18x128xf32>
    %2 = tpu.matmul %0, %1, %cst {dimension_numbers = #tpu.dot_dimension_numbers<[1], [0], [0], [1], [0, 0, 1, 1], [], []>} : vector<18x1152xbf16>, vector<1152x128xbf16>, vector<18x128xf32> -> vector<18x128xf32>
    %c0_3 = arith.constant 0 : index
    %c0_4 = arith.constant 0 : index
    %3 = vector.load %arg3[%c0_3, %c0_4] : memref<1x128xf32, #tpu.memory_space<vmem>>, vector<1x128xf32>
    %4 = vector.broadcast %3 : vector<1x128xf32> to vector<18x128xf32>
    %5 = arith.addf %2, %4 : vector<18x128xf32>
    %6 = arith.negf %5 : vector<18x128xf32>
    %7 = math.exp %6 : vector<18x128xf32>
    %cst_5 = arith.constant 1.000000e+00 : f32
    %8 = vector.broadcast %cst_5 : f32 to vector<18x128xf32>
    %9 = arith.addf %8, %7 : vector<18x128xf32>
    %10 = arith.divf %8, %9 : vector<18x128xf32>
    %11 = arith.mulf %5, %10 : vector<18x128xf32>
    %12 = arith.truncf %11 : vector<18x128xf32> to vector<18x128xbf16>
    %c0_6 = arith.constant 0 : index
    %c0_7 = arith.constant 0 : index
    %13 = vector.load %arg4[%c0_6, %c0_7] : memref<18x128xbf16, #tpu.memory_space<vmem>>, vector<18x128xbf16>
    tpu.vector_store %arg4[%c0_6, %c0_7], %12 {strides = array<i32>} : memref<18x128xbf16, #tpu.memory_space<vmem>>, vector<18x128xbf16>,
    return
  }
  func.func @transform_0(%arg0: i32) -> (i32, i32) {
    %c0_i32 = arith.constant 0 : i32
    %c0_i32_0 = arith.constant 0 : i32
    return %arg0, %c0_i32 : i32, i32
  }
  func.func @transform_1(%arg0: i32) -> (i32, i32) {
    %c0_i32 = arith.constant 0 : i32
    %c0_i32_0 = arith.constant 0 : i32
    %c0_i32_1 = arith.constant 0 : i32
    return %c0_i32, %c0_i32_0 : i32, i32
  }
  func.func @transform_2(%arg0: i32) -> (i32, i32) {
    %c0_i32 = arith.constant 0 : i32
    %c0_i32_0 = arith.constant 0 : i32
    %c0_i32_1 = arith.constant 0 : i32
    return %c0_i32, %c0_i32_0 : i32, i32
  }
  func.func @transform_3(%arg0: i32) -> (i32, i32) {
    %c0_i32 = arith.constant 0 : i32
    %c0_i32_0 = arith.constant 0 : i32
    return %arg0, %c0_i32 : i32, i32
  }
}

module attributes {stable_mosaic.version = 11 : i64} {
  func.func @_conv_gemm_kernel(%arg0: i32, %arg1: memref<128x9xbf16, #tpu.memory_space<vmem>>, %arg2: memref<9x128xbf16, #tpu.memory_space<vmem>>, %arg3: memref<1x128xf32, #tpu.memory_space<vmem>>, %arg4: memref<128x128xbf16, #tpu.memory_space<vmem>>) attributes {dimension_semantics = [#tpu.dimension_semantics<parallel>], iteration_bounds = array<i64: 4>, scalar_prefetch = 0 : i64, scratch_operands = 0 : i64, tpu.core_type = #tpu.core_type<tc>, window_params = [{transform_indices = @transform_0, window_bounds = array<i64: 128, 9>}, {pipeline_mode = #tpu.pipeline_mode<synchronous>, transform_indices = @transform_1, window_bounds = array<i64: 9, 128>}, {pipeline_mode = #tpu.pipeline_mode<synchronous>, transform_indices = @transform_2, window_bounds = array<i64: 1, 128>}, {transform_indices = @transform_3, window_bounds = array<i64: 128, 128>}]} {
    %c0 = arith.constant 0 : index
    %c0_0 = arith.constant 0 : index
    %0 = vector.load %arg1[%c0, %c0_0] : memref<128x9xbf16, #tpu.memory_space<vmem>>, vector<128x9xbf16>
    %c0_1 = arith.constant 0 : index
    %c0_2 = arith.constant 0 : index
    %1 = vector.load %arg2[%c0_1, %c0_2] : memref<9x128xbf16, #tpu.memory_space<vmem>>, vector<9x128xbf16>
    %cst = arith.constant dense<0.000000e+00> : vector<128x128xf32>
    %2 = tpu.matmul %0, %1, %cst {dimension_numbers = #tpu.dot_dimension_numbers<[1], [0], [0], [1], [0, 0, 1, 1], [], []>} : vector<128x9xbf16>, vector<9x128xbf16>, vector<128x128xf32> -> vector<128x128xf32>
    %c0_3 = arith.constant 0 : index
    %c0_4 = arith.constant 0 : index
    %3 = vector.load %arg3[%c0_3, %c0_4] : memref<1x128xf32, #tpu.memory_space<vmem>>, vector<1x128xf32>
    %4 = vector.broadcast %3 : vector<1x128xf32> to vector<128x128xf32>
    %5 = arith.addf %2, %4 : vector<128x128xf32>
    %6 = arith.negf %5 : vector<128x128xf32>
    %7 = math.exp %6 : vector<128x128xf32>
    %cst_5 = arith.constant 1.000000e+00 : f32
    %8 = vector.broadcast %cst_5 : f32 to vector<128x128xf32>
    %9 = arith.addf %8, %7 : vector<128x128xf32>
    %10 = arith.divf %8, %9 : vector<128x128xf32>
    %11 = arith.mulf %5, %10 : vector<128x128xf32>
    %12 = arith.truncf %11 : vector<128x128xf32> to vector<128x128xbf16>
    %c0_6 = arith.constant 0 : index
    %c0_7 = arith.constant 0 : index
    %13 = vector.load %arg4[%c0_6, %c0_7] : memref<128x128xbf16, #tpu.memory_space<vmem>>, vector<128x128xbf16>
    tpu.vector_store %arg4[%c0_6, %c0_7], %12 {strides = array<i32>} : memref<128x128xbf16, #tpu.memory_space<vmem>>, vector<128x128xbf16>,
    return
  }
  func.func @transform_0(%arg0: i32) -> (i32, i32) {
    %c0_i32 = arith.constant 0 : i32
    %c0_i32_0 = arith.constant 0 : i32
    return %arg0, %c0_i32 : i32, i32
  }
  func.func @transform_1(%arg0: i32) -> (i32, i32) {
    %c0_i32 = arith.constant 0 : i32
    %c0_i32_0 = arith.constant 0 : i32
    %c0_i32_1 = arith.constant 0 : i32
    return %c0_i32, %c0_i32_0 : i32, i32
  }
  func.func @transform_2(%arg0: i32) -> (i32, i32) {
    %c0_i32 = arith.constant 0 : i32
    %c0_i32_0 = arith.constant 0 : i32
    %c0_i32_1 = arith.constant 0 : i32
    return %c0_i32, %c0_i32_0 : i32, i32
  }
  func.func @transform_3(%arg0: i32) -> (i32, i32) {
    %c0_i32 = arith.constant 0 : i32
    %c0_i32_0 = arith.constant 0 : i32
    return %arg0, %c0_i32 : i32, i32
  }
}

module attributes {stable_mosaic.version = 11 : i64} {
  func.func @_conv_gemm_kernel(%arg0: i32, %arg1: memref<50x1152xbf16, #tpu.memory_space<vmem>>, %arg2: memref<1152x128xbf16, #tpu.memory_space<vmem>>, %arg3: memref<1x128xf32, #tpu.memory_space<vmem>>, %arg4: memref<50x128xbf16, #tpu.memory_space<vmem>>) attributes {dimension_semantics = [#tpu.dimension_semantics<parallel>], iteration_bounds = array<i64: 1>, scalar_prefetch = 0 : i64, scratch_operands = 0 : i64, tpu.core_type = #tpu.core_type<tc>, window_params = [{transform_indices = @transform_0, window_bounds = array<i64: 50, 1152>}, {pipeline_mode = #tpu.pipeline_mode<synchronous>, transform_indices = @transform_1, window_bounds = array<i64: 1152, 128>}, {pipeline_mode = #tpu.pipeline_mode<synchronous>, transform_indices = @transform_2, window_bounds = array<i64: 1, 128>}, {transform_indices = @transform_3, window_bounds = array<i64: 50, 128>}]} {
    %c0 = arith.constant 0 : index
    %c0_0 = arith.constant 0 : index
    %0 = vector.load %arg1[%c0, %c0_0] : memref<50x1152xbf16, #tpu.memory_space<vmem>>, vector<50x1152xbf16>
    %c0_1 = arith.constant 0 : index
    %c0_2 = arith.constant 0 : index
    %1 = vector.load %arg2[%c0_1, %c0_2] : memref<1152x128xbf16, #tpu.memory_space<vmem>>, vector<1152x128xbf16>
    %cst = arith.constant dense<0.000000e+00> : vector<50x128xf32>
    %2 = tpu.matmul %0, %1, %cst {dimension_numbers = #tpu.dot_dimension_numbers<[1], [0], [0], [1], [0, 0, 1, 1], [], []>} : vector<50x1152xbf16>, vector<1152x128xbf16>, vector<50x128xf32> -> vector<50x128xf32>
    %c0_3 = arith.constant 0 : index
    %c0_4 = arith.constant 0 : index
    %3 = vector.load %arg3[%c0_3, %c0_4] : memref<1x128xf32, #tpu.memory_space<vmem>>, vector<1x128xf32>
    %4 = vector.broadcast %3 : vector<1x128xf32> to vector<50x128xf32>
    %5 = arith.addf %2, %4 : vector<50x128xf32>
    %6 = arith.negf %5 : vector<50x128xf32>
    %7 = math.exp %6 : vector<50x128xf32>
    %cst_5 = arith.constant 1.000000e+00 : f32
    %8 = vector.broadcast %cst_5 : f32 to vector<50x128xf32>
    %9 = arith.addf %8, %7 : vector<50x128xf32>
    %10 = arith.divf %8, %9 : vector<50x128xf32>
    %11 = arith.mulf %5, %10 : vector<50x128xf32>
    %12 = arith.truncf %11 : vector<50x128xf32> to vector<50x128xbf16>
    %c0_6 = arith.constant 0 : index
    %c0_7 = arith.constant 0 : index
    %13 = vector.load %arg4[%c0_6, %c0_7] : memref<50x128xbf16, #tpu.memory_space<vmem>>, vector<50x128xbf16>
    tpu.vector_store %arg4[%c0_6, %c0_7], %12 {strides = array<i32>} : memref<50x128xbf16, #tpu.memory_space<vmem>>, vector<50x128xbf16>,
    return
  }
  func.func @transform_0(%arg0: i32) -> (i32, i32) {
    %c0_i32 = arith.constant 0 : i32
    %c0_i32_0 = arith.constant 0 : i32
    return %arg0, %c0_i32 : i32, i32
  }
  func.func @transform_1(%arg0: i32) -> (i32, i32) {
    %c0_i32 = arith.constant 0 : i32
    %c0_i32_0 = arith.constant 0 : i32
    %c0_i32_1 = arith.constant 0 : i32
    return %c0_i32, %c0_i32_0 : i32, i32
  }
  func.func @transform_2(%arg0: i32) -> (i32, i32) {
    %c0_i32 = arith.constant 0 : i32
    %c0_i32_0 = arith.constant 0 : i32
    %c0_i32_1 = arith.constant 0 : i32
    return %c0_i32, %c0_i32_0 : i32, i32
  }
  func.func @transform_3(%arg0: i32) -> (i32, i32) {
    %c0_i32 = arith.constant 0 : i32
    %c0_i32_0 = arith.constant 0 : i32
    return %arg0, %c0_i32 : i32, i32
  }
}

module attributes {stable_mosaic.version = 11 : i64} {
  func.func @_tail_kernel(%arg0: memref<2x1152xbf16, #tpu.memory_space<vmem>>, %arg1: memref<2x1152xbf16, #tpu.memory_space<vmem>>, %arg2: memref<1152x512xbf16, #tpu.memory_space<vmem>>, %arg3: memref<1x512xf32, #tpu.memory_space<vmem>>, %arg4: memref<512x128xbf16, #tpu.memory_space<vmem>>, %arg5: memref<1x128xf32, #tpu.memory_space<vmem>>, %arg6: memref<2x128xf32, #tpu.memory_space<vmem>>) attributes {dimension_semantics = [], scalar_prefetch = 0 : i64, scratch_operands = 0 : i64, tpu.core_type = #tpu.core_type<tc>} {
    %c0 = arith.constant 0 : index
    %c0_0 = arith.constant 0 : index
    %0 = vector.load %arg0[%c0, %c0_0] : memref<2x1152xbf16, #tpu.memory_space<vmem>>, vector<2x1152xbf16>
    %1 = arith.extf %0 : vector<2x1152xbf16> to vector<2x1152xf32>
    %c0_1 = arith.constant 0 : index
    %c0_2 = arith.constant 0 : index
    %2 = vector.load %arg1[%c0_1, %c0_2] : memref<2x1152xbf16, #tpu.memory_space<vmem>>, vector<2x1152xbf16>
    %3 = arith.extf %2 : vector<2x1152xbf16> to vector<2x1152xf32>
    %4 = arith.addf %1, %3 : vector<2x1152xf32>
    %5 = arith.truncf %4 : vector<2x1152xf32> to vector<2x1152xbf16>
    %c0_3 = arith.constant 0 : index
    %c0_4 = arith.constant 0 : index
    %6 = vector.load %arg2[%c0_3, %c0_4] : memref<1152x512xbf16, #tpu.memory_space<vmem>>, vector<1152x512xbf16>
    %cst = arith.constant dense<0.000000e+00> : vector<2x512xf32>
    %7 = tpu.matmul %5, %6, %cst {dimension_numbers = #tpu.dot_dimension_numbers<[1], [0], [0], [1], [0, 0, 1, 1], [], []>} : vector<2x1152xbf16>, vector<1152x512xbf16>, vector<2x512xf32> -> vector<2x512xf32>
    %c0_5 = arith.constant 0 : index
    %c0_6 = arith.constant 0 : index
    %8 = vector.load %arg3[%c0_5, %c0_6] : memref<1x512xf32, #tpu.memory_space<vmem>>, vector<1x512xf32>
    %9 = vector.broadcast %8 : vector<1x512xf32> to vector<2x512xf32>
    %10 = arith.addf %7, %9 : vector<2x512xf32>
    %11 = arith.negf %10 : vector<2x512xf32>
    %12 = math.exp %11 : vector<2x512xf32>
    %cst_7 = arith.constant 1.000000e+00 : f32
    %13 = vector.broadcast %cst_7 : f32 to vector<2x512xf32>
    %14 = arith.addf %13, %12 : vector<2x512xf32>
    %15 = arith.divf %13, %14 : vector<2x512xf32>
    %16 = arith.mulf %10, %15 : vector<2x512xf32>
    %17 = arith.truncf %16 : vector<2x512xf32> to vector<2x512xbf16>
    %c0_8 = arith.constant 0 : index
    %c0_9 = arith.constant 0 : index
    %18 = vector.load %arg4[%c0_8, %c0_9] : memref<512x128xbf16, #tpu.memory_space<vmem>>, vector<512x128xbf16>
    %cst_10 = arith.constant dense<0.000000e+00> : vector<2x128xf32>
    %19 = tpu.matmul %17, %18, %cst_10 {dimension_numbers = #tpu.dot_dimension_numbers<[1], [0], [0], [1], [0, 0, 1, 1], [], []>} : vector<2x512xbf16>, vector<512x128xbf16>, vector<2x128xf32> -> vector<2x128xf32>
    %c0_11 = arith.constant 0 : index
    %c0_12 = arith.constant 0 : index
    %20 = vector.load %arg5[%c0_11, %c0_12] : memref<1x128xf32, #tpu.memory_space<vmem>>, vector<1x128xf32>
    %21 = vector.broadcast %20 : vector<1x128xf32> to vector<2x128xf32>
    %22 = arith.addf %19, %21 : vector<2x128xf32>
    %c0_13 = arith.constant 0 : index
    %c0_14 = arith.constant 0 : index
    %23 = vector.load %arg6[%c0_13, %c0_14] : memref<2x128xf32, #tpu.memory_space<vmem>>, vector<2x128xf32>
    tpu.vector_store %arg6[%c0_13, %c0_14], %22 {strides = array<i32>} : memref<2x128xf32, #tpu.memory_space<vmem>>, vector<2x128xf32>,
    return
  }
}

</mosaic_0001>

<bundles_post_ra>
// kernel: net_forward.7
= control target key start
LH: loop header
LB: loop body
LE: loop exit
PB: predicated region body
PF: predicated region fallthrough
CT: control target
= control target key end

     0   :  { %8 = vsyncpa [#allocation3], 0  ;;  %s778_s0 = inlined_call_operand.vmem [shape: bf16[98,9], index: 0, kind: input, shape index: {}]   ;;  %s779_s1 = inlined_call_operand.hbm [shape: bf16[9,128], index: 1, kind: input, shape index: {}]   ;;  %s780_s2 = inlined_call_operand.hbm [shape: f32[1,128], index: 2, kind: input, shape index: {}]   ;;  %s781_s3 = inlined_call_operand.vmem [shape: bf16[98,128], index: 3, kind: output, shape index: {}]  }
   0x1   :  { %9 = vsyncpa [#allocation5], 0  ;;  %s622_s12 = smov [#allocation2]  }
   0x2   :  { %s17_s13 = sshll.u32 %s622_s12, 4  ;;  %s18_s13 = int_to_ptr.vmem [resolvable:$true] %s17_s13 }
   0x3   :  { %s586_s14 = scalar_lea.vmem %s18_s13, 128  ;;  %p591_p1 = scmp.lt.s32.totalorder %s18_s13, %s18_s13 }
   0x4   :  { %p587_p0 = scmp.ne.s32.totalorder %s18_s13, %s586_s14  ;;  %p592_p2 = scmp.lt.s32.totalorder %s586_s14, %s586_s14 }
   0x6   :  { %p593_p3 = por %p592_p2, %p591_p1 }
   0x8   :  { %p594_p4 = pnand %p593_p3, %p587_p0 }
   0xa   :  { %597 = shalt.err (!%p594_p4)
}
   0xb   :  { %s623_s15 = smov 64   ;;  %s624_s16 = smov 4  }
   0xc   :  { %23 = dma.hbm_to_vmem [thread:$0]  %s779_s1, 128, %s18_s13, [#allocation3], %s623_s15, %s623_s15, %s624_s16  }
   0xd   :  { %s625_s19 = smov [#allocation4]  }
   0xe   :  { %s30_s20 = sshll.u32 %s625_s19, 4  ;;  %s31_s20 = int_to_ptr.vmem [resolvable:$true] %s30_s20 }
   0xf   :  { %s606_s21 = scalar_lea.vmem %s31_s20, 16  ;;  %s610_s22 = scalar_lea.vmem %s31_s20, 32 }
  0x10   :  { %p607_p5 = scmp.ne.s32.totalorder %s31_s20, %s606_s21  ;;  %p611_p6 = scmp.lt.s32.totalorder %s31_s20, %s31_s20 }
  0x11   :  { %p612_p7 = scmp.lt.s32.totalorder %s610_s22, %s606_s21 }
  0x13   :  { %p613_p8 = por %p612_p7, %p611_p6 }
  0x15   :  { %p614_p9 = pnand %p613_p8, %p607_p5 }
  0x17   :  { %617 = shalt.err (!%p614_p9)
}
  0x18   :  { %33 = dma.hbm_to_vmem [thread:$0]  %s780_s2, 16, %s31_s20, [#allocation5]  }
  0x19   :  { %618 = dma.done.wait [#allocation3], 128  }
  0x1a   :  { %619 = vsyncadd [#allocation3], 4294967168 }
  0x1b   :  { %620 = dma.done.wait [#allocation5], 16  }
  0x1c   :  { %621 = vsyncadd [#allocation5], 4294967280  ;;  %vm123_vm0 = vcmask 1043456   ;;  %v626_v0 = vmov 0.0   ;;  %vm627_vm1 = vmmov 0   ;;  %vm124_vm2 = vcmask 1044480  }
  0x1d   :  { %479 = vmatprep.subr.bf16.mxu0 %v626_v0  ;;  %509 = vmatprep.subr.bf16.mxu1 %v626_v0  ;;  %v628_v1 = vmov 65535   ;;  %v518_v4 = vld [vmem:[#allocation2] sm:$0x1f]   ;;  %vm101_vm3 = vcmask 72704   ;;  %v521_v8 = vld [vmem:[%s778_s0 + $0x8] sm:$0xff]   ;;  %v523_v10 = vld [vmem:[%s778_s0 + $0x10] sm:$0xff]  }
  0x1e   :  { %481 = vmatprep.mubr.msk.bf16.mxu0 %vm627_vm1, %v626_v0  ;;  %497 = vmatprep.mubr.msk.bf16.mxu1 %vm627_vm1, %v626_v0  ;;  %v125_v2 = vsel %vm123_vm0, 4294967295, %v628_v1  ;;  %v519_v6 = vld [vmem:[%s778_s0] sm:$0xff]   ;;  %v522_v9 = vld [vmem:[%s778_s0 + $0x28] sm:$0xff]   ;;  %v524_v11 = vld [vmem:[%s778_s0 + $0x30] ss:$0 sps:$4 sm:$0x11]  }
  0x1f   :  { %v126_v3 = vsel %vm124_vm2, %v125_v2, 0  ;;  %v520_v7 = vld [vmem:[%s778_s0 + $0x20] sm:$0xff]   ;;  %v525_v12 = vld [vmem:[%s778_s0 + $0x18] sm:$0xff]   ;;  %v690_v13 = vld [vmem:[#allocation4] ss:$0 sm:$0xff] }
  0x20   :  { %v128_v5 = vand.u32 %v518_v4, %v126_v3 }
  0x22   :  { %480 = vmatpush3.bf16.msra.mxu0 %v128_v5  ;;  %510 = vmatpush3.bf16.msra.mxu1 %v128_v5 }
  0x25   :  { %482 = vmatmul.mubr.msk.bf16.vlgmr.msra.gmra.mxu0 %vm101_vm3, %v519_v6  ;;  %498 = vmatmul.mubr.msk.bf16.vlgmr.msra.gmra.mxu1 %vm101_vm3, %v520_v7 }
  0x26   :  { %485 = vmatprep.mubr.msk.bf16.mxu0 %vm627_vm1, %v626_v0  ;;  %501 = vmatprep.mubr.msk.bf16.mxu1 %vm627_vm1, %v626_v0 }
  0x2d   :  { %486 = vmatmul.mubr.msk.bf16.gmra.mxu0 %vm101_vm3, %v521_v8  ;;  %502 = vmatmul.mubr.msk.bf16.gmra.mxu1 %vm101_vm3, %v522_v9 }
  0x2e   :  { %489 = vmatprep.mubr.msk.bf16.mxu0 %vm627_vm1, %v626_v0  ;;  %505 = vmatprep.mubr.msk.bf16.mxu1 %vm627_vm1, %v626_v0 }
  0x35   :  { %490 = vmatmul.mubr.msk.bf16.gmra.mxu0 %vm101_vm3, %v523_v10  ;;  %506 = vmatmul.mubr.msk.bf16.gmra.mxu1 %vm101_vm3, %v524_v11 }
  0x36   :  { %493 = vmatprep.mubr.msk.bf16.mxu0 %vm627_vm1, %v626_v0 }
  0x3d   :  { %494 = vmatmul.mubr.msk.bf16.gmra.mxu0 %vm101_vm3, %v525_v12 }
  0xe5   :  { %v164_v14 = vpop.f32.mrf.mxu0  ;;  %v196_v15 = vpop.f32.mrf.mxu1 }
  0xe6   :  { %v693_v16 = vadd.f32 %v690_v13, %v164_v14  ;;  %v696_v17 = vadd.f32 %v690_v13, %v196_v15 }
  0xe7   :  { %v483_v18 = vpop.f32.mrf.mxu0  ;;  %v499_v19 = vpop.f32.mrf.mxu1 }
  0xe8   :  { %v397_v20 = vmul.f32 -1.442695, %v693_v16  ;;  %v405_v21 = vmul.f32 -1.442695, %v696_v17 }
  0xe9   :  { %v167_v22 = vpop.f32.mrf.mxu0  ;;  %v199_v23 = vpop.f32.mrf.mxu1 }
  0xea   :  { %526 = vpow2.f32 %v397_v20  ;;  %v701_v24 = vadd.f32 %v690_v13, %v167_v22  ;;  %v704_v25 = vadd.f32 %v690_v13, %v199_v23 }
  0xeb   :  { %528 = vpow2.f32 %v405_v21  ;;  %v484_v26 = vpop.f32.mrf.mxu0  ;;  %v500_v27 = vpop.f32.mrf.mxu1 }
  0xec   :  { %v398_v28 = vmul.f32 -1.442695, %v701_v24  ;;  %v406_v29 = vmul.f32 -1.442695, %v704_v25 }
  0xed   :  { %v172_v30 = vpop.f32.mrf.mxu0  ;;  %v204_v31 = vpop.f32.mrf.mxu1 }
  0xee   :  { %530 = vpow2.f32 %v398_v28  ;;  %v709_v32 = vadd.f32 %v690_v13, %v172_v30  ;;  %v712_v33 = vadd.f32 %v690_v13, %v204_v31 }
  0xef   :  { %532 = vpow2.f32 %v406_v29  ;;  %v487_v34 = vpop.f32.mrf.mxu0  ;;  %v503_v35 = vpop.f32.mrf.mxu1 }
  0xf0   :  { %v399_v36 = vmul.f32 -1.442695, %v709_v32  ;;  %v407_v37 = vmul.f32 -1.442695, %v712_v33 }
  0xf1   :  { %v175_v38 = vpop.f32.mrf.mxu0  ;;  %v207_v39 = vpop.f32.mrf.mxu1 }
  0xf2   :  { %534 = vpow2.f32 %v399_v36  ;;  %v717_v40 = vadd.f32 %v690_v13, %v175_v38  ;;  %v720_v41 = vadd.f32 %v690_v13, %v207_v39 }
  0xf3   :  { %536 = vpow2.f32 %v407_v37  ;;  %v488_v42 = vpop.f32.mrf.mxu0  ;;  %v504_v43 = vpop.f32.mrf.mxu1 }
  0xf4   :  { %v400_v44 = vmul.f32 -1.442695, %v717_v40  ;;  %v408_v45 = vmul.f32 -1.442695, %v720_v41 }
  0xf5   :  { %v180_v46 = vpop.f32.mrf.mxu0  ;;  %v212_v47 = vpop.f32.mrf.mxu1 }
  0xf6   :  { %538 = vpow2.f32 %v400_v44  ;;  %v725_v48 = vadd.f32 %v690_v13, %v180_v46  ;;  %v728_v49 = vadd.f32 %v690_v13, %v212_v47 }
  0xf7   :  { %v527_v50 = vpop.eup %526  ;;  %540 = vpow2.f32 %v408_v45  ;;  %v491_v51 = vpop.f32.mrf.mxu0 }
  0xf8   :  { %v507_v52 = vpop.f32.mrf.mxu1  ;;  %v529_v53 = vpop.eup %528  ;;  %v257_v54 = vadd.f32 1.0, %v527_v50  ;;  %v401_v55 = vmul.f32 -1.442695, %v725_v48  ;;  %v409_v57 = vmul.f32 -1.442695, %v728_v49 }
  0xf9   :  { %v265_v56 = vadd.f32 1.0, %v529_v53  ;;  %v183_v58 = vpop.f32.mrf.mxu0 }
  0xfa   :  { %v215_v59 = vpop.f32.mrf.mxu1  ;;  %542 = vrcp.f32 %v257_v54  ;;  %v733_v60 = vadd.f32 %v690_v13, %v183_v58 }
  0xfb   :  { %v531_v61 = vpop.eup %530  ;;  %544 = vrcp.f32 %v265_v56  ;;  %v492_v62 = vpop.f32.mrf.mxu0 }
  0xfc   :  { %v508_v63 = vpop.f32.mrf.mxu1  ;;  %v533_v0 = vpop.eup %532  ;;  %v258_v1 = vadd.f32 1.0, %v531_v61  ;;  %546 = vpow2.f32 %v401_v55  ;;  %v402_v2 = vmul.f32 -1.442695, %v733_v60 }
  0xfd   :  { %v266_v3 = vadd.f32 1.0, %v533_v0  ;;  %548 = vpow2.f32 %v409_v57  ;;  %v188_v4 = vpop.f32.mrf.mxu0 }
  0xfe   :  { %550 = vrcp.f32 %v258_v1  ;;  %v737_v5 = vadd.f32 %v690_v13, %v188_v4 }
  0xff   :  { %v535_v6 = vpop.eup %534  ;;  %552 = vrcp.f32 %v266_v3  ;;  %v495_v7 = vpop.f32.mrf.mxu0 }
 0x100   :  { %v537_v8 = vpop.eup %536  ;;  %v259_v9 = vadd.f32 1.0, %v535_v6  ;;  %554 = vpow2.f32 %v402_v2  ;;  %v403_v10 = vmul.f32 -1.442695, %v737_v5 }
 0x101   :  { %v267_v11 = vadd.f32 1.0, %v537_v8  ;;  %v191_v12 = vpop.f32.mrf.mxu0 }
 0x102   :  { %v741_v14 = vadd.f32 %v690_v13, %v191_v12  ;;  %556 = vrcp.f32 %v259_v9 }
 0x103   :  { %v539_v15 = vpop.eup %538  ;;  %v496_v18 = vpop.f32.mrf.mxu0  ;;  %558 = vpow2.f32 %v403_v10 }
 0x104   :  { %v541_v19 = vpop.eup %540  ;;  %v260_v20 = vadd.f32 1.0, %v539_v15  ;;  %v404_v21 = vmul.f32 -1.442695, %v741_v14  ;;  %560 = vrcp.f32 %v267_v11 }
 0x105   :  { %v268_v22 = vadd.f32 1.0, %v541_v19 }
 0x106   :  { %562 = vrcp.f32 %v260_v20 }
 0x107   :  { %v543_v23 = vpop.eup %542  ;;  %564 = vrcp.f32 %v268_v22 }
 0x108   :  { %v545_v26 = vpop.eup %544  ;;  %566 = vpow2.f32 %v404_v21  ;;  %v296_v34 = vmul.f32 %v543_v23, %v693_v16 }
 0x109   :  { %v547_v27 = vpop.eup %546  ;;  %v304_v37 = vmul.f32 %v545_v26, %v696_v17 }
 0x10a   :  { %v549_v28 = vpop.eup %548  ;;  %v261_v29 = vadd.f32 1.0, %v547_v27 }
 0x10b   :  { %v551_v13 = vpop.eup %550  ;;  %v269_v30 = vadd.f32 1.0, %v549_v28 }
 0x10c   :  { %v553_v31 = vpop.eup %552  ;;  %v297_v35 = vmul.f32 %v551_v13, %v701_v24 }
 0x10d   :  { %v555_v36 = vpop.eup %554  ;;  %v305_v38 = vmul.f32 %v553_v31, %v704_v25  ;;  %568 = vrcp.f32 %v269_v30 }
 0x10e   :  { %v439_v39 = vpack.c.bf16 %v297_v35, %v296_v34  ;;  %570 = vrcp.f32 %v261_v29  ;;  %v262_v42 = vadd.f32 1.0, %v555_v36 }
 0x10f   :  { %v459_v43 = vpack.c.bf16 %v305_v38, %v304_v37  ;;  %v557_v44 = vpop.eup %556 }
 0x110   :  { %440 = vst [vmem:[%s781_s3] sm:$0xff] %v439_v39   ;;  %572 = vrcp.f32 %v262_v42  ;;  %v559_v45 = vpop.eup %558  ;;  %v298_v46 = vmul.f32 %v557_v44, %v709_v32 }
 0x111   :  { %469 = vst [vmem:[%s781_s3 + $0x20] sm:$0xff] %v459_v43   ;;  %v561_v16 = vpop.eup %560  ;;  %v263_v17 = vadd.f32 1.0, %v559_v45 }
 0x112   :  { %v306_v51 = vmul.f32 %v561_v16, %v712_v33 }
 0x113   :  { %v563_v24 = vpop.eup %562  ;;  %574 = vrcp.f32 %v263_v17 }
 0x114   :  { %v565_v25 = vpop.eup %564  ;;  %v299_v47 = vmul.f32 %v563_v24, %v717_v40 }
 0x115   :  { %v567_v50 = vpop.eup %566  ;;  %v307_v52 = vmul.f32 %v565_v25, %v720_v41 }
 0x116   :  { %v444_v53 = vpack.c.bf16 %v299_v47, %v298_v46  ;;  %v264_v54 = vadd.f32 1.0, %v567_v50 }
 0x117   :  { %v464_v55 = vpack.c.bf16 %v307_v52, %v306_v51 }
 0x118   :  { %466 = vst [vmem:[%s781_s3 + $0x8] sm:$0xff] %v444_v53   ;;  %576 = vrcp.f32 %v264_v54 }
 0x119   :  { %470 = vst [vmem:[%s781_s3 + $0x28] sm:$0xff] %v464_v55  }
 0x11a   :  { %v569_v32 = vpop.eup %568 }
 0x11b   :  { %v571_v40 = vpop.eup %570  ;;  %v308_v56 = vmul.f32 %v569_v32, %v728_v49 }
 0x11c   :  { %v300_v41 = vmul.f32 %v571_v40, %v725_v48 }
 0x11d   :  { %v573_v33 = vpop.eup %572  ;;  %v435_v57 = vpack.c.bf16 %v308_v56, %v308_v56 }
 0x11e   :  { %v301_v58 = vmul.f32 %v573_v33, %v733_v60 }
 0x11f   :  { %374 = vst [vmem:[%s781_s3 + $0x30] sm:$0x1] %v435_v57 }
 0x120   :  { %v449_v59 = vpack.c.bf16 %v301_v58, %v300_v41  ;;  %v575_v61 = vpop.eup %574 }
 0x121   :  { %v302_v63 = vmul.f32 %v575_v61, %v737_v5 }
 0x122   :  { %467 = vst [vmem:[%s781_s3 + $0x10] sm:$0xff] %v449_v59  }
 0x125   :  { %v577_v62 = vpop.eup %576 }
 0x126   :  { %v303_v49 = vmul.f32 %v577_v62, %v741_v14 }
 0x128   :  { %v454_v0 = vpack.c.bf16 %v303_v49, %v302_v63 }
 0x12a   :  { %468 = vst [vmem:[%s781_s3 + $0x18] sm:$0xff] %v454_v0  }
 0x12b   :  { %379 = vsyncpa [#allocation3], 1 }
 0x12c   :  { %380 = vsyncpa [#allocation5], 1 }

// kernel: net_forward.8
= control target key start
LH: loop header
LB: loop body
LE: loop exit
PB: predicated region body
PF: predicated region fallthrough
CT: control target
= control target key end

     0   :  { %8 = vsyncpa [#allocation3], 0  ;;  %s1479_s0 = inlined_call_operand.vmem [shape: bf16[18,1152], index: 0, kind: input, shape index: {}]   ;;  %s1480_s1 = inlined_call_operand.hbm [shape: bf16[1152,128], index: 1, kind: input, shape index: {}]   ;;  %s1481_s2 = inlined_call_operand.hbm [shape: f32[1,128], index: 2, kind: input, shape index: {}]   ;;  %s1482_s3 = inlined_call_operand.vmem [shape: bf16[18,128], index: 3, kind: output, shape index: {}]  }
   0x1   :  { %9 = vsyncpa [#allocation5], 0  ;;  %s1401_s12 = smov [#allocation2]  }
   0x2   :  { %s17_s13 = sshll.u32 %s1401_s12, 4  ;;  %s18_s13 = int_to_ptr.vmem [resolvable:$true] %s17_s13 }
   0x3   :  { %s1365_s14 = scalar_lea.vmem %s18_s13, 9216  ;;  %p1370_p1 = scmp.lt.s32.totalorder %s18_s13, %s18_s13 }
   0x4   :  { %p1366_p0 = scmp.ne.s32.totalorder %s18_s13, %s1365_s14  ;;  %p1371_p2 = scmp.lt.s32.totalorder %s1365_s14, %s1365_s14 }
   0x6   :  { %p1372_p3 = por %p1371_p2, %p1370_p1 }
   0x8   :  { %p1373_p4 = pnand %p1372_p3, %p1366_p0 }
   0xa   :  { %1376 = shalt.err (!%p1373_p4)
}
   0xb   :  { %s1402_s15 = smov 64   ;;  %s1403_s16 = smov 4  }
   0xc   :  { %23 = dma.hbm_to_vmem [thread:$0]  %s1480_s1, 9216, %s18_s13, [#allocation3], %s1402_s15, %s1402_s15, %s1403_s16  }
   0xd   :  { %s1404_s19 = smov [#allocation4]  }
   0xe   :  { %s30_s20 = sshll.u32 %s1404_s19, 4  ;;  %s31_s20 = int_to_ptr.vmem [resolvable:$true] %s30_s20 }
   0xf   :  { %s1385_s21 = scalar_lea.vmem %s31_s20, 16  ;;  %s1389_s22 = scalar_lea.vmem %s31_s20, 32 }
  0x10   :  { %p1386_p5 = scmp.ne.s32.totalorder %s31_s20, %s1385_s21  ;;  %p1390_p6 = scmp.lt.s32.totalorder %s31_s20, %s31_s20 }
  0x11   :  { %p1391_p7 = scmp.lt.s32.totalorder %s1389_s22, %s1385_s21 }
  0x13   :  { %p1392_p8 = por %p1391_p7, %p1390_p6 }
  0x15   :  { %p1393_p9 = pnand %p1392_p8, %p1386_p5 }
  0x17   :  { %1396 = shalt.err (!%p1393_p9)
}
  0x18   :  { %33 = dma.hbm_to_vmem [thread:$0]  %s1481_s2, 16, %s31_s20, [#allocation5]  }
  0x19   :  { %1397 = dma.done.wait [#allocation3], 9216  }
  0x1a   :  { %1398 = vsyncadd [#allocation3], 4294958080 }
  0x1b   :  { %1399 = dma.done.wait [#allocation5], 16  }
  0x1c   :  { %1400 = vsyncadd [#allocation5], 4294967280  ;;  %v1251_v0 = vld [vmem:[#allocation2 + $0x78] sm:$0xff]   ;;  %v1255_v4 = vld [vmem:[#allocation2 + $0x70] sm:$0xff]  }
  0x1d   :  { %v1252_v1 = vld [vmem:[#allocation2 + $0x38] sm:$0xff]   ;;  %1105 = vmatprep.subr.bf16.mxu0 %v1251_v0  ;;  %v1256_v5 = vld [vmem:[#allocation2 + $0x30] sm:$0xff]   ;;  %v1259_v8 = vld [vmem:[#allocation2 + $0x68] sm:$0xff]  }
  0x1e   :  { %v1253_v2 = vld [vmem:[#allocation2 + $0xf8] sm:$0xff]   ;;  %1106 = vmatpush3.bf16.msra.mxu0 %v1252_v1  ;;  %v1257_v6 = vld [vmem:[#allocation2 + $0xf0] sm:$0xff]   ;;  %v1260_v9 = vld [vmem:[#allocation2 + $0x28] sm:$0xff]  }
  0x1f   :  { %v1254_v3 = vld [vmem:[#allocation2 + $0xb8] sm:$0xff]   ;;  %1133 = vmatprep.subr.bf16.mxu1 %v1253_v2  ;;  %1107 = vmatprep.subr.bf16.mxu0 %v1255_v4  ;;  %v1258_v7 = vld [vmem:[#allocation2 + $0xb0] sm:$0xff]   ;;  %v1261_v10 = vld [vmem:[#allocation2 + $0xe8] sm:$0xff]  }
  0x20   :  { %1134 = vmatpush3.bf16.msra.mxu1 %v1254_v3  ;;  %v1262_v11 = vld [vmem:[#allocation2 + $0xa8] sm:$0xff]   ;;  %v1263_v12 = vld [vmem:[#allocation2 + $0x60] sm:$0xff]   ;;  %v1267_v16 = vld [vmem:[#allocation2 + $0x58] sm:$0xff]  }
  0x21   :  { %1135 = vmatprep.subr.bf16.mxu1 %v1257_v6  ;;  %v1264_v13 = vld [vmem:[#allocation2 + $0x20] sm:$0xff]   ;;  %v1268_v17 = vld [vmem:[#allocation2 + $0x18] sm:$0xff]   ;;  %v1271_v20 = vld [vmem:[#allocation2 + $0x50] sm:$0xff]  }
  0x22   :  { %1108 = vmatpush3.bf16.msra.mxu0 %v1256_v5  ;;  %v1265_v14 = vld [vmem:[#allocation2 + $0xe0] sm:$0xff]   ;;  %v1269_v18 = vld [vmem:[#allocation2 + $0xd8] sm:$0xff]   ;;  %v1272_v21 = vld [vmem:[#allocation2 + $0x10] sm:$0xff]  }
  0x23   :  { %1109 = vmatprep.subr.bf16.mxu0 %v1259_v8  ;;  %v1266_v15 = vld [vmem:[#allocation2 + $0xa0] sm:$0xff]   ;;  %v1270_v19 = vld [vmem:[#allocation2 + $0x98] sm:$0xff]   ;;  %v1273_v22 = vld [vmem:[#allocation2 + $0xd0] sm:$0xff]  }
  0x24   :  { %1136 = vmatpush3.bf16.msra.mxu1 %v1258_v7  ;;  %v1274_v23 = vld [vmem:[#allocation2 + $0x90] sm:$0xff]   ;;  %v1275_v24 = vld [vmem:[#allocation2 + $0x48] sm:$0xff]   ;;  %v1279_v28 = vld [vmem:[#allocation2 + $0x40] sm:$0xff]  }
  0x25   :  { %1137 = vmatprep.subr.bf16.mxu1 %v1261_v10  ;;  %v1276_v25 = vld [vmem:[#allocation2 + $0x8] sm:$0xff]   ;;  %v1280_v29 = vld [vmem:[#allocation2] sm:$0xff]   ;;  %v1286_v34 = vld [vmem:[#allocation2 + $0x178] sm:$0xff]  }
  0x26   :  { %1110 = vmatpush3.bf16.msra.mxu0 %v1260_v9  ;;  %v1277_v26 = vld [vmem:[#allocation2 + $0xc8] sm:$0xff]   ;;  %v1281_v30 = vld [vmem:[#allocation2 + $0xc0] sm:$0xff]   ;;  %v1290_v37 = vld [vmem:[#allocation2 + $0x138] sm:$0xff]  }
  0x27   :  { %1111 = vmatprep.subr.bf16.mxu0 %v1263_v12  ;;  %v1278_v27 = vld [vmem:[#allocation2 + $0x88] sm:$0xff]   ;;  %v1282_v31 = vld [vmem:[%s1479_s0] ss:$36 sps:$4 sm:$0xff]   ;;  %v1291_v38 = vld [vmem:[#allocation2 + $0x1f8] sm:$0xff]  }
  0x28   :  { %1138 = vmatpush3.bf16.msra.mxu1 %v1262_v11  ;;  %v1284_v32 = vld [vmem:[%s1479_s0 + $0x4] ss:$36 sps:$4 sm:$0xff]   ;;  %v1289_v36 = vld [vmem:[%s1479_s0 + $0xc] ss:$36 sps:$4 sm:$0xff]   ;;  %v1292_v39 = vld [vmem:[#allocation2 + $0x1b8] sm:$0xff]  }
  0x29   :  { %1139 = vmatprep.subr.bf16.mxu1 %v1265_v14  ;;  %v1285_v33 = vld [vmem:[#allocation2 + $0x80] sm:$0xff]   ;;  %749 = vmatprep.mubr.bf16.mxu0 %v1284_v32  ;;  %v1287_v35 = vld [vmem:[%s1479_s0 + $0x8] ss:$36 sps:$4 sm:$0xff]   ;;  %v1293_v40 = vld [vmem:[#allocation2 + $0x170] sm:$0xff]  }
  0x2a   :  { %1112 = vmatpush3.bf16.msra.mxu0 %v1264_v13  ;;  %797 = vmatprep.mubr.bf16.mxu1 %v1289_v36  ;;  %v1294_v41 = vld [vmem:[#allocation2 + $0x130] sm:$0xff]   ;;  %v1297_v44 = vld [vmem:[#allocation2 + $0x168] sm:$0xff]   ;;  %v1301_v48 = vld [vmem:[#allocation2 + $0x160] sm:$0xff]  }
  0x2b   :  { %1113 = vmatprep.subr.bf16.mxu0 %v1267_v16  ;;  %v1295_v42 = vld [vmem:[#allocation2 + $0x1f0] sm:$0xff]   ;;  %v1298_v45 = vld [vmem:[#allocation2 + $0x128] sm:$0xff]   ;;  %v1302_v49 = vld [vmem:[#allocation2 + $0x120] sm:$0xff]  }
  0x2c   :  { %1140 = vmatpush3.bf16.msra.mxu1 %v1266_v15  ;;  %v1296_v43 = vld [vmem:[#allocation2 + $0x1b0] sm:$0xff]   ;;  %v1299_v46 = vld [vmem:[#allocation2 + $0x1e8] sm:$0xff]   ;;  %v1303_v50 = vld [vmem:[#allocation2 + $0x1e0] sm:$0xff]  }
  0x2d   :  { %1141 = vmatprep.subr.bf16.mxu1 %v1269_v18  ;;  %v1300_v47 = vld [vmem:[#allocation2 + $0x1a8] sm:$0xff]   ;;  %v1304_v51 = vld [vmem:[#allocation2 + $0x1a0] sm:$0xff]   ;;  %v1305_v52 = vld [vmem:[#allocation2 + $0x158] sm:$0xff]  }
  0x2e   :  { %1114 = vmatpush3.bf16.msra.mxu0 %v1268_v17  ;;  %v1306_v53 = vld [vmem:[#allocation2 + $0x118] sm:$0xff]   ;;  %v51_v54 = vld [vmem:[%s1479_s0 + $0x48] sm:$0x11]  ;;  %v1311_v59 = vld [vmem:[#allocation2 + $0x150] sm:$0xff]  }
  0x2f   :  { %1115 = vmatprep.subr.bf16.mxu0 %v1271_v20  ;;  %v1011_v55 = vcombine.high %v51_v54, %v51_v54  ;;  %v1308_v56 = vld [vmem:[#allocation2 + $0x1d8] sm:$0xff]   ;;  %v1010_v57 = vcombine.low %v51_v54, %v51_v54  ;;  %v1312_v60 = vld [vmem:[#allocation2 + $0x110] sm:$0xff]   ;;  %v1316_v1 = vld [vmem:[#allocation2 + $0x148] sm:$0xff]  }
  0x30   :  { %1142 = vmatpush3.bf16.msra.mxu1 %v1270_v19  ;;  %v1310_v58 = vld [vmem:[#allocation2 + $0x198] sm:$0xff]   ;;  %v1313_v61 = vld [vmem:[#allocation2 + $0x1d0] sm:$0xff]   ;;  %v1318_v3 = vld [vmem:[#allocation2 + $0x108] sm:$0xff]  }
  0x31   :  { %1143 = vmatprep.subr.bf16.mxu1 %v1273_v22  ;;  %v1314_v62 = vld [vmem:[#allocation2 + $0x190] sm:$0xff]   ;;  %v1319_v4 = vld [vmem:[#allocation2 + $0x1c8] sm:$0xff]   ;;  %v1321_v6 = vld [vmem:[#allocation2 + $0x140] sm:$0xff]  }
  0x32   :  { %1116 = vmatpush3.bf16.msra.mxu0 %v1272_v21  ;;  %v52_v63 = vld [vmem:[%s1479_s0 + $0x50] sm:$0x11]  ;;  %v1320_v5 = vld [vmem:[#allocation2 + $0x188] sm:$0xff]   ;;  %v1322_v7 = vld [vmem:[#allocation2 + $0x100] sm:$0xff]  }
  0x33   :  { %1117 = vmatprep.subr.bf16.mxu0 %v1275_v24  ;;  %v1013_v0 = vcombine.high %v52_v63, %v52_v63  ;;  %v1012_v2 = vcombine.low %v52_v63, %v52_v63  ;;  %v1323_v8 = vld [vmem:[#allocation2 + $0x1c0] sm:$0xff]   ;;  %v1324_v9 = vld [vmem:[%s1479_s0 + $0x10] ss:$36 sps:$4 sm:$0xff]   ;;  %v1328_v12 = vld [vmem:[#allocation2 + $0x238] sm:$0xff]  }
  0x34   :  { %1144 = vmatpush3.bf16.msra.mxu1 %v1274_v23  ;;  %v1326_v10 = vld [vmem:[%s1479_s0 + $0x14] ss:$36 sps:$4 sm:$0xff]   ;;  %v1327_v11 = vld [vmem:[#allocation2 + $0x180] sm:$0xff]   ;;  %v1335_v18 = vld [vmem:[#allocation2 + $0x228] sm:$0xff]  }
  0x35   :  { %1145 = vmatprep.subr.bf16.mxu1 %v1277_v26  ;;  %v1329_v13 = vld [vmem:[%s1479_s0 + $0x18] ss:$36 sps:$4 sm:$0xff]   ;;  %v1332_v15 = vld [vmem:[#allocation2 + $0x230] sm:$0xff]   ;;  %v54_v19 = vld [vmem:[%s1479_s0 + $0x60] sm:$0x11] }
  0x36   :  { %1118 = vmatpush3.bf16.msra.mxu0 %v1276_v25  ;;  %v1331_v14 = vld [vmem:[%s1479_s0 + $0x1c] ss:$36 sps:$4 sm:$0xff]   ;;  %v1017_v21 = vcombine.high %v54_v19, %v54_v19  ;;  %v1016_v22 = vcombine.low %v54_v19, %v54_v19  ;;  %v1340_v26 = vld [vmem:[#allocation2 + $0x210] sm:$0xff]  }
  0x37   :  { %1119 = vmatprep.subr.bf16.mxu0 %v1279_v28  ;;  %v53_v16 = vld [vmem:[%s1479_s0 + $0x58] sm:$0x11]  ;;  %v1338_v23 = vld [vmem:[#allocation2 + $0x220] sm:$0xff]  }
  0x38   :  { %1146 = vmatpush3.bf16.msra.mxu1 %v1278_v27  ;;  %v1015_v17 = vcombine.high %v53_v16, %v53_v16  ;;  %v1014_v20 = vcombine.low %v53_v16, %v53_v16  ;;  %v1343_v24 = vld [vmem:[%s1479_s0 + $0x20] ss:$36 sps:$4 sm:$0xff]   ;;  %v1339_v25 = vld [vmem:[#allocation2 + $0x218] sm:$0xff]   ;;  %v1341_v27 = vld [vmem:[#allocation2 + $0x208] sm:$0xff]  }
  0x39   :  { %1147 = vmatprep.subr.bf16.mxu1 %v1281_v30  ;;  %v1342_v28 = vld [vmem:[#allocation2 + $0x200] sm:$0xff]  }
  0x3a   :  { %1120 = vmatpush3.bf16.msra.mxu0 %v1280_v29  ;;  %v1344_v29 = vld [vmem:[%s1479_s0 + $0x68] ss:$0 sps:$4 sm:$0x11]  }
  0x3b   :  { %1161 = vmatprep.subr.bf16.mxu0 %v1286_v34 }
  0x3c   :  { %1148 = vmatpush3.bf16.msra.mxu1 %v1285_v33 }
  0x3d   :  { %750 = vmatmul.mubr.bf16.vlgmr.msra.gmra.mxu0 %v1282_v31  ;;  %1189 = vmatprep.subr.bf16.mxu1 %v1291_v38 }
  0x3e   :  { %1162 = vmatpush3.bf16.msra.mxu0 %v1290_v37  ;;  %757 = vmatprep.mubr.bf16.mxu0 %v1011_v55 }
  0x3f   :  { %798 = vmatmul.mubr.bf16.vlgmr.msra.gmra.mxu1 %v1287_v35  ;;  %1163 = vmatprep.subr.bf16.mxu0 %v1293_v40 }
  0x40   :  { %1190 = vmatpush3.bf16.msra.mxu1 %v1292_v39  ;;  %805 = vmatprep.mubr.bf16.mxu1 %v1013_v0  ;;  %v1000_v0 = vld [vmem:[#allocation4] ss:$0 sm:$0xff] }
  0x41   :  { %1191 = vmatprep.subr.bf16.mxu1 %v1295_v42 }
  0x42   :  { %1164 = vmatpush3.bf16.msra.mxu0 %v1294_v41 }
  0x43   :  { %1165 = vmatprep.subr.bf16.mxu0 %v1297_v44 }
  0x44   :  { %1192 = vmatpush3.bf16.msra.mxu1 %v1296_v43 }
  0x45   :  { %1193 = vmatprep.subr.bf16.mxu1 %v1299_v46  ;;  %758 = vmatmul.mubr.bf16.gmra.mxu0 %v1010_v57 }
  0x46   :  { %1166 = vmatpush3.bf16.msra.mxu0 %v1298_v45  ;;  %845 = vmatprep.mubr.bf16.mxu0 %v1326_v10 }
  0x47   :  { %1167 = vmatprep.subr.bf16.mxu0 %v1301_v48  ;;  %806 = vmatmul.mubr.bf16.gmra.mxu1 %v1012_v2 }
  0x48   :  { %1194 = vmatpush3.bf16.msra.mxu1 %v1300_v47  ;;  %893 = vmatprep.mubr.bf16.mxu1 %v1331_v14 }
  0x49   :  { %1195 = vmatprep.subr.bf16.mxu1 %v1303_v50 }
  0x4a   :  { %1168 = vmatpush3.bf16.msra.mxu0 %v1302_v49 }
  0x4b   :  { %1169 = vmatprep.subr.bf16.mxu0 %v1305_v52 }
  0x4c   :  { %1196 = vmatpush3.bf16.msra.mxu1 %v1304_v51 }
  0x4d   :  { %1197 = vmatprep.subr.bf16.mxu1 %v1308_v56 }
  0x4e   :  { %1170 = vmatpush3.bf16.msra.mxu0 %v1306_v53 }
  0x4f   :  { %1171 = vmatprep.subr.bf16.mxu0 %v1311_v59 }
  0x50   :  { %1198 = vmatpush3.bf16.msra.mxu1 %v1310_v58 }
  0x51   :  { %1199 = vmatprep.subr.bf16.mxu1 %v1313_v61 }
  0x52   :  { %1172 = vmatpush3.bf16.msra.mxu0 %v1312_v60 }
  0x53   :  { %1173 = vmatprep.subr.bf16.mxu0 %v1316_v1 }
  0x54   :  { %1200 = vmatpush3.bf16.msra.mxu1 %v1314_v62 }
  0x55   :  { %1201 = vmatprep.subr.bf16.mxu1 %v1319_v4 }
  0x56   :  { %1174 = vmatpush3.bf16.msra.mxu0 %v1318_v3 }
  0x57   :  { %1175 = vmatprep.subr.bf16.mxu0 %v1321_v6 }
  0x58   :  { %1202 = vmatpush3.bf16.msra.mxu1 %v1320_v5 }
  0x59   :  { %1203 = vmatprep.subr.bf16.mxu1 %v1323_v8 }
  0x5a   :  { %1176 = vmatpush3.bf16.msra.mxu0 %v1322_v7 }
  0x5b   :  { %1227 = vmatprep.subr.bf16.mxu0 %v1328_v12 }
  0x5c   :  { %1204 = vmatpush3.bf16.msra.mxu1 %v1327_v11 }
  0x5d   :  { %846 = vmatmul.mubr.bf16.vlgmr.msra.gmra.mxu0 %v1324_v9 }
  0x5e   :  { %1228 = vmatpush3.bf16.msra.mxu0 %v1328_v12  ;;  %853 = vmatprep.mubr.bf16.mxu0 %v1015_v17 }
  0x5f   :  { %894 = vmatmul.mubr.bf16.vlgmr.msra.gmra.mxu1 %v1329_v13  ;;  %1229 = vmatprep.subr.bf16.mxu0 %v1332_v15 }
  0x60   :  { %901 = vmatprep.mubr.bf16.mxu1 %v1017_v21 }
  0x62   :  { %1230 = vmatpush3.bf16.msra.mxu0 %v1332_v15 }
  0x63   :  { %1231 = vmatprep.subr.bf16.mxu0 %v1335_v18 }
  0x65   :  { %854 = vmatmul.mubr.bf16.gmra.mxu0 %v1014_v20 }
  0x66   :  { %1232 = vmatpush3.bf16.msra.mxu0 %v1335_v18  ;;  %1243 = vmatprep.mubr.bf16.mxu0 %v1343_v24 }
  0x67   :  { %902 = vmatmul.mubr.bf16.gmra.mxu1 %v1016_v22  ;;  %1233 = vmatprep.subr.bf16.mxu0 %v1338_v23 }
  0x6a   :  { %1234 = vmatpush3.bf16.msra.mxu0 %v1338_v23 }
  0x6b   :  { %1235 = vmatprep.subr.bf16.mxu0 %v1339_v25 }
  0x6e   :  { %1236 = vmatpush3.bf16.msra.mxu0 %v1339_v25 }
  0x6f   :  { %1237 = vmatprep.subr.bf16.mxu0 %v1340_v26 }
  0x72   :  { %1238 = vmatpush3.bf16.msra.mxu0 %v1340_v26 }
  0x73   :  { %1239 = vmatprep.subr.bf16.mxu0 %v1341_v27 }
  0x76   :  { %1240 = vmatpush3.bf16.msra.mxu0 %v1341_v27 }
  0x77   :  { %1241 = vmatprep.subr.bf16.mxu0 %v1342_v28 }
  0x7a   :  { %1242 = vmatpush3.bf16.msra.mxu0 %v1342_v28 }
  0x7d   :  { %1244 = vmatmul.mubr.bf16.vlgmr.msra.gmra.mxu0 %v1344_v29 }
  0xfd   :  { %v1121_v30 = vpop.f32.mrf.mxu0 }
  0xff   :  { %v1122_v31 = vpop.f32.mrf.mxu0  ;;  %v1149_v32 = vpop.f32.mrf.mxu1 }
 0x100   :  { %v1123_v63 = vadd.f32 %v1122_v31, %v1121_v30 }
 0x101   :  { %v1124_v33 = vpop.f32.mrf.mxu0  ;;  %v1150_v34 = vpop.f32.mrf.mxu1 }
 0x102   :  { %v752_v3 = vadd.f32 %v1123_v63, %v1000_v0  ;;  %v1151_v4 = vadd.f32 %v1150_v34, %v1149_v32 }
 0x103   :  { %v1125_v35 = vpop.f32.mrf.mxu0  ;;  %v1152_v37 = vpop.f32.mrf.mxu1 }
 0x104   :  { %v1126_v5 = vadd.f32 %v1125_v35, %v1124_v33  ;;  %v800_v9 = vadd.f32 %v1151_v4, %v752_v3 }
 0x105   :  { %v1127_v36 = vpop.f32.mrf.mxu0  ;;  %v1153_v40 = vpop.f32.mrf.mxu1 }
 0x106   :  { %v755_v10 = vadd.f32 %v1126_v5, %v1000_v0  ;;  %v1154_v11 = vadd.f32 %v1153_v40, %v1152_v37 }
 0x107   :  { %v1128_v38 = vpop.f32.mrf.mxu0  ;;  %v1155_v42 = vpop.f32.mrf.mxu1 }
 0x108   :  { %v1129_v62 = vadd.f32 %v1128_v38, %v1127_v36  ;;  %v803_v17 = vadd.f32 %v1154_v11, %v755_v10 }
 0x109   :  { %v1130_v39 = vpop.f32.mrf.mxu0  ;;  %v1156_v43 = vpop.f32.mrf.mxu1 }
 0x10a   :  { %v760_v1 = vadd.f32 %v1129_v62, %v1000_v0  ;;  %v1157_v2 = vadd.f32 %v1156_v43, %v1155_v42 }
 0x10b   :  { %v1131_v41 = vpop.f32.mrf.mxu0  ;;  %v1158_v44 = vpop.f32.mrf.mxu1 }
 0x10c   :  { %v808_v7 = vadd.f32 %v1157_v2, %v760_v1 }
 0x10d   :  { %v1159_v45 = vpop.f32.mrf.mxu1 }
 0x11d   :  { %v1177_v46 = vpop.f32.mrf.mxu0 }
 0x11f   :  { %v1178_v47 = vpop.f32.mrf.mxu0  ;;  %v1205_v48 = vpop.f32.mrf.mxu1 }
 0x120   :  { %v1179_v8 = vadd.f32 %v1178_v47, %v1177_v46 }
 0x121   :  { %v1180_v49 = vpop.f32.mrf.mxu0  ;;  %v1206_v50 = vpop.f32.mrf.mxu1 }
 0x122   :  { %v848_v14 = vadd.f32 %v1179_v8, %v800_v9  ;;  %v1207_v15 = vadd.f32 %v1206_v50, %v1205_v48 }
 0x123   :  { %v1181_v51 = vpop.f32.mrf.mxu0  ;;  %v1208_v52 = vpop.f32.mrf.mxu1 }
 0x124   :  { %v1182_v16 = vadd.f32 %v1181_v51, %v1180_v49  ;;  %v896_v23 = vadd.f32 %v1207_v15, %v848_v14 }
 0x125   :  { %v1183_v53 = vpop.f32.mrf.mxu0  ;;  %v1209_v54 = vpop.f32.mrf.mxu1 }
 0x126   :  { %v851_v20 = vadd.f32 %v1182_v16, %v803_v17  ;;  %v1210_v21 = vadd.f32 %v1209_v54, %v1208_v52 }
 0x127   :  { %v1184_v55 = vpop.f32.mrf.mxu0  ;;  %v1211_v56 = vpop.f32.mrf.mxu1 }
 0x128   :  { %v1185_v6 = vadd.f32 %v1184_v55, %v1183_v53  ;;  %v899_v29 = vadd.f32 %v1210_v21, %v851_v20 }
 0x129   :  { %v1186_v57 = vpop.f32.mrf.mxu0  ;;  %v1212_v58 = vpop.f32.mrf.mxu1 }
 0x12a   :  { %v856_v12 = vadd.f32 %v1185_v6, %v808_v7  ;;  %v1213_v13 = vadd.f32 %v1212_v58, %v1211_v56 }
 0x12b   :  { %v1187_v59 = vpop.f32.mrf.mxu0  ;;  %v1214_v60 = vpop.f32.mrf.mxu1 }
 0x12c   :  { %v904_v18 = vadd.f32 %v1213_v13, %v856_v12 }
 0x12d   :  { %v1215_v61 = vpop.f32.mrf.mxu1 }
 0x13d   :  { %v1245_v19 = vpop.f32.mrf.mxu0 }
 0x13e   :  { %v952_v22 = vadd.f32 %v1245_v19, %v904_v18 }
 0x13f   :  { %v943_v24 = vpop.f32.mrf.mxu0 }
 0x140   :  { %v1093_v25 = vmul.f32 -1.442695, %v952_v22  ;;  %v944_v26 = vadd.f32 %v943_v24, %v896_v23 }
 0x141   :  { %v1246_v27 = vpop.f32.mrf.mxu0 }
 0x142   :  { %1345 = vpow2.f32 %v1093_v25  ;;  %v1091_v28 = vmul.f32 -1.442695, %v944_v26 }
 0x143   :  { %v946_v30 = vpop.f32.mrf.mxu0 }
 0x144   :  { %1347 = vpow2.f32 %v1091_v28  ;;  %v947_v31 = vadd.f32 %v946_v30, %v899_v29 }
 0x146   :  { %v1092_v32 = vmul.f32 -1.442695, %v947_v31 }
 0x148   :  { %1349 = vpow2.f32 %v1092_v32 }
 0x14f   :  { %v1346_v33 = vpop.eup %1345 }
 0x150   :  { %v968_v34 = vadd.f32 1.0, %v1346_v33 }
 0x151   :  { %v1348_v35 = vpop.eup %1347 }
 0x152   :  { %1351 = vrcp.f32 %v968_v34  ;;  %v966_v36 = vadd.f32 1.0, %v1348_v35 }
 0x154   :  { %1353 = vrcp.f32 %v966_v36 }
 0x155   :  { %v1350_v37 = vpop.eup %1349 }
 0x156   :  { %v967_v38 = vadd.f32 1.0, %v1350_v37 }
 0x158   :  { %1355 = vrcp.f32 %v967_v38 }
 0x15f   :  { %v1352_v39 = vpop.eup %1351 }
 0x160   :  { %v977_v40 = vmul.f32 %v1352_v39, %v952_v22 }
 0x161   :  { %v1354_v42 = vpop.eup %1353 }
 0x162   :  { %v1099_v41 = vpack.c.bf16 %v977_v40, %v977_v40  ;;  %v975_v44 = vmul.f32 %v1354_v42, %v944_v26 }
 0x164   :  { %993 = vst [vmem:[%s1482_s3 + $0x8] sm:$0x1] %v1099_v41 }
 0x165   :  { %v1356_v43 = vpop.eup %1355 }
 0x166   :  { %v976_v45 = vmul.f32 %v1356_v43, %v947_v31 }
 0x168   :  { %v1103_v46 = vpack.c.bf16 %v976_v45, %v975_v44 }
 0x16a   :  { %1104 = vst [vmem:[%s1482_s3] sm:$0xff] %v1103_v46  }
 0x16b   :  { %998 = vsyncpa [#allocation3], 1 }
 0x16c   :  { %999 = vsyncpa [#allocation5], 1 }

// kernel: net_forward.5
= control target key start
LH: loop header
LB: loop body
LE: loop exit
PB: predicated region body
PF: predicated region fallthrough
CT: control target
= control target key end

     0   :  { %s1300_s12 = smov 0   ;;  %s1302_s13 = smov 0   ;;  %s1529_s0 = inlined_call_operand.vmem [shape: bf16[392,9], index: 0, kind: input, shape index: {}]   ;;  %s1530_s1 = inlined_call_operand.vmem [shape: bf16[9,128], index: 1, kind: input, shape index: {}]   ;;  %s1531_s2 = inlined_call_operand.vmem [shape: f32[1,128], index: 2, kind: input, shape index: {}]   ;;  %s1532_s3 = inlined_call_operand.vmem [shape: bf16[392,128], index: 3, kind: output, shape index: {}]  }
   0x1   :  { %s1304_s14 = smov 0  }
   0x2 LB: > { %s1313_s15 = sadd.s32 4294967295, %s1245_s14   ;;  %s1315_s16 = sadd.s32 1, %s1245_s14   ;;  %s1245_s14 = sphi %s1304_s14, %s1539_s14   ;;  %s1241_s13 = sphi %s1302_s13, %s1538_s13   ;;  %s1237_s12 = sphi %s1300_s12, %s1537_s12  }
   0x3   : > { %s85_s17 = ssub.s32 %s1245_s14, %s1315_s16  ;;  %s88_s18 = sadd.s32 1, %s1241_s13 }
   0x4   : > { %p86_p0 = scmp.eq.s32.totalorder %s85_s17, 0  ;;  %p98_p1 = scmp.ne.s32.totalorder %s1241_s13, %s1237_s12 }
   0x5   : > { %p99_p2 = scmp.eq.s32.totalorder %s1313_s15, 3  ;;  %p863_p3 = scmp.ge.s32.totalorder %s1245_s14, 1 }
   0x6   : > { %s1323_s19 = scalar_select %p86_p0, %s1241_s13, %s88_s18  }
   0x7   : > { %p1325_p4 = por %p99_p2, %p98_p1  ;;  %p146_p5 = scmp.lt.s32.totalorder %s1245_s14, 5 }
   0x9   : > { %p147_p6 = pnand %p863_p3, %p146_p5 }
   0xa   : > { %s1333_s23 = sshll.u32 (!%p147_p6), %s1313_s15, 4  ;;  %s170_s4 = sand.u32 (!%p147_p6), 1, %s1237_s12  }
   0xb   : > { %150 = sbr.rel (%p147_p6) target bundleno = 321 (0x141), region = 32  ;;  %p178_p7 = scmp.lt.s32.totalorder (!%p147_p6), %s1333_s23, 48 }
   0xc   : > { %s864_s5 = sshll.u32 (!%p147_p6), %s170_s4, 6 }
   0xd   : > { %s1408_s6 = scalar_lea.vmem (!%p147_p6), [#allocation2], %s864_s5  }
  0x10   : > { %v1118_v0 = vld [vmem:[%s1530_s1] sm:$0x1f]   ;;  %vm288_vm0 = vcmask 1043456   ;;  %vm289_vm1 = vcmask 1044480   ;;  %v1279_v1 = vmov 65535   ;;  %s179_s24 = scalar_select %p178_p7, %s1333_s23, 48 }
  0x11   : > { %v290_v2 = vsel %vm288_vm0, 4294967295, %v1279_v1  ;;  %vm263_vm2 = vcmask 72704   ;;  %v867_v13 = vld [vmem:[%s1531_s2] ss:$0 sm:$0xff]  ;;  %s592_s7 = ssub.s32 (%p1325_p4), 49, %s1333_s23  ;;  %s950_s8 = sshll.u32 (%p1325_p4), %s1313_s15, 6 }
  0x12   : > { %v291_v3 = vsel %vm289_vm1, %v290_v2, 0  ;;  %s866_s25 = sshll.u32 %s179_s24, 2  ;;  %p593_p8 = scmp.lt.s32.totalorder (%p1325_p4), %s592_s7, 16 }
  0x13   : > { %v293_v4 = vand.u32 %v1118_v0, %v291_v3  ;;  %s181_s28 = scalar_lea.vmem %s1529_s0, %s866_s25  ;;  %s1433_s11 = scalar_lea.vmem (%p1325_p4), %s1532_s3, %s950_s8  }
  0x14   : > { %v1119_v5 = vld [vmem:[%s181_s28] sm:$0xff]   ;;  %v1121_v7 = vld [vmem:[%s181_s28 + $0x8] sm:$0xff]   ;;  %v1123_v9 = vld [vmem:[%s181_s28 + $0x10] sm:$0xff]  }
  0x15   : > { %1009 = vmatprep.subr.bf16.mxu0 %v293_v4  ;;  %1027 = vmatprep.subr.bf16.mxu1 %v293_v4  ;;  %v1120_v6 = vld [vmem:[%s181_s28 + $0x20] sm:$0xff]   ;;  %v1122_v8 = vld [vmem:[%s181_s28 + $0x28] sm:$0xff]   ;;  %v1124_v10 = vld [vmem:[%s181_s28 + $0x30] sm:$0xff]  }
  0x16   : > { %1010 = vmatpush3.bf16.msra.mxu0 %v293_v4  ;;  %1028 = vmatpush3.bf16.msra.mxu1 %v293_v4  ;;  %v1125_v11 = vld [vmem:[%s181_s28 + $0x18] sm:$0xff]  }
  0x17   : > { %1011 = vmatprep.mubr.msk.bf16.mxu0 %vm263_vm2, %v1119_v5  ;;  %1019 = vmatprep.mubr.msk.bf16.mxu1 %vm263_vm2, %v1120_v6  ;;  %v1126_v12 = vld [vmem:[%s181_s28 + $0x38] sm:$0xff]  }
  0x19   : > { %1012 = vmatmul.mubr.msk.bf16.vlgmr.msra.gmra.mxu0 %vm263_vm2, %v1121_v7  ;;  %1020 = vmatmul.mubr.msk.bf16.vlgmr.msra.gmra.mxu1 %vm263_vm2, %v1122_v8 }
  0x1a   : > { %1015 = vmatprep.mubr.msk.bf16.mxu0 %vm263_vm2, %v1123_v9  ;;  %1023 = vmatprep.mubr.msk.bf16.mxu1 %vm263_vm2, %v1124_v10 }
  0x21   : > { %1016 = vmatmul.mubr.msk.bf16.gmra.mxu0 %vm263_vm2, %v1125_v11  ;;  %1024 = vmatmul.mubr.msk.bf16.gmra.mxu1 %vm263_vm2, %v1126_v12 }
  0xd9   : > { %v1013_v14 = vpop.f32.mrf.mxu0  ;;  %v1021_v16 = vpop.f32.mrf.mxu1 }
  0xda   : > { %v1351_v15 = vadd.f32 %v1013_v14, %v867_v13  ;;  %v1353_v17 = vadd.f32 %v1021_v16, %v867_v13 }
  0xdb   : > { %v329_v18 = vpop.f32.mrf.mxu0  ;;  %v361_v21 = vpop.f32.mrf.mxu1 }
  0xdc   : > { %v887_v19 = vmul.f32 -1.442695, %v1351_v15  ;;  %v1356_v20 = vadd.f32 %v867_v13, %v329_v18  ;;  %v895_v22 = vmul.f32 -1.442695, %v1353_v17  ;;  %v1359_v23 = vadd.f32 %v867_v13, %v361_v21 }
  0xdd   : > { %v1014_v24 = vpop.f32.mrf.mxu0  ;;  %v1022_v27 = vpop.f32.mrf.mxu1 }
  0xde   : > { %1127 = vpow2.f32 %v887_v19  ;;  %v885_v25 = vmul.f32 -1.442695, %v1356_v20  ;;  %v1362_v26 = vadd.f32 %v1014_v24, %v867_v13  ;;  %v893_v28 = vmul.f32 -1.442695, %v1359_v23 }
  0xdf   : > { %1129 = vpow2.f32 %v895_v22  ;;  %v1365_v29 = vadd.f32 %v1022_v27, %v867_v13  ;;  %v332_v30 = vpop.f32.mrf.mxu0  ;;  %v364_v33 = vpop.f32.mrf.mxu1 }
  0xe0   : > { %1131 = vpow2.f32 %v885_v25  ;;  %v888_v31 = vmul.f32 -1.442695, %v1362_v26  ;;  %v1368_v32 = vadd.f32 %v867_v13, %v332_v30  ;;  %v1371_v35 = vadd.f32 %v867_v13, %v364_v33 }
  0xe1   : > { %1133 = vpow2.f32 %v893_v28  ;;  %v896_v34 = vmul.f32 -1.442695, %v1365_v29  ;;  %v1017_v36 = vpop.f32.mrf.mxu0  ;;  %v1025_v39 = vpop.f32.mrf.mxu1 }
  0xe2   : > { %1135 = vpow2.f32 %v888_v31  ;;  %v886_v37 = vmul.f32 -1.442695, %v1368_v32  ;;  %v1374_v38 = vadd.f32 %v1017_v36, %v867_v13  ;;  %v894_v40 = vmul.f32 -1.442695, %v1371_v35 }
  0xe3   : > { %1137 = vpow2.f32 %v896_v34  ;;  %v1377_v41 = vadd.f32 %v1025_v39, %v867_v13  ;;  %v345_v42 = vpop.f32.mrf.mxu0  ;;  %v377_v45 = vpop.f32.mrf.mxu1 }
  0xe4   : > { %1139 = vpow2.f32 %v886_v37  ;;  %v891_v43 = vmul.f32 -1.442695, %v1374_v38  ;;  %v1380_v44 = vadd.f32 %v867_v13, %v345_v42  ;;  %v1383_v47 = vadd.f32 %v867_v13, %v377_v45 }
  0xe5   : > { %1141 = vpow2.f32 %v894_v40  ;;  %v899_v46 = vmul.f32 -1.442695, %v1377_v41  ;;  %v1018_v48 = vpop.f32.mrf.mxu0  ;;  %v1026_v51 = vpop.f32.mrf.mxu1 }
  0xe6   : > { %1143 = vpow2.f32 %v891_v43  ;;  %v889_v49 = vmul.f32 -1.442695, %v1380_v44  ;;  %v1386_v50 = vadd.f32 %v1018_v48, %v867_v13  ;;  %v897_v52 = vmul.f32 -1.442695, %v1383_v47 }
  0xe7   : > { %1145 = vpow2.f32 %v899_v46  ;;  %v1389_v53 = vadd.f32 %v1026_v51, %v867_v13  ;;  %v348_v54 = vpop.f32.mrf.mxu0  ;;  %v380_v57 = vpop.f32.mrf.mxu1 }
  0xe8   : > { %1147 = vpow2.f32 %v889_v49  ;;  %v892_v55 = vmul.f32 -1.442695, %v1386_v50  ;;  %v1392_v56 = vadd.f32 %v867_v13, %v348_v54  ;;  %v1395_v59 = vadd.f32 %v867_v13, %v380_v57 }
  0xe9   : > { %1149 = vpow2.f32 %v897_v52  ;;  %v900_v58 = vmul.f32 -1.442695, %v1389_v53 }
  0xea   : > { %1151 = vpow2.f32 %v892_v55  ;;  %v890_v60 = vmul.f32 -1.442695, %v1392_v56  ;;  %v898_v62 = vmul.f32 -1.442695, %v1395_v59 }
  0xeb   : > { %v1128_v61 = vpop.eup %1127  ;;  %1153 = vpow2.f32 %v900_v58 }
  0xec   : > { %v1130_v63 = vpop.eup %1129  ;;  %v442_v0 = vadd.f32 1.0, %v1128_v61  ;;  %1155 = vpow2.f32 %v890_v60 }
  0xed   : > { %v1132_v1 = vpop.eup %1131  ;;  %v450_v2 = vadd.f32 1.0, %v1130_v63  ;;  %1157 = vpow2.f32 %v898_v62 }
  0xee   : > { %v1134_v3 = vpop.eup %1133  ;;  %1159 = vrcp.f32 %v442_v0  ;;  %v440_v4 = vadd.f32 1.0, %v1132_v1 }
  0xef   : > { %v1136_v5 = vpop.eup %1135  ;;  %1161 = vrcp.f32 %v450_v2  ;;  %v448_v6 = vadd.f32 1.0, %v1134_v3 }
  0xf0   : > { %v1138_v7 = vpop.eup %1137  ;;  %1163 = vrcp.f32 %v440_v4  ;;  %v443_v8 = vadd.f32 1.0, %v1136_v5 }
  0xf1   : > { %v1140_v9 = vpop.eup %1139  ;;  %1165 = vrcp.f32 %v448_v6  ;;  %v451_v10 = vadd.f32 1.0, %v1138_v7 }
  0xf2   : > { %v1142_v11 = vpop.eup %1141  ;;  %1167 = vrcp.f32 %v443_v8  ;;  %v441_v12 = vadd.f32 1.0, %v1140_v9 }
  0xf3   : > { %v1144_v13 = vpop.eup %1143  ;;  %1169 = vrcp.f32 %v451_v10  ;;  %v449_v14 = vadd.f32 1.0, %v1142_v11 }
  0xf4   : > { %v1146_v16 = vpop.eup %1145  ;;  %1171 = vrcp.f32 %v441_v12  ;;  %v446_v18 = vadd.f32 1.0, %v1144_v13 }
  0xf5   : > { %v1148_v19 = vpop.eup %1147  ;;  %1173 = vrcp.f32 %v449_v14  ;;  %v454_v21 = vadd.f32 1.0, %v1146_v16 }
  0xf6   : > { %v1150_v22 = vpop.eup %1149  ;;  %1175 = vrcp.f32 %v446_v18  ;;  %v444_v24 = vadd.f32 1.0, %v1148_v19 }
  0xf7   : > { %v1152_v25 = vpop.eup %1151  ;;  %1177 = vrcp.f32 %v454_v21  ;;  %v452_v27 = vadd.f32 1.0, %v1150_v22 }
  0xf8   : > { %v1154_v28 = vpop.eup %1153  ;;  %1179 = vrcp.f32 %v444_v24  ;;  %v447_v30 = vadd.f32 1.0, %v1152_v25 }
  0xf9   : > { %v1156_v31 = vpop.eup %1155  ;;  %1181 = vrcp.f32 %v452_v27  ;;  %v455_v33 = vadd.f32 1.0, %v1154_v28 }
  0xfa   : > { %v1158_v34 = vpop.eup %1157  ;;  %1183 = vrcp.f32 %v447_v30  ;;  %v445_v36 = vadd.f32 1.0, %v1156_v31 }
  0xfb   : > { %v1160_v37 = vpop.eup %1159  ;;  %1185 = vrcp.f32 %v455_v33  ;;  %v453_v39 = vadd.f32 1.0, %v1158_v34 }
  0xfc   : > { %v1162_v40 = vpop.eup %1161  ;;  %1187 = vrcp.f32 %v445_v36  ;;  %v490_v48 = vmul.f32 %v1160_v37, %v1351_v15 }
  0xfd   : > { %v1164_v42 = vpop.eup %1163  ;;  %1189 = vrcp.f32 %v453_v39  ;;  %v498_v52 = vmul.f32 %v1162_v40, %v1353_v17 }
  0xfe   : > { %v1166_v43 = vpop.eup %1165  ;;  %v488_v57 = vmul.f32 %v1164_v42, %v1356_v20 }
  0xff   : > { %v1168_v45 = vpop.eup %1167  ;;  %v496_v62 = vmul.f32 %v1166_v43, %v1359_v23 }
 0x100   : > { %v1170_v46 = vpop.eup %1169  ;;  %v491_v49 = vmul.f32 %v1168_v45, %v1362_v26 }
 0x101   : > { %v1172_v51 = vpop.eup %1171  ;;  %v499_v54 = vmul.f32 %v1170_v46, %v1365_v29 }
 0x102   : > { %v1174_v55 = vpop.eup %1173  ;;  %v961_v58 = vpack.c.bf16 %v491_v49, %v490_v48  ;;  %v489_v60 = vmul.f32 %v1172_v51, %v1368_v32 }
 0x103   : > { %v1176_v61 = vpop.eup %1175  ;;  %v981_v63 = vpack.c.bf16 %v499_v54, %v498_v52  ;;  %v497_v0 = vmul.f32 %v1174_v55, %v1371_v35 }
 0x104   : > { %v1178_v15 = vpop.eup %1177  ;;  %993 = vst [vmem:[%s1408_s6 + $0x8] sm:$0xff] %v961_v58   ;;  %v956_v17 = vpack.c.bf16 %v489_v60, %v488_v57  ;;  %v494_v35 = vmul.f32 %v1176_v61, %v1374_v38 }
 0x105   : > { %v1180_v26 = vpop.eup %1179  ;;  %997 = vst [vmem:[%s1408_s6 + $0x28] sm:$0xff] %v981_v63   ;;  %v976_v20 = vpack.c.bf16 %v497_v0, %v496_v62  ;;  %v502_v3 = vmul.f32 %v1178_v15, %v1377_v41 }
 0x106   : > { %v1182_v29 = vpop.eup %1181  ;;  %957 = vst [vmem:[%s1408_s6] sm:$0xff] %v956_v17   ;;  %v492_v6 = vmul.f32 %v1180_v26, %v1380_v44 }
 0x107   : > { %v1184_v32 = vpop.eup %1183  ;;  %996 = vst [vmem:[%s1408_s6 + $0x20] sm:$0xff] %v976_v20   ;;  %v500_v9 = vmul.f32 %v1182_v29, %v1383_v47 }
 0x108   : > { %v1186_v23 = vpop.eup %1185  ;;  %v495_v1 = vmul.f32 %v1184_v32, %v1386_v50 }
 0x109   : > { %v1188_v2 = vpop.eup %1187  ;;  %v503_v4 = vmul.f32 %v1186_v23, %v1389_v53 }
 0x10a   : > { %v1190_v5 = vpop.eup %1189  ;;  %v971_v7 = vpack.c.bf16 %v495_v1, %v494_v35  ;;  %v493_v8 = vmul.f32 %v1188_v2, %v1392_v56 }
 0x10b   : > { %v991_v10 = vpack.c.bf16 %v503_v4, %v502_v3  ;;  %v501_v38 = vmul.f32 %v1190_v5, %v1395_v59  ;;  %590 = sbr.rel (!%p1325_p4) target bundleno = 321 (0x141), region = 36 }
 0x10c   : > { %995 = vst [vmem:[%s1408_s6 + $0x18] sm:$0xff] %v971_v7   ;;  %v966_v11 = vpack.c.bf16 %v493_v8, %v492_v6 }
 0x10d   : > { %999 = vst [vmem:[%s1408_s6 + $0x38] sm:$0xff] %v991_v10   ;;  %v986_v50 = vpack.c.bf16 %v501_v38, %v500_v9 }
 0x10e   : > { %994 = vst [vmem:[%s1408_s6 + $0x10] sm:$0xff] %v966_v11  }
 0x10f   : > { %998 = vst [vmem:[%s1408_s6 + $0x30] sm:$0xff] %v986_v50  }
 0x110   : > { %s1541_s7 = smov (!%p593_p8, %s592_s7), 16 }
 0x111   : > { %s919_s12 = sshll.u32 %s1541_s7, 6 }
 0x112   : > { %p922_p9 = scmp.eq.s32.totalorder %s919_s12, 0 }
 0x113   : > { %s1439_s14 = sshrl.u32 (!%p922_p9), %s1541_s7, 4 }
 0x114   : > { %601 = sbr.rel (%p922_p9) target bundleno = 321 (0x141), region = 40  ;;  %p923_p10 = scmp.le.s32.totalorder (!%p922_p9), %s1439_s14, 0 }
 0x119   : > { %816 = sbr.rel (%p923_p10) target bundleno = 304 (0x130), region = 112  ;;  %s1534_s15 = smov (!%p923_p10), %s1433_s11 }
 0x11a   : > { %s1535_s17 = smov (!%p923_p10), %s1408_s6  ;;  %s1448_s18 = smov (!%p923_p10), 0  }
 0x11b   : > { %s1450_s20 = smov (!%p923_p10), 0  }
 0x11e LB: >> { %v618_v41 = vld [vmem:[%s1253_s17] sm:$0xf]  ;;  %v620_v44 = vld [vmem:[%s1253_s17 + $0x4] sm:$0xf]  ;;  %v622_v47 = vld [vmem:[%s1253_s17 + $0x8] sm:$0xf]  ;;  %s1261_s20 = sphi %s1450_s20, %s612_s20   ;;  %s1257_s18 = sphi %s1448_s18, %s1536_s18   ;;  %s1253_s17 = sphi %s1535_s17, %s655_s17   ;;  %s1249_s15 = sphi %s1534_s15, %s656_s15  }
 0x11f   : >> { %619 = vst [vmem:[%s1249_s15] sm:$0xf] %v618_v41  ;;  %621 = vst [vmem:[%s1249_s15 + $0x4] sm:$0xf] %v620_v44  ;;  %v624_v53 = vld [vmem:[%s1253_s17 + $0xc] sm:$0xf]  ;;  %s650_s21 = sadd.s32 1, %s1257_s18 }
 0x120   : >> { %623 = vst [vmem:[%s1249_s15 + $0x8] sm:$0xf] %v622_v47  ;;  %v626_v56 = vld [vmem:[%s1253_s17 + $0x10] sm:$0xf]  ;;  %v628_v59 = vld [vmem:[%s1253_s17 + $0x14] sm:$0xf]  ;;  %p651_p11 = scmp.ge.s32.totalorder %s650_s21, %s1439_s14 }
 0x121   : >> { %625 = vst [vmem:[%s1249_s15 + $0xc] sm:$0xf] %v624_v53  ;;  %627 = vst [vmem:[%s1249_s15 + $0x10] sm:$0xf] %v626_v56  ;;  %v630_v12 = vld [vmem:[%s1253_s17 + $0x18] sm:$0xf] }
 0x122   : >> { %629 = vst [vmem:[%s1249_s15 + $0x14] sm:$0xf] %v628_v59  ;;  %v632_v13 = vld [vmem:[%s1253_s17 + $0x1c] sm:$0xf]  ;;  %v634_v14 = vld [vmem:[%s1253_s17 + $0x20] sm:$0xf] }
 0x123   : >> { %631 = vst [vmem:[%s1249_s15 + $0x18] sm:$0xf] %v630_v12  ;;  %633 = vst [vmem:[%s1249_s15 + $0x1c] sm:$0xf] %v632_v13  ;;  %v636_v16 = vld [vmem:[%s1253_s17 + $0x24] sm:$0xf] }
 0x124   : >> { %635 = vst [vmem:[%s1249_s15 + $0x20] sm:$0xf] %v634_v14  ;;  %v638_v18 = vld [vmem:[%s1253_s17 + $0x28] sm:$0xf]  ;;  %v640_v19 = vld [vmem:[%s1253_s17 + $0x2c] sm:$0xf] }
 0x125   : >> { %637 = vst [vmem:[%s1249_s15 + $0x24] sm:$0xf] %v636_v16  ;;  %639 = vst [vmem:[%s1249_s15 + $0x28] sm:$0xf] %v638_v18  ;;  %v642_v21 = vld [vmem:[%s1253_s17 + $0x30] sm:$0xf] }
 0x126   : >> { %641 = vst [vmem:[%s1249_s15 + $0x2c] sm:$0xf] %v640_v19  ;;  %v644_v22 = vld [vmem:[%s1253_s17 + $0x34] sm:$0xf]  ;;  %v646_v24 = vld [vmem:[%s1253_s17 + $0x38] sm:$0xf] }
 0x127   : >> { %643 = vst [vmem:[%s1249_s15 + $0x30] sm:$0xf] %v642_v21  ;;  %645 = vst [vmem:[%s1249_s15 + $0x34] sm:$0xf] %v644_v22  ;;  %v648_v25 = vld [vmem:[%s1253_s17 + $0x3c] sm:$0xf] }
 0x128   : >> { %647 = vst [vmem:[%s1249_s15 + $0x38] sm:$0xf] %v646_v24  ;;  %649 = vst [vmem:[%s1249_s15 + $0x3c] sm:$0xf] %v648_v25  ;;  %s1543_s21 = smov (%p651_p11, %s650_s21), 0  ;;  %s612_s20 = sadd.s32 1, %s1261_s20  }
 0x129   : >> { %s924_s22 = sshll.u32 %s1543_s21, 6  ;;  %p611_p12 = scmp.ge.s32.totalorder %s612_s20, %s1439_s14 }
 0x12a   : >> { %s655_s17 = scalar_lea.vmem %s1408_s6, %s924_s22 [#allocation2]   ;;  %s656_s15 = scalar_lea.vmem %s1433_s11, %s924_s22  }
 0x12b   : >> { %s1536_s18 = smov %s1543_s21  ;;  %614 = sbr.rel (!%p611_p12) target bundleno = 286 (0x11e), region = 118 }
 0x130 PF: > { %s1511_s23 = sand.u32 15, %s1541_s7   ;;  %s951_s24 = sshll.u32 %s1439_s14, 6 }
 0x131   : > { %s661_s25 = scalar_lea.vmem %s1408_s6, %s951_s24 [#allocation2]   ;;  %s663_s26 = scalar_lea.vmem %s1433_s11, %s951_s24  }
 0x132   : > { %p929_p13 = scmp.le.s32.totalorder %s1511_s23, 0 }
 0x133   : > { %s1263_s27 = smov (!%p929_p13), %s663_s26   ;;  %s1267_s28 = smov (!%p929_p13), %s661_s25  }
 0x134   : > { %830 = sbr.rel (%p929_p13) target bundleno = 321 (0x141), region = 123  ;;  %s1271_s29 = smov (!%p929_p13), 0  }
 0x135   : > { %s1275_s30 = smov (!%p929_p13), 0  }
 0x139 LB: >> { %v673_v27 = vld [vmem:[%s1269_s28] sm:$0xf]  ;;  %s675_s4 = sadd.s32 1, %s1273_s29  ;;  %s667_s30 = sadd.s32 1, %s1277_s30   ;;  %s1277_s30 = sphi %s1275_s30, %s667_s30   ;;  %s1273_s29 = sphi %s1271_s29, %s1272_s29   ;;  %s1269_s28 = sphi %s1267_s28, %s680_s28   ;;  %s1265_s27 = sphi %s1263_s27, %s681_s27  }
 0x13a   : >> { %674 = vst [vmem:[%s1265_s27] sm:$0xf] %v673_v27  ;;  %p676_p0 = scmp.ge.s32.totalorder %s675_s4, %s1511_s23  ;;  %p666_p1 = scmp.ge.s32.totalorder %s667_s30, %s1511_s23 }
 0x13c   : >> { %s1545_s4 = smov (%p676_p0, %s675_s4), 0  ;;  %669 = sbr.rel (!%p666_p1) target bundleno = 313 (0x139), region = 129 }
 0x13d   : >> { %s930_s5 = sshll.u32 %s1545_s4, 2  ;;  %s1272_s29 = smov %s1545_s4  }
 0x13e   : >> { %s680_s28 = scalar_lea.vmem %s661_s25, %s930_s5 [#allocation2]   ;;  %s681_s27 = scalar_lea.vmem %s663_s26, %s930_s5  }
 0x141 PF: > { %p10_p2 = scmp.ge.s32.totalorder %s1315_s16, 6   ;;  %s1537_s12 = smov %s1241_s13 }
 0x142   : > { %s1538_s13 = smov %s1323_s19  ;;  %s1539_s14 = smov %s1315_s16 }
 0x143   :  { %12 = sbr.rel (!%p10_p2) target bundleno = 2 (0x2), region = 140 }

// kernel: net_forward.6
= control target key start
LH: loop header
LB: loop body
LE: loop exit
PB: predicated region body
PF: predicated region fallthrough
CT: control target
= control target key end

     0   :  { %s2118_s1 = inlined_call_operand.vmem [shape: bf16[1152,128], index: 1, kind: input, shape index: {}]   ;;  %s2119_s0 = inlined_call_operand.vmem [shape: bf16[50,1152], index: 0, kind: input, shape index: {}]   ;;  %s2120_s2 = inlined_call_operand.vmem [shape: f32[1,128], index: 2, kind: input, shape index: {}]   ;;  %s2121_s3 = inlined_call_operand.vmem [shape: bf16[50,128], index: 3, kind: output, shape index: {}]  }
   0x1   :  { %v1571_v0 = vld [vmem:[%s2118_s1 + $0x78] sm:$0xff]   ;;  %v1575_v4 = vld [vmem:[%s2118_s1 + $0x70] sm:$0xff]   ;;  %v1579_v8 = vld [vmem:[%s2118_s1 + $0x68] sm:$0xff]  }
   0x2   :  { %v1572_v1 = vld [vmem:[%s2118_s1 + $0xf8] sm:$0xff]   ;;  %1359 = vmatprep.subr.bf16.mxu0 %v1571_v0  ;;  %v1576_v5 = vld [vmem:[%s2118_s1 + $0xf0] sm:$0xff]   ;;  %v1580_v9 = vld [vmem:[%s2118_s1 + $0xe8] sm:$0xff]  }
   0x3   :  { %v1573_v2 = vld [vmem:[%s2118_s1 + $0x38] sm:$0xff]   ;;  %1399 = vmatprep.subr.bf16.mxu1 %v1572_v1  ;;  %v1577_v6 = vld [vmem:[%s2118_s1 + $0x30] sm:$0xff]   ;;  %v1581_v10 = vld [vmem:[%s2118_s1 + $0x28] sm:$0xff]  }
   0x4   :  { %v1574_v3 = vld [vmem:[%s2118_s1 + $0xb8] sm:$0xff]   ;;  %1360 = vmatpush3.bf16.msra.mxu0 %v1573_v2  ;;  %v1578_v7 = vld [vmem:[%s2118_s1 + $0xb0] sm:$0xff]   ;;  %v1582_v11 = vld [vmem:[%s2118_s1 + $0xa8] sm:$0xff]  }
   0x5   :  { %1400 = vmatpush3.bf16.msra.mxu1 %v1574_v3  ;;  %1361 = vmatprep.subr.bf16.mxu0 %v1575_v4  ;;  %v1583_v12 = vld [vmem:[%s2118_s1 + $0x60] sm:$0xff]   ;;  %v1587_v16 = vld [vmem:[%s2118_s1 + $0x58] sm:$0xff]   ;;  %v1591_v20 = vld [vmem:[%s2118_s1 + $0x50] sm:$0xff]  }
   0x6   :  { %1401 = vmatprep.subr.bf16.mxu1 %v1576_v5  ;;  %v1584_v13 = vld [vmem:[%s2118_s1 + $0xe0] sm:$0xff]   ;;  %v1588_v17 = vld [vmem:[%s2118_s1 + $0xd8] sm:$0xff]   ;;  %v1592_v21 = vld [vmem:[%s2118_s1 + $0xd0] sm:$0xff]  }
   0x7   :  { %v1585_v14 = vld [vmem:[%s2118_s1 + $0x20] sm:$0xff]   ;;  %v1589_v18 = vld [vmem:[%s2118_s1 + $0x18] sm:$0xff]   ;;  %v1593_v22 = vld [vmem:[%s2118_s1 + $0x10] sm:$0xff]  }
   0x8   :  { %1362 = vmatpush3.bf16.msra.mxu0 %v1577_v6  ;;  %v1586_v15 = vld [vmem:[%s2118_s1 + $0xa0] sm:$0xff]   ;;  %v1590_v19 = vld [vmem:[%s2118_s1 + $0x98] sm:$0xff]   ;;  %v1594_v23 = vld [vmem:[%s2118_s1 + $0x90] sm:$0xff]  }
   0x9   :  { %1402 = vmatpush3.bf16.msra.mxu1 %v1578_v7  ;;  %1363 = vmatprep.subr.bf16.mxu0 %v1579_v8  ;;  %v1595_v24 = vld [vmem:[%s2118_s1 + $0x48] sm:$0xff]   ;;  %v1599_v28 = vld [vmem:[%s2118_s1 + $0x40] sm:$0xff]   ;;  %v1609_v36 = vld [vmem:[%s2118_s1 + $0x178] sm:$0xff]  }
   0xa   :  { %1403 = vmatprep.subr.bf16.mxu1 %v1580_v9  ;;  %v1596_v25 = vld [vmem:[%s2118_s1 + $0xc8] sm:$0xff]   ;;  %v1600_v29 = vld [vmem:[%s2118_s1 + $0xc0] sm:$0xff]   ;;  %v1610_v37 = vld [vmem:[%s2118_s1 + $0x1f8] sm:$0xff]  }
   0xb   :  { %v1597_v26 = vld [vmem:[%s2118_s1 + $0x8] sm:$0xff]   ;;  %v1601_v30 = vld [vmem:[%s2118_s1] sm:$0xff]   ;;  %v1611_v38 = vld [vmem:[%s2118_s1 + $0x138] sm:$0xff]  }
   0xc   :  { %1364 = vmatpush3.bf16.msra.mxu0 %v1581_v10  ;;  %v1598_v27 = vld [vmem:[%s2118_s1 + $0x88] sm:$0xff]   ;;  %v1602_v31 = vld [vmem:[%s2118_s1 + $0x80] sm:$0xff]   ;;  %v1612_v39 = vld [vmem:[%s2118_s1 + $0x1b8] sm:$0xff]  }
   0xd   :  { %1404 = vmatpush3.bf16.msra.mxu1 %v1582_v11  ;;  %1365 = vmatprep.subr.bf16.mxu0 %v1583_v12  ;;  %v1603_v32 = vld [vmem:[%s2119_s0] ss:$36 sps:$4 sm:$0xff]   ;;  %v1606_v34 = vld [vmem:[%s2119_s0 + $0x8] ss:$36 sps:$4 sm:$0xff]   ;;  %v1613_v40 = vld [vmem:[%s2118_s1 + $0x170] sm:$0xff]  }
   0xe   :  { %1405 = vmatprep.subr.bf16.mxu1 %v1584_v13  ;;  %v1605_v33 = vld [vmem:[%s2119_s0 + $0x4] ss:$36 sps:$4 sm:$0xff]   ;;  %v1608_v35 = vld [vmem:[%s2119_s0 + $0xc] ss:$36 sps:$4 sm:$0xff]   ;;  %v1619_v45 = vld [vmem:[%s2119_s0 + $0x54] ss:$36 sps:$4 sm:$0xff]  }
   0xf   :  { %835 = vmatprep.mubr.bf16.mxu0 %v1605_v33  ;;  %899 = vmatprep.mubr.bf16.mxu1 %v1608_v35  ;;  %v1614_v41 = vld [vmem:[%s2118_s1 + $0x1f0] sm:$0xff]   ;;  %v1621_v46 = vld [vmem:[%s2119_s0 + $0x48] ss:$36 sps:$4 sm:$0xff]   ;;  %v1627_v52 = vld [vmem:[%s2118_s1 + $0x160] sm:$0xff]  }
  0x10   :  { %1366 = vmatpush3.bf16.msra.mxu0 %v1585_v14  ;;  %v1615_v42 = vld [vmem:[%s2118_s1 + $0x130] sm:$0xff]   ;;  %v1623_v48 = vld [vmem:[%s2118_s1 + $0x168] sm:$0xff]   ;;  %v1628_v53 = vld [vmem:[%s2118_s1 + $0x1e0] sm:$0xff]  }
  0x11   :  { %1406 = vmatpush3.bf16.msra.mxu1 %v1586_v15  ;;  %1367 = vmatprep.subr.bf16.mxu0 %v1587_v16  ;;  %v1616_v43 = vld [vmem:[%s2118_s1 + $0x1b0] sm:$0xff]   ;;  %v1624_v49 = vld [vmem:[%s2118_s1 + $0x1e8] sm:$0xff]   ;;  %v1629_v54 = vld [vmem:[%s2118_s1 + $0x120] sm:$0xff]  }
  0x12   :  { %1407 = vmatprep.subr.bf16.mxu1 %v1588_v17  ;;  %v1617_v44 = vld [vmem:[%s2119_s0 + $0x4c] ss:$36 sps:$4 sm:$0xff]   ;;  %v1630_v55 = vld [vmem:[%s2118_s1 + $0x1a0] sm:$0xff]   ;;  %v1631_v56 = vld [vmem:[%s2119_s0 + $0x94] ss:$36 sps:$4 sm:$0xff]  }
  0x13   :  { %v1622_v47 = vld [vmem:[%s2119_s0 + $0x50] ss:$36 sps:$4 sm:$0xff]   ;;  %v1625_v50 = vld [vmem:[%s2118_s1 + $0x128] sm:$0xff]   ;;  %v1633_v57 = vld [vmem:[%s2119_s0 + $0x9c] ss:$36 sps:$4 sm:$0xff]  }
  0x14   :  { %1368 = vmatpush3.bf16.msra.mxu0 %v1589_v18  ;;  %v1626_v51 = vld [vmem:[%s2118_s1 + $0x1a8] sm:$0xff]   ;;  %v1635_v58 = vld [vmem:[%s2119_s0 + $0x90] ss:$36 sps:$4 sm:$0xff]   ;;  %v1636_v59 = vld [vmem:[%s2119_s0 + $0x98] ss:$36 sps:$4 sm:$0xff]  }
  0x15   :  { %1408 = vmatpush3.bf16.msra.mxu1 %v1590_v19  ;;  %1369 = vmatprep.subr.bf16.mxu0 %v1591_v20  ;;  %v1637_v60 = vld [vmem:[%s2118_s1 + $0x158] sm:$0xff]   ;;  %v1641_v0 = vld [vmem:[%s2118_s1 + $0x150] sm:$0xff]   ;;  %v46_v5 = vld [vmem:[%s2119_s0 + $0xe0] sm:$0x11] }
  0x16   :  { %1409 = vmatprep.subr.bf16.mxu1 %v1592_v21  ;;  %v1638_v61 = vld [vmem:[%s2118_s1 + $0x1d8] sm:$0xff]   ;;  %v1642_v1 = vld [vmem:[%s2118_s1 + $0x1d0] sm:$0xff]   ;;  %v1243_v7 = vcombine.high %v46_v5, %v46_v5  ;;  %v1242_v9 = vcombine.low %v46_v5, %v46_v5  ;;  %v1649_v10 = vld [vmem:[%s2118_s1 + $0x148] sm:$0xff]  }
  0x17   :  { %v1639_v62 = vld [vmem:[%s2118_s1 + $0x118] sm:$0xff]   ;;  %v1643_v2 = vld [vmem:[%s2118_s1 + $0x110] sm:$0xff]   ;;  %v1650_v11 = vld [vmem:[%s2118_s1 + $0x1c8] sm:$0xff]  }
  0x18   :  { %1370 = vmatpush3.bf16.msra.mxu0 %v1593_v22  ;;  %v1640_v63 = vld [vmem:[%s2118_s1 + $0x198] sm:$0xff]   ;;  %v1644_v3 = vld [vmem:[%s2118_s1 + $0x190] sm:$0xff]   ;;  %v1651_v12 = vld [vmem:[%s2118_s1 + $0x108] sm:$0xff]  }
  0x19   :  { %1410 = vmatpush3.bf16.msra.mxu1 %v1594_v23  ;;  %1371 = vmatprep.subr.bf16.mxu0 %v1595_v24  ;;  %v45_v4 = vld [vmem:[%s2119_s0 + $0xd8] sm:$0x11]  ;;  %v1652_v13 = vld [vmem:[%s2118_s1 + $0x188] sm:$0xff]   ;;  %v1653_v14 = vld [vmem:[%s2118_s1 + $0x140] sm:$0xff]  }
  0x1a   :  { %1411 = vmatprep.subr.bf16.mxu1 %v1596_v25  ;;  %v1241_v6 = vcombine.high %v45_v4, %v45_v4  ;;  %v1240_v8 = vcombine.low %v45_v4, %v45_v4  ;;  %v1654_v15 = vld [vmem:[%s2118_s1 + $0x1c0] sm:$0xff]   ;;  %v1657_v18 = vld [vmem:[%s2119_s0 + $0x10] ss:$36 sps:$4 sm:$0xff]   ;;  %v1660_v20 = vld [vmem:[%s2119_s0 + $0x18] ss:$36 sps:$4 sm:$0xff]  }
  0x1b   :  { %v1655_v16 = vld [vmem:[%s2118_s1 + $0x100] sm:$0xff]   ;;  %v1659_v19 = vld [vmem:[%s2119_s0 + $0x14] ss:$36 sps:$4 sm:$0xff]   ;;  %v47_v33 = vld [vmem:[%s2119_s0 + $0xe8] sm:$0x11] }
  0x1c   :  { %1372 = vmatpush3.bf16.msra.mxu0 %v1597_v26  ;;  %v1656_v17 = vld [vmem:[%s2118_s1 + $0x180] sm:$0xff]   ;;  %v1663_v22 = vld [vmem:[%s2118_s1 + $0x238] sm:$0xff]   ;;  %v1664_v23 = vld [vmem:[%s2118_s1 + $0x230] sm:$0xff]  }
  0x1d   :  { %1412 = vmatpush3.bf16.msra.mxu1 %v1598_v27  ;;  %1373 = vmatprep.subr.bf16.mxu0 %v1599_v28  ;;  %v1662_v21 = vld [vmem:[%s2119_s0 + $0x1c] ss:$36 sps:$4 sm:$0xff]   ;;  %v1667_v25 = vld [vmem:[%s2119_s0 + $0x64] ss:$36 sps:$4 sm:$0xff]  }
  0x1e   :  { %1413 = vmatprep.subr.bf16.mxu1 %v1600_v29  ;;  %v1665_v24 = vld [vmem:[%s2119_s0 + $0x5c] ss:$36 sps:$4 sm:$0xff]   ;;  %v1671_v27 = vld [vmem:[%s2118_s1 + $0x228] sm:$0xff]  }
  0x1f   :  { %v1669_v26 = vld [vmem:[%s2119_s0 + $0x58] ss:$36 sps:$4 sm:$0xff]   ;;  %v1670_v28 = vld [vmem:[%s2119_s0 + $0x60] ss:$36 sps:$4 sm:$0xff]  }
  0x20   :  { %1374 = vmatpush3.bf16.msra.mxu0 %v1601_v30  ;;  %v1673_v29 = vld [vmem:[%s2119_s0 + $0xa4] ss:$36 sps:$4 sm:$0xff]   ;;  %v1675_v30 = vld [vmem:[%s2119_s0 + $0xac] ss:$36 sps:$4 sm:$0xff]  }
  0x21   :  { %1414 = vmatpush3.bf16.msra.mxu1 %v1602_v31  ;;  %1439 = vmatprep.subr.bf16.mxu0 %v1609_v36  ;;  %v1672_v31 = vld [vmem:[%s2118_s1 + $0x220] sm:$0xff]   ;;  %v1678_v36 = vld [vmem:[%s2119_s0 + $0xa8] ss:$36 sps:$4 sm:$0xff]  }
  0x22   :  { %1479 = vmatprep.subr.bf16.mxu1 %v1610_v37  ;;  %v1677_v35 = vld [vmem:[%s2119_s0 + $0xa0] ss:$36 sps:$4 sm:$0xff]   ;;  %v1245_v37 = vcombine.high %v47_v33, %v47_v33 }
  0x23   :  { %836 = vmatmul.mubr.bf16.vlgmr.msra.gmra.mxu0 %v1603_v32  ;;  %v1679_v32 = vld [vmem:[%s2118_s1 + $0x218] sm:$0xff]  }
  0x24   :  { %900 = vmatmul.mubr.bf16.vlgmr.msra.gmra.mxu1 %v1606_v34  ;;  %1440 = vmatpush3.bf16.msra.mxu0 %v1611_v38  ;;  %v48_v34 = vld [vmem:[%s2119_s0 + $0xf0] sm:$0x11] }
  0x25   :  { %1480 = vmatpush3.bf16.msra.mxu1 %v1612_v39  ;;  %1441 = vmatprep.subr.bf16.mxu0 %v1613_v40  ;;  %v1247_v38 = vcombine.high %v48_v34, %v48_v34  ;;  %v1680_v39 = vld [vmem:[%s2118_s1 + $0x210] sm:$0xff]   ;;  %v1685_v40 = vld [vmem:[%s2118_s1 + $0x208] sm:$0xff]  }
  0x26   :  { %1481 = vmatprep.subr.bf16.mxu1 %v1614_v41  ;;  %843 = vmatprep.mubr.bf16.mxu0 %v1617_v44  ;;  %v1244_v41 = vcombine.low %v47_v33, %v47_v33  ;;  %v1688_v44 = vld [vmem:[%s2119_s0 + $0xb0] ss:$36 sps:$4 sm:$0xff]  }
  0x27   :  { %907 = vmatprep.mubr.bf16.mxu1 %v1619_v45  ;;  %v1686_v45 = vld [vmem:[%s2118_s1 + $0x200] sm:$0xff]  }
  0x28   :  { %1442 = vmatpush3.bf16.msra.mxu0 %v1615_v42  ;;  %v1246_v42 = vcombine.low %v48_v34, %v48_v34 }
  0x29   :  { %1482 = vmatpush3.bf16.msra.mxu1 %v1616_v43  ;;  %1443 = vmatprep.subr.bf16.mxu0 %v1623_v48  ;;  %v1687_v43 = vld [vmem:[%s2119_s0 + $0x20] ss:$36 sps:$4 sm:$0xff]  }
  0x2a   :  { %1483 = vmatprep.subr.bf16.mxu1 %v1624_v49 }
  0x2b   :  { %844 = vmatmul.mubr.bf16.gmra.mxu0 %v1621_v46  ;;  %v1689_v46 = vld [vmem:[%s2119_s0 + $0x68] ss:$36 sps:$4 sm:$0xff]  }
  0x2c   :  { %908 = vmatmul.mubr.bf16.gmra.mxu1 %v1622_v47  ;;  %1444 = vmatpush3.bf16.msra.mxu0 %v1625_v50  ;;  %v1690_v47 = vld [vmem:[%s2119_s0 + $0xf8] ss:$0 sps:$4 sm:$0x11]  }
  0x2d   :  { %1484 = vmatpush3.bf16.msra.mxu1 %v1626_v51  ;;  %1445 = vmatprep.subr.bf16.mxu0 %v1627_v52 }
  0x2e   :  { %1485 = vmatprep.subr.bf16.mxu1 %v1628_v53  ;;  %851 = vmatprep.mubr.bf16.mxu0 %v1631_v56 }
  0x2f   :  { %915 = vmatprep.mubr.bf16.mxu1 %v1633_v57 }
  0x30   :  { %1446 = vmatpush3.bf16.msra.mxu0 %v1629_v54 }
  0x31   :  { %1486 = vmatpush3.bf16.msra.mxu1 %v1630_v55  ;;  %1447 = vmatprep.subr.bf16.mxu0 %v1637_v60 }
  0x32   :  { %1487 = vmatprep.subr.bf16.mxu1 %v1638_v61 }
  0x33   :  { %852 = vmatmul.mubr.bf16.gmra.mxu0 %v1635_v58 }
  0x34   :  { %916 = vmatmul.mubr.bf16.gmra.mxu1 %v1636_v59  ;;  %1448 = vmatpush3.bf16.msra.mxu0 %v1639_v62 }
  0x35   :  { %1488 = vmatpush3.bf16.msra.mxu1 %v1640_v63  ;;  %1449 = vmatprep.subr.bf16.mxu0 %v1641_v0 }
  0x36   :  { %1489 = vmatprep.subr.bf16.mxu1 %v1642_v1  ;;  %859 = vmatprep.mubr.bf16.mxu0 %v1241_v6 }
  0x37   :  { %923 = vmatprep.mubr.bf16.mxu1 %v1243_v7 }
  0x38   :  { %1450 = vmatpush3.bf16.msra.mxu0 %v1643_v2 }
  0x39   :  { %1490 = vmatpush3.bf16.msra.mxu1 %v1644_v3  ;;  %1451 = vmatprep.subr.bf16.mxu0 %v1649_v10 }
  0x3a   :  { %1491 = vmatprep.subr.bf16.mxu1 %v1650_v11 }
  0x3b   :  { %860 = vmatmul.mubr.bf16.gmra.mxu0 %v1240_v8 }
  0x3c   :  { %924 = vmatmul.mubr.bf16.gmra.mxu1 %v1242_v9  ;;  %1452 = vmatpush3.bf16.msra.mxu0 %v1651_v12 }
  0x3d   :  { %1492 = vmatpush3.bf16.msra.mxu1 %v1652_v13  ;;  %1453 = vmatprep.subr.bf16.mxu0 %v1653_v14 }
  0x3e   :  { %1493 = vmatprep.subr.bf16.mxu1 %v1654_v15  ;;  %963 = vmatprep.mubr.bf16.mxu0 %v1659_v19 }
  0x3f   :  { %1027 = vmatprep.mubr.bf16.mxu1 %v1662_v21 }
  0x40   :  { %1454 = vmatpush3.bf16.msra.mxu0 %v1655_v16 }
  0x41   :  { %1494 = vmatpush3.bf16.msra.mxu1 %v1656_v17  ;;  %1531 = vmatprep.subr.bf16.mxu0 %v1663_v22 }
  0x42   :  { %1555 = vmatprep.subr.bf16.mxu1 %v1663_v22 }
  0x43   :  { %964 = vmatmul.mubr.bf16.vlgmr.msra.gmra.mxu0 %v1657_v18 }
  0x44   :  { %1028 = vmatmul.mubr.bf16.vlgmr.msra.gmra.mxu1 %v1660_v20  ;;  %1532 = vmatpush3.bf16.msra.mxu0 %v1663_v22 }
  0x45   :  { %1563 = vmatpush3.bf16.msra.mxu1 %v1663_v22  ;;  %1533 = vmatprep.subr.bf16.mxu0 %v1664_v23 }
  0x46   :  { %1556 = vmatprep.subr.bf16.mxu1 %v1664_v23  ;;  %971 = vmatprep.mubr.bf16.mxu0 %v1665_v24 }
  0x47   :  { %1035 = vmatprep.mubr.bf16.mxu1 %v1667_v25 }
  0x48   :  { %1534 = vmatpush3.bf16.msra.mxu0 %v1664_v23 }
  0x49   :  { %1564 = vmatpush3.bf16.msra.mxu1 %v1664_v23  ;;  %1535 = vmatprep.subr.bf16.mxu0 %v1671_v27 }
  0x4a   :  { %1557 = vmatprep.subr.bf16.mxu1 %v1671_v27 }
  0x4b   :  { %972 = vmatmul.mubr.bf16.gmra.mxu0 %v1669_v26 }
  0x4c   :  { %1036 = vmatmul.mubr.bf16.gmra.mxu1 %v1670_v28  ;;  %979 = vmatprep.mubr.bf16.mxu0 %v1673_v29 }
  0x4d   :  { %1536 = vmatpush3.bf16.msra.mxu0 %v1671_v27  ;;  %1043 = vmatprep.mubr.bf16.mxu1 %v1675_v30 }
  0x4e   :  { %1565 = vmatpush3.bf16.msra.mxu1 %v1671_v27  ;;  %1537 = vmatprep.subr.bf16.mxu0 %v1672_v31 }
  0x4f   :  { %1558 = vmatprep.subr.bf16.mxu1 %v1672_v31 }
  0x51   :  { %1538 = vmatpush3.bf16.msra.mxu0 %v1672_v31 }
  0x52   :  { %1566 = vmatpush3.bf16.msra.mxu1 %v1672_v31  ;;  %1539 = vmatprep.subr.bf16.mxu0 %v1679_v32 }
  0x53   :  { %980 = vmatmul.mubr.bf16.gmra.mxu0 %v1677_v35  ;;  %1559 = vmatprep.subr.bf16.mxu1 %v1679_v32  ;;  %v1212_v35 = vld [vmem:[%s2120_s2] ss:$0 sm:$0xff] }
  0x54   :  { %1044 = vmatmul.mubr.bf16.gmra.mxu1 %v1678_v36  ;;  %987 = vmatprep.mubr.bf16.mxu0 %v1245_v37 }
  0x55   :  { %1540 = vmatpush3.bf16.msra.mxu0 %v1679_v32  ;;  %1051 = vmatprep.mubr.bf16.mxu1 %v1247_v38 }
  0x56   :  { %1567 = vmatpush3.bf16.msra.mxu1 %v1679_v32  ;;  %1541 = vmatprep.subr.bf16.mxu0 %v1680_v39 }
  0x57   :  { %1560 = vmatprep.subr.bf16.mxu1 %v1680_v39 }
  0x59   :  { %1542 = vmatpush3.bf16.msra.mxu0 %v1680_v39 }
  0x5a   :  { %1568 = vmatpush3.bf16.msra.mxu1 %v1680_v39  ;;  %1543 = vmatprep.subr.bf16.mxu0 %v1685_v40 }
  0x5b   :  { %988 = vmatmul.mubr.bf16.gmra.mxu0 %v1244_v41  ;;  %1561 = vmatprep.subr.bf16.mxu1 %v1685_v40 }
  0x5c   :  { %1052 = vmatmul.mubr.bf16.gmra.mxu1 %v1246_v42  ;;  %1547 = vmatprep.mubr.bf16.mxu0 %v1687_v43 }
  0x5d   :  { %1544 = vmatpush3.bf16.msra.mxu0 %v1685_v40  ;;  %1551 = vmatprep.mubr.bf16.mxu1 %v1688_v44 }
  0x5e   :  { %1569 = vmatpush3.bf16.msra.mxu1 %v1685_v40  ;;  %1545 = vmatprep.subr.bf16.mxu0 %v1686_v45 }
  0x5f   :  { %1562 = vmatprep.subr.bf16.mxu1 %v1686_v45 }
  0x61   :  { %1546 = vmatpush3.bf16.msra.mxu0 %v1686_v45 }
  0x62   :  { %1570 = vmatpush3.bf16.msra.mxu1 %v1686_v45 }
  0x64   :  { %1548 = vmatmul.mubr.bf16.vlgmr.msra.gmra.mxu0 %v1689_v46 }
  0x65   :  { %1552 = vmatmul.mubr.bf16.vlgmr.msra.gmra.mxu1 %v1690_v47 }
  0xe3   :  { %v1375_v48 = vpop.f32.mrf.mxu0 }
  0xe4   :  { %v2051_v49 = vpop.f32.mrf.mxu1 }
  0xe5   :  { %v1376_v50 = vpop.f32.mrf.mxu0 }
  0xe6   :  { %v1416_v51 = vpop.f32.mrf.mxu1  ;;  %v1377_v33 = vadd.f32 %v1376_v50, %v1375_v48 }
  0xe7   :  { %v2053_v52 = vpop.f32.mrf.mxu0  ;;  %v1417_v47 = vadd.f32 %v1416_v51, %v2051_v49 }
  0xe8   :  { %v2055_v53 = vpop.f32.mrf.mxu1  ;;  %v838_v41 = vadd.f32 %v1377_v33, %v1212_v35 }
  0xe9   :  { %v1379_v54 = vpop.f32.mrf.mxu0 }
  0xea   :  { %v2057_v55 = vpop.f32.mrf.mxu1 }
  0xeb   :  { %v1381_v56 = vpop.f32.mrf.mxu0 }
  0xec   :  { %v1421_v57 = vpop.f32.mrf.mxu1 }
  0xed   :  { %v1382_v58 = vpop.f32.mrf.mxu0 }
  0xee   :  { %v1422_v59 = vpop.f32.mrf.mxu1  ;;  %v1383_v36 = vadd.f32 %v1382_v58, %v1381_v56  ;;  %v902_v58 = vadd.f32 %v1417_v47, %v838_v41 }
  0xef   :  { %v1384_v60 = vpop.f32.mrf.mxu0 }
  0xf0   :  { %v2059_v61 = vpop.f32.mrf.mxu1  ;;  %v846_v44 = vadd.f32 %v1383_v36, %v1212_v35 }
  0xf1   :  { %v1385_v62 = vpop.f32.mrf.mxu0 }
  0xf2   :  { %v2061_v63 = vpop.f32.mrf.mxu1  ;;  %v1386_v45 = vadd.f32 %v1385_v62, %v1384_v60 }
  0xf3   :  { %v1387_v0 = vpop.f32.mrf.mxu0 }
  0xf4   :  { %v2063_v1 = vpop.f32.mrf.mxu1  ;;  %v849_v60 = vadd.f32 %v1386_v45, %v1212_v35 }
  0xf5   :  { %v1388_v2 = vpop.f32.mrf.mxu0 }
  0xf6   :  { %v1428_v3 = vpop.f32.mrf.mxu1  ;;  %v1389_v42 = vadd.f32 %v1388_v2, %v1387_v0  ;;  %v1420_v0 = vadd.f32 %v2057_v55, %v2055_v53 }
  0xf7   :  { %v1390_v4 = vpop.f32.mrf.mxu0  ;;  %v1429_v49 = vadd.f32 %v1428_v3, %v2063_v1 }
  0xf8   :  { %v2065_v5 = vpop.f32.mrf.mxu1 }
  0xf9   :  { %v1391_v6 = vpop.f32.mrf.mxu0 }
  0xfa   :  { %v2067_v7 = vpop.f32.mrf.mxu1 }
  0xfb   :  { %v1393_v8 = vpop.f32.mrf.mxu0 }
  0xfc   :  { %v1433_v9 = vpop.f32.mrf.mxu1 }
  0xfd   :  { %v1394_v10 = vpop.f32.mrf.mxu0 }
  0xfe   :  { %v1434_v11 = vpop.f32.mrf.mxu1  ;;  %v1395_v38 = vadd.f32 %v1394_v10, %v1393_v8  ;;  %v854_v8 = vadd.f32 %v1389_v42, %v1212_v35  ;;  %v1392_v10 = vadd.f32 %v1391_v6, %v1390_v4 }
  0xff   :  { %v1396_v12 = vpop.f32.mrf.mxu0 }
 0x100   :  { %v1436_v13 = vpop.f32.mrf.mxu1  ;;  %v862_v48 = vadd.f32 %v1395_v38, %v1212_v35  ;;  %v1380_v12 = vadd.f32 %v1379_v54, %v2053_v52 }
 0x101   :  { %v1397_v14 = vpop.f32.mrf.mxu0  ;;  %v1423_v13 = vadd.f32 %v1422_v59, %v1421_v57  ;;  %v1426_v59 = vadd.f32 %v2061_v63, %v2059_v61 }
 0x102   :  { %v1437_v15 = vpop.f32.mrf.mxu1  ;;  %v841_v57 = vadd.f32 %v1380_v12, %v1212_v35 }
 0x103   :  { %v1455_v16 = vpop.f32.mrf.mxu0  ;;  %v1435_v15 = vadd.f32 %v1434_v11, %v1433_v9  ;;  %v910_v2 = vadd.f32 %v1423_v13, %v846_v44  ;;  %v918_v11 = vadd.f32 %v1429_v49, %v854_v8 }
 0x104   :  { %v2069_v17 = vpop.f32.mrf.mxu1  ;;  %v905_v63 = vadd.f32 %v1420_v0, %v841_v57 }
 0x105   :  { %v1456_v18 = vpop.f32.mrf.mxu0  ;;  %v926_v51 = vadd.f32 %v1435_v15, %v862_v48 }
 0x106   :  { %v2071_v19 = vpop.f32.mrf.mxu1  ;;  %v1457_v62 = vadd.f32 %v1456_v18, %v1455_v16  ;;  %v913_v16 = vadd.f32 %v1426_v59, %v849_v60 }
 0x107   :  { %v1458_v20 = vpop.f32.mrf.mxu0 }
 0x108   :  { %v2073_v21 = vpop.f32.mrf.mxu1  ;;  %v966_v18 = vadd.f32 %v1457_v62, %v902_v58 }
 0x109   :  { %v1459_v22 = vpop.f32.mrf.mxu0 }
 0x10a   :  { %v2075_v23 = vpop.f32.mrf.mxu1  ;;  %v1460_v41 = vadd.f32 %v1459_v22, %v1458_v20 }
 0x10b   :  { %v1461_v24 = vpop.f32.mrf.mxu0 }
 0x10c   :  { %v1501_v25 = vpop.f32.mrf.mxu1  ;;  %v969_v12 = vadd.f32 %v1460_v41, %v905_v63 }
 0x10d   :  { %v1462_v26 = vpop.f32.mrf.mxu0 }
 0x10e   :  { %v1502_v27 = vpop.f32.mrf.mxu1  ;;  %v1463_v14 = vadd.f32 %v1462_v26, %v1461_v24  ;;  %v857_v24 = vadd.f32 %v1392_v10, %v1212_v35 }
 0x10f   :  { %v1464_v28 = vpop.f32.mrf.mxu0  ;;  %v1503_v1 = vadd.f32 %v1502_v27, %v1501_v25 }
 0x110   :  { %v2077_v29 = vpop.f32.mrf.mxu1  ;;  %v974_v4 = vadd.f32 %v1463_v14, %v910_v2 }
 0x111   :  { %v1465_v30 = vpop.f32.mrf.mxu0 }
 0x112   :  { %v2079_v31 = vpop.f32.mrf.mxu1  ;;  %v1466_v6 = vadd.f32 %v1465_v30, %v1464_v28  ;;  %v1497_v28 = vadd.f32 %v2071_v19, %v2069_v17  ;;  %v1038_v35 = vadd.f32 %v1503_v1, %v974_v4  ;;  %v1500_v17 = vadd.f32 %v2075_v23, %v2073_v21 }
 0x113   :  { %v1467_v32 = vpop.f32.mrf.mxu0  ;;  %v1506_v20 = vadd.f32 %v2079_v31, %v2077_v29 }
 0x114   :  { %v1507_v34 = vpop.f32.mrf.mxu1  ;;  %v977_v30 = vadd.f32 %v1466_v6, %v913_v16  ;;  %v1033_v15 = vadd.f32 %v1500_v17, %v969_v12 }
 0x115   :  { %v1468_v37 = vpop.f32.mrf.mxu0 }
 0x116   :  { %v1508_v39 = vpop.f32.mrf.mxu1  ;;  %v1469_v38 = vadd.f32 %v1468_v37, %v1467_v32  ;;  %v1432_v32 = vadd.f32 %v2067_v7, %v2065_v5  ;;  %v1030_v7 = vadd.f32 %v1497_v28, %v966_v18 }
 0x117   :  { %v1470_v40 = vpop.f32.mrf.mxu0  ;;  %v1509_v47 = vadd.f32 %v1508_v39, %v1507_v34  ;;  %v1041_v39 = vadd.f32 %v1506_v20, %v977_v30 }
 0x118   :  { %v2084_v43 = vpop.f32.mrf.mxu1  ;;  %v982_v37 = vadd.f32 %v1469_v38, %v918_v11  ;;  %v921_v45 = vadd.f32 %v1432_v32, %v857_v24 }
 0x119   :  { %v1471_v46 = vpop.f32.mrf.mxu0 }
 0x11a   :  { %v1511_v50 = vpop.f32.mrf.mxu1  ;;  %v1472_v42 = vadd.f32 %v1471_v46, %v1470_v40  ;;  %v1046_v46 = vadd.f32 %v1509_v47, %v982_v37 }
 0x11b   :  { %v1473_v56 = vpop.f32.mrf.mxu0  ;;  %v1512_v14 = vadd.f32 %v1511_v50, %v2084_v43 }
 0x11c   :  { %v1513_v33 = vpop.f32.mrf.mxu1  ;;  %v985_v25 = vadd.f32 %v1472_v42, %v921_v45 }
 0x11d   :  { %v1474_v36 = vpop.f32.mrf.mxu0 }
 0x11e   :  { %v1475_v52 = vadd.f32 %v1474_v36, %v1473_v56  ;;  %v1514_v54 = vpop.f32.mrf.mxu1  ;;  %v1049_v2 = vadd.f32 %v1512_v14, %v985_v25 }
 0x11f   :  { %v1476_v9 = vpop.f32.mrf.mxu0  ;;  %v1515_v55 = vadd.f32 %v1514_v54, %v1513_v33 }
 0x120   :  { %v990_v53 = vadd.f32 %v1475_v52, %v926_v51  ;;  %v1516_v26 = vpop.f32.mrf.mxu1 }
 0x121   :  { %v1477_v3 = vpop.f32.mrf.mxu0 }
 0x122   :  { %v1517_v44 = vpop.f32.mrf.mxu1  ;;  %v1054_v61 = vadd.f32 %v1515_v55, %v990_v53 }
 0x124   :  { %v1549_v48 = vpop.f32.mrf.mxu0 }
 0x125   :  { %v2099_v22 = vadd.f32 %v1549_v48, %v1038_v35  ;;  %v1553_v5 = vpop.f32.mrf.mxu1 }
 0x126   :  { %v1118_v27 = vadd.f32 %v1553_v5, %v1054_v61  ;;  %v1093_v40 = vpop.f32.mrf.mxu0 }
 0x127   :  { %v1323_v19 = vmul.f32 -1.442695, %v2099_v22  ;;  %v1094_v13 = vadd.f32 %v1093_v40, %v1030_v7  ;;  %v1109_v34 = vpop.f32.mrf.mxu1 }
 0x128   :  { %v1327_v56 = vmul.f32 -1.442695, %v1118_v27  ;;  %v1110_v29 = vadd.f32 %v1109_v34, %v1046_v46  ;;  %v1550_v31 = vpop.f32.mrf.mxu0 }
 0x129   :  { %1691 = vpow2.f32 %v1323_v19  ;;  %v1321_v58 = vmul.f32 -1.442695, %v1094_v13  ;;  %v1105_v8 = vadd.f32 %v1550_v31, %v1041_v39  ;;  %v1554_v10 = vpop.f32.mrf.mxu1 }
 0x12a   :  { %1693 = vpow2.f32 %v1327_v56  ;;  %v1325_v33 = vmul.f32 -1.442695, %v1110_v29  ;;  %v1096_v0 = vpop.f32.mrf.mxu0 }
 0x12b   :  { %1695 = vpow2.f32 %v1321_v58  ;;  %v1324_v21 = vmul.f32 -1.442695, %v1105_v8  ;;  %v1097_v23 = vadd.f32 %v1096_v0, %v1033_v15  ;;  %v1112_v60 = vpop.f32.mrf.mxu1 }
 0x12c   :  { %1697 = vpow2.f32 %v1325_v33  ;;  %v1113_v62 = vadd.f32 %v1112_v60, %v1049_v2 }
 0x12d   :  { %1699 = vpow2.f32 %v1324_v21  ;;  %v1322_v43 = vmul.f32 -1.442695, %v1097_v23 }
 0x12e   :  { %v1326_v50 = vmul.f32 -1.442695, %v1113_v62 }
 0x12f   :  { %1701 = vpow2.f32 %v1322_v43 }
 0x130   :  { %1703 = vpow2.f32 %v1326_v50 }
 0x136   :  { %v1692_v36 = vpop.eup %1691 }
 0x137   :  { %v1694_v49 = vpop.eup %1693  ;;  %v1146_v51 = vadd.f32 1.0, %v1692_v36 }
 0x138   :  { %v1696_v38 = vpop.eup %1695  ;;  %v1150_v52 = vadd.f32 1.0, %v1694_v49 }
 0x139   :  { %v1698_v54 = vpop.eup %1697  ;;  %v1144_v57 = vadd.f32 1.0, %v1696_v38 }
 0x13a   :  { %v1700_v59 = vpop.eup %1699  ;;  %1705 = vrcp.f32 %v1150_v52  ;;  %v1148_v4 = vadd.f32 1.0, %v1698_v54 }
 0x13b   :  { %1707 = vrcp.f32 %v1146_v51  ;;  %v1147_v6 = vadd.f32 1.0, %v1700_v59 }
 0x13c   :  { %v1702_v9 = vpop.eup %1701  ;;  %1709 = vrcp.f32 %v1144_v57 }
 0x13d   :  { %v1704_v11 = vpop.eup %1703  ;;  %1711 = vrcp.f32 %v1147_v6  ;;  %v1145_v24 = vadd.f32 1.0, %v1702_v9 }
 0x13e   :  { %1713 = vrcp.f32 %v1148_v4  ;;  %v1149_v53 = vadd.f32 1.0, %v1704_v11 }
 0x13f   :  { %1715 = vrcp.f32 %v1145_v24 }
 0x140   :  { %1717 = vrcp.f32 %v1149_v53 }
 0x147   :  { %v1706_v55 = vpop.eup %1705 }
 0x148   :  { %v1708_v26 = vpop.eup %1707  ;;  %v1171_v16 = vmul.f32 %v1706_v55, %v1118_v27 }
 0x149   :  { %v1710_v18 = vpop.eup %1709  ;;  %v1167_v32 = vmul.f32 %v1708_v26, %v2099_v22 }
 0x14a   :  { %v1712_v41 = vpop.eup %1711  ;;  %v1341_v1 = vpack.c.bf16 %v1171_v16, %v1171_v16  ;;  %v1165_v61 = vmul.f32 %v1710_v18, %v1094_v13 }
 0x14b   :  { %v1714_v3 = vpop.eup %1713  ;;  %v1168_v37 = vmul.f32 %v1712_v41, %v1105_v8 }
 0x14c   :  { %v1716_v42 = vpop.eup %1715  ;;  %1207 = vst [vmem:[%s2121_s3 + $0x18] sm:$0x1] %v1341_v1  ;;  %v1169_v30 = vmul.f32 %v1714_v3, %v1110_v29 }
 0x14d   :  { %v1718_v44 = vpop.eup %1717  ;;  %v1350_v63 = vpack.c.bf16 %v1168_v37, %v1167_v32  ;;  %v1166_v28 = vmul.f32 %v1716_v42, %v1097_v23 }
 0x14e   :  { %v1170_v35 = vmul.f32 %v1718_v44, %v1113_v62 }
 0x14f   :  { %1357 = vst [vmem:[%s2121_s3 + $0x8] sm:$0xff] %v1350_v63   ;;  %v1345_v45 = vpack.c.bf16 %v1166_v28, %v1165_v61 }
 0x150   :  { %v1355_v47 = vpack.c.bf16 %v1170_v35, %v1169_v30 }
 0x151   :  { %1346 = vst [vmem:[%s2121_s3] sm:$0xff] %v1345_v45  }
 0x152   :  { %1358 = vst [vmem:[%s2121_s3 + $0x10] sm:$0xff] %v1355_v47  }

// kernel: net_forward.9
= control target key start
LH: loop header
LB: loop body
LE: loop exit
PB: predicated region body
PF: predicated region fallthrough
CT: control target
= control target key end

     0   :  { %v3524_v41 = vmov 1983009808   ;;  %v45_v43 = vlaneseq  ;;  %s4619_s0 = inlined_call_operand.vmem [shape: bf16[2,1152], index: 0, kind: input, shape index: {}]   ;;  %s4620_s1 = inlined_call_operand.vmem [shape: bf16[2,1152], index: 1, kind: input, shape index: {}]   ;;  %s4621_s2 = inlined_call_operand.vmem [shape: bf16[1152,512], index: 2, kind: input, shape index: {}]   ;;  %s4622_s3 = inlined_call_operand.vmem [shape: f32[1,512], index: 3, kind: input, shape index: {}]   ;;  %s4623_s4 = inlined_call_operand.vmem [shape: bf16[512,128], index: 4, kind: input, shape index: {}]   ;;  %s4624_s5 = inlined_call_operand.vmem [shape: f32[1,128], index: 5, kind: input, shape index: {}]   ;;  %s4625_s6 = inlined_call_operand.hbm [shape: f32[2,128], index: 6, kind: output, shape index: {}]  }
   0x1   :  { %v3022_v0 = vld [vmem:[%s4621_s2 + $0xe4] ss:$16 sps:$4 sm:$0xff]   ;;  %v3026_v2 = vld [vmem:[%s4621_s2 + $0xe0] ss:$16 sps:$4 sm:$0xff]   ;;  %v43_v42 = vunpack.c.l.s4 %v3524_v41 }
   0x2   :  { %v3024_v1 = vld [vmem:[%s4621_s2 + $0x2e4] ss:$16 sps:$4 sm:$0xff]   ;;  %1850 = vmatprep.subr.bf16.mxu0 %v3022_v0  ;;  %v3027_v3 = vld [vmem:[%s4621_s2 + $0x2e0] ss:$16 sps:$4 sm:$0xff]   ;;  %v3697_v49 = vshrl.u32 %v45_v43, 7 }
   0x3   :  { %1891 = vmatprep.subr.bf16.mxu1 %v3024_v1  ;;  %v3028_v4 = vld [vmem:[%s4621_s2 + $0xc4] ss:$16 sps:$4 sm:$0xff]   ;;  %1851 = vmatpush1.bf16.msra.mxu0 %v3026_v2  ;;  %v3032_v6 = vld [vmem:[%s4621_s2 + $0xc0] ss:$16 sps:$4 sm:$0xff]   ;;  %v44_v48 = vunpack.c.0.s8 %v43_v42 }
   0x4   :  { %1892 = vmatpush1.bf16.msra.mxu1 %v3027_v3  ;;  %v3030_v5 = vld [vmem:[%s4621_s2 + $0x2c4] ss:$16 sps:$4 sm:$0xff]   ;;  %1852 = vmatprep.subr.bf16.mxu0 %v3028_v4  ;;  %v3033_v7 = vld [vmem:[%s4621_s2 + $0x2c0] ss:$16 sps:$4 sm:$0xff]  }
   0x5   :  { %1893 = vmatprep.subr.bf16.mxu1 %v3030_v5  ;;  %v3034_v8 = vld [vmem:[%s4621_s2 + $0xa4] ss:$16 sps:$4 sm:$0xff]   ;;  %v3038_v10 = vld [vmem:[%s4621_s2 + $0xa0] ss:$16 sps:$4 sm:$0xff]   ;;  %v3715_v57 = vsub.s32 %v44_v48, %v3697_v49 }
   0x6   :  { %v3036_v9 = vld [vmem:[%s4621_s2 + $0x2a4] ss:$16 sps:$4 sm:$0xff]   ;;  %v3039_v11 = vld [vmem:[%s4621_s2 + $0x2a0] ss:$16 sps:$4 sm:$0xff]  }
   0x7   :  { %1853 = vmatpush1.bf16.msra.mxu0 %v3032_v6  ;;  %v3040_v12 = vld [vmem:[%s4621_s2 + $0x84] ss:$16 sps:$4 sm:$0xff]   ;;  %v3044_v14 = vld [vmem:[%s4621_s2 + $0x80] ss:$16 sps:$4 sm:$0xff]  }
   0x8   :  { %1894 = vmatpush1.bf16.msra.mxu1 %v3033_v7  ;;  %1854 = vmatprep.subr.bf16.mxu0 %v3034_v8  ;;  %v3042_v13 = vld [vmem:[%s4621_s2 + $0x284] ss:$16 sps:$4 sm:$0xff]   ;;  %v3045_v15 = vld [vmem:[%s4621_s2 + $0x280] ss:$16 sps:$4 sm:$0xff]  }
   0x9   :  { %1895 = vmatprep.subr.bf16.mxu1 %v3036_v9  ;;  %v3046_v16 = vld [vmem:[%s4621_s2 + $0x64] ss:$16 sps:$4 sm:$0xff]   ;;  %v3050_v18 = vld [vmem:[%s4621_s2 + $0x60] ss:$16 sps:$4 sm:$0xff]  }
   0xa   :  { %v3048_v17 = vld [vmem:[%s4621_s2 + $0x264] ss:$16 sps:$4 sm:$0xff]   ;;  %v3051_v19 = vld [vmem:[%s4621_s2 + $0x260] ss:$16 sps:$4 sm:$0xff]  }
   0xb   :  { %1855 = vmatpush1.bf16.msra.mxu0 %v3038_v10  ;;  %v3052_v20 = vld [vmem:[%s4621_s2 + $0x44] ss:$16 sps:$4 sm:$0xff]   ;;  %v3056_v22 = vld [vmem:[%s4621_s2 + $0x40] ss:$16 sps:$4 sm:$0xff]  }
   0xc   :  { %1896 = vmatpush1.bf16.msra.mxu1 %v3039_v11  ;;  %1856 = vmatprep.subr.bf16.mxu0 %v3040_v12  ;;  %v3054_v21 = vld [vmem:[%s4621_s2 + $0x244] ss:$16 sps:$4 sm:$0xff]   ;;  %v3057_v23 = vld [vmem:[%s4621_s2 + $0x240] ss:$16 sps:$4 sm:$0xff]  }
   0xd   :  { %1897 = vmatprep.subr.bf16.mxu1 %v3042_v13  ;;  %v3058_v24 = vld [vmem:[%s4621_s2 + $0x24] ss:$16 sps:$4 sm:$0xff]   ;;  %v3062_v26 = vld [vmem:[%s4621_s2 + $0x20] ss:$16 sps:$4 sm:$0xff]  }
   0xe   :  { %v3060_v25 = vld [vmem:[%s4621_s2 + $0x224] ss:$16 sps:$4 sm:$0xff]   ;;  %v3063_v27 = vld [vmem:[%s4621_s2 + $0x220] ss:$16 sps:$4 sm:$0xff]  }
   0xf   :  { %1857 = vmatpush1.bf16.msra.mxu0 %v3044_v14  ;;  %v3064_v28 = vld [vmem:[%s4621_s2 + $0x4] ss:$16 sps:$4 sm:$0xff]   ;;  %v3068_v30 = vld [vmem:[%s4621_s2] ss:$16 sps:$4 sm:$0xff]  }
  0x10   :  { %1898 = vmatpush1.bf16.msra.mxu1 %v3045_v15  ;;  %1858 = vmatprep.subr.bf16.mxu0 %v3046_v16  ;;  %v3066_v29 = vld [vmem:[%s4621_s2 + $0x204] ss:$16 sps:$4 sm:$0xff]   ;;  %v3069_v31 = vld [vmem:[%s4621_s2 + $0x200] ss:$16 sps:$4 sm:$0xff]  }
  0x11   :  { %1899 = vmatprep.subr.bf16.mxu1 %v3048_v17  ;;  %v3070_v32 = vld [vmem:[%s4621_s2 + $0x1e4] ss:$16 sps:$4 sm:$0xff]   ;;  %v3074_v34 = vld [vmem:[%s4621_s2 + $0x1e0] ss:$16 sps:$4 sm:$0xff]  }
  0x12   :  { %v3072_v33 = vld [vmem:[%s4621_s2 + $0x3e4] ss:$16 sps:$4 sm:$0xff]   ;;  %v3075_v35 = vld [vmem:[%s4621_s2 + $0x3e0] ss:$16 sps:$4 sm:$0xff]  }
  0x13   :  { %1859 = vmatpush1.bf16.msra.mxu0 %v3050_v18  ;;  %v3076_v36 = vld [vmem:[%s4621_s2 + $0x1c4] ss:$16 sps:$4 sm:$0xff]   ;;  %v3080_v38 = vld [vmem:[%s4621_s2 + $0x1c0] ss:$16 sps:$4 sm:$0xff]  }
  0x14   :  { %1900 = vmatpush1.bf16.msra.mxu1 %v3051_v19  ;;  %1860 = vmatprep.subr.bf16.mxu0 %v3052_v20  ;;  %v3078_v37 = vld [vmem:[%s4621_s2 + $0x3c4] ss:$16 sps:$4 sm:$0xff]   ;;  %v3081_v39 = vld [vmem:[%s4621_s2 + $0x3c0] ss:$16 sps:$4 sm:$0xff]  }
  0x15   :  { %1901 = vmatprep.subr.bf16.mxu1 %v3054_v21  ;;  %v3082_v40 = vld [vmem:[%s4621_s2 + $0x1a4] ss:$16 sps:$4 sm:$0xff]   ;;  %v3086_v45 = vld [vmem:[%s4621_s2 + $0x1a0] ss:$16 sps:$4 sm:$0xff]  }
  0x16   :  { %v3084_v44 = vld [vmem:[%s4621_s2 + $0x3a4] ss:$16 sps:$4 sm:$0xff]   ;;  %v3087_v46 = vld [vmem:[%s4621_s2 + $0x3a0] ss:$16 sps:$4 sm:$0xff]  }
  0x17   :  { %1861 = vmatpush1.bf16.msra.mxu0 %v3056_v22  ;;  %v3088_v47 = vld [vmem:[%s4621_s2 + $0x184] ss:$16 sps:$4 sm:$0xff]   ;;  %v3092_v54 = vld [vmem:[%s4621_s2 + $0x180] ss:$16 sps:$4 sm:$0xff]  }
  0x18   :  { %1902 = vmatpush1.bf16.msra.mxu1 %v3057_v23  ;;  %1862 = vmatprep.subr.bf16.mxu0 %v3058_v24  ;;  %v3090_v50 = vld [vmem:[%s4621_s2 + $0x384] ss:$16 sps:$4 sm:$0xff]   ;;  %v3093_v55 = vld [vmem:[%s4621_s2 + $0x380] ss:$16 sps:$4 sm:$0xff]  }
  0x19   :  { %1903 = vmatprep.subr.bf16.mxu1 %v3060_v25  ;;  %v25_v51 = vld [vmem:[%s4619_s0] sm:$0xff] }
  0x1a   :  { %v27_v52 = vunpack.c.l.bf16 %v25_v51  ;;  %v30_v53 = vld [vmem:[%s4620_s1] sm:$0xff]  ;;  %v28_v60 = vunpack.c.h.bf16 %v25_v51 }
  0x1b   :  { %1863 = vmatpush1.bf16.msra.mxu0 %v3062_v26  ;;  %v32_v56 = vunpack.c.l.bf16 %v30_v53  ;;  %v3094_v58 = vld [vmem:[%s4621_s2 + $0x164] ss:$16 sps:$4 sm:$0xff]   ;;  %v33_v61 = vunpack.c.h.bf16 %v30_v53  ;;  %v3098_v63 = vld [vmem:[%s4621_s2 + $0x160] ss:$16 sps:$4 sm:$0xff]  }
  0x1c   :  { %1904 = vmatpush1.bf16.msra.mxu1 %v3063_v27  ;;  %1864 = vmatprep.subr.bf16.mxu0 %v3064_v28  ;;  %v3096_v59 = vld [vmem:[%s4621_s2 + $0x364] ss:$16 sps:$4 sm:$0xff]   ;;  %v3099_v0 = vld [vmem:[%s4621_s2 + $0x360] ss:$16 sps:$4 sm:$0xff]  }
  0x1d   :  { %1905 = vmatprep.subr.bf16.mxu1 %v3066_v29  ;;  %v35_v62 = vadd.f32 %v32_v56, %v27_v52  ;;  %v3100_v3 = vld [vmem:[%s4621_s2 + $0x144] ss:$16 sps:$4 sm:$0xff]   ;;  %v36_v7 = vadd.f32 %v33_v61, %v28_v60  ;;  %v3104_v8 = vld [vmem:[%s4621_s2 + $0x140] ss:$16 sps:$4 sm:$0xff]  }
  0x1e   :  { %v3102_v4 = vld [vmem:[%s4621_s2 + $0x344] ss:$16 sps:$4 sm:$0xff]   ;;  %v3105_v9 = vld [vmem:[%s4621_s2 + $0x340] ss:$16 sps:$4 sm:$0xff]  }
  0x1f   :  { %1865 = vmatpush1.bf16.msra.mxu0 %v3068_v30  ;;  %v48_v1 = vrot.slane %v35_v62, %v3715_v57  ;;  %v41_v2 = vcombine.high %v35_v62, %v35_v62  ;;  %v3106_v12 = vld [vmem:[%s4621_s2 + $0x124] ss:$16 sps:$4 sm:$0xff]   ;;  %v58_v15 = vcombine.high %v36_v7, %v36_v7  ;;  %v3110_v16 = vld [vmem:[%s4621_s2 + $0x120] ss:$16 sps:$4 sm:$0xff]   ;;  %v3768_v20 = vrot.slane %v36_v7, %v3715_v57 }
  0x20   :  { %1906 = vmatpush1.bf16.msra.mxu1 %v3069_v31  ;;  %1866 = vmatprep.subr.bf16.mxu0 %v3070_v32  ;;  %v3108_v13 = vld [vmem:[%s4621_s2 + $0x324] ss:$16 sps:$4 sm:$0xff]   ;;  %v3111_v17 = vld [vmem:[%s4621_s2 + $0x320] ss:$16 sps:$4 sm:$0xff]  }
  0x21   :  { %1907 = vmatprep.subr.bf16.mxu1 %v3072_v33  ;;  %v56_v5 = vcombine.high %v48_v1, %v48_v1  ;;  %v55_v6 = vrot.slane %v41_v2, %v3715_v57  ;;  %v3112_v18 = vld [vmem:[%s4621_s2 + $0x104] ss:$16 sps:$4 sm:$0xff]   ;;  %v3771_v21 = vrot.slane %v58_v15, %v3715_v57  ;;  %v3116_v22 = vld [vmem:[%s4621_s2 + $0x100] ss:$16 sps:$4 sm:$0xff]   ;;  %v73_v26 = vcombine.high %v3768_v20, %v3768_v20 }
  0x22   :  { %v3114_v19 = vld [vmem:[%s4621_s2 + $0x304] ss:$16 sps:$4 sm:$0xff]   ;;  %v3117_v23 = vld [vmem:[%s4621_s2 + $0x300] ss:$16 sps:$4 sm:$0xff]   ;;  %v3789_v28 = vpack.c.bf16 %v48_v1, %v48_v1 }
  0x23   :  { %1867 = vmatpush2.bf16.msra.mxu0 %v3074_v34  ;;  %v3743_v10 = vpack.c.bf16 %v56_v5, %v56_v5  ;;  %v57_v11 = vcombine.high %v55_v6, %v55_v6  ;;  %v3120_v24 = vld [vmem:[%s4621_s2 + $0x4e4] ss:$16 sps:$4 sm:$0xff]   ;;  %v74_v27 = vcombine.high %v3771_v21, %v3771_v21  ;;  %v3791_v29 = vpack.c.bf16 %v55_v6, %v55_v6  ;;  %v3118_v30 = vld [vmem:[%s4621_s2 + $0x4e0] ss:$16 sps:$4 sm:$0xff]  }
  0x24   :  { %1908 = vmatpush2.bf16.msra.mxu1 %v3075_v35  ;;  %1868 = vmatprep.subr.bf16.mxu0 %v3076_v36  ;;  %v3123_v25 = vld [vmem:[%s4621_s2 + $0x6e4] ss:$16 sps:$4 sm:$0xff]   ;;  %v3121_v31 = vld [vmem:[%s4621_s2 + $0x6e0] ss:$16 sps:$4 sm:$0xff]   ;;  %v3805_v34 = vpack.c.bf16 %v73_v26, %v73_v26 }
  0x25   :  { %1909 = vmatprep.subr.bf16.mxu1 %v3078_v37  ;;  %1882 = vmatprep.mubr.bf16.mxu0 %v3743_v10  ;;  %v3752_v14 = vpack.c.bf16 %v57_v11, %v57_v11  ;;  %v3126_v32 = vld [vmem:[%s4621_s2 + $0x4c4] ss:$16 sps:$4 sm:$0xff]   ;;  %v3807_v35 = vpack.c.bf16 %v74_v27, %v74_v27  ;;  %v3124_v36 = vld [vmem:[%s4621_s2 + $0x4c0] ss:$16 sps:$4 sm:$0xff]  }
  0x26   :  { %v3129_v33 = vld [vmem:[%s4621_s2 + $0x6c4] ss:$16 sps:$4 sm:$0xff]   ;;  %v3127_v37 = vld [vmem:[%s4621_s2 + $0x6c0] ss:$16 sps:$4 sm:$0xff]  }
  0x27   :  { %1869 = vmatpush2.bf16.msra.mxu0 %v3080_v38  ;;  %1923 = vmatprep.mubr.bf16.mxu1 %v3752_v14  ;;  %v3132_v38 = vld [vmem:[%s4621_s2 + $0x4a4] ss:$16 sps:$4 sm:$0xff]   ;;  %v3133_v41 = vld [vmem:[%s4621_s2 + $0x6a0] ss:$16 sps:$4 sm:$0xff]  }
  0x28   :  { %1910 = vmatpush2.bf16.msra.mxu1 %v3081_v39  ;;  %1870 = vmatprep.subr.bf16.mxu0 %v3082_v40  ;;  %v3135_v39 = vld [vmem:[%s4621_s2 + $0x6a4] ss:$16 sps:$4 sm:$0xff]   ;;  %v3130_v40 = vld [vmem:[%s4621_s2 + $0x4a0] ss:$16 sps:$4 sm:$0xff]  }
  0x29   :  { %1911 = vmatprep.subr.bf16.mxu1 %v3084_v44  ;;  %v3138_v42 = vld [vmem:[%s4621_s2 + $0x484] ss:$16 sps:$4 sm:$0xff]   ;;  %v3136_v44 = vld [vmem:[%s4621_s2 + $0x480] ss:$16 sps:$4 sm:$0xff]  }
  0x2a   :  { %v3141_v43 = vld [vmem:[%s4621_s2 + $0x684] ss:$16 sps:$4 sm:$0xff]   ;;  %v3142_v48 = vld [vmem:[%s4621_s2 + $0x460] ss:$16 sps:$4 sm:$0xff]  }
  0x2b   :  { %1871 = vmatpush2.bf16.msra.mxu0 %v3086_v45  ;;  %v3139_v45 = vld [vmem:[%s4621_s2 + $0x680] ss:$16 sps:$4 sm:$0xff]   ;;  %v3150_v51 = vld [vmem:[%s4621_s2 + $0x444] ss:$16 sps:$4 sm:$0xff]  }
  0x2c   :  { %1912 = vmatpush2.bf16.msra.mxu1 %v3087_v46  ;;  %1872 = vmatprep.subr.bf16.mxu0 %v3088_v47  ;;  %v3144_v46 = vld [vmem:[%s4621_s2 + $0x464] ss:$16 sps:$4 sm:$0xff]   ;;  %v3148_v53 = vld [vmem:[%s4621_s2 + $0x440] ss:$16 sps:$4 sm:$0xff]  }
  0x2d   :  { %1913 = vmatprep.subr.bf16.mxu1 %v3090_v50  ;;  %v3147_v47 = vld [vmem:[%s4621_s2 + $0x664] ss:$16 sps:$4 sm:$0xff]   ;;  %v3145_v50 = vld [vmem:[%s4621_s2 + $0x660] ss:$16 sps:$4 sm:$0xff]  }
  0x2e   :  { %v3153_v52 = vld [vmem:[%s4621_s2 + $0x644] ss:$16 sps:$4 sm:$0xff]   ;;  %v3160_v62 = vld [vmem:[%s4621_s2 + $0x400] ss:$16 sps:$4 sm:$0xff]  }
  0x2f   :  { %1873 = vmatpush2.bf16.msra.mxu0 %v3092_v54  ;;  %v3151_v54 = vld [vmem:[%s4621_s2 + $0x640] ss:$16 sps:$4 sm:$0xff]   ;;  %v3159_v56 = vld [vmem:[%s4621_s2 + $0x624] ss:$16 sps:$4 sm:$0xff]  }
  0x30   :  { %1914 = vmatpush2.bf16.msra.mxu1 %v3093_v55  ;;  %1874 = vmatprep.subr.bf16.mxu0 %v3094_v58  ;;  %v3156_v55 = vld [vmem:[%s4621_s2 + $0x424] ss:$16 sps:$4 sm:$0xff]   ;;  %v3154_v58 = vld [vmem:[%s4621_s2 + $0x420] ss:$16 sps:$4 sm:$0xff]  }
  0x31   :  { %1915 = vmatprep.subr.bf16.mxu1 %v3096_v59  ;;  %v3157_v59 = vld [vmem:[%s4621_s2 + $0x620] ss:$16 sps:$4 sm:$0xff]   ;;  %v3162_v60 = vld [vmem:[%s4621_s2 + $0x404] ss:$16 sps:$4 sm:$0xff]  }
  0x32   :  { %v3165_v61 = vld [vmem:[%s4621_s2 + $0x604] ss:$16 sps:$4 sm:$0xff]   ;;  %v3166_v2 = vld [vmem:[%s4621_s2 + $0x5e0] ss:$16 sps:$4 sm:$0xff]  }
  0x33   :  { %1875 = vmatpush2.bf16.msra.mxu0 %v3098_v63  ;;  %v3163_v63 = vld [vmem:[%s4621_s2 + $0x600] ss:$16 sps:$4 sm:$0xff]   ;;  %v3171_v1 = vld [vmem:[%s4621_s2 + $0x7e4] ss:$16 sps:$4 sm:$0xff]  }
  0x34   :  { %1916 = vmatpush2.bf16.msra.mxu1 %v3099_v0  ;;  %1876 = vmatprep.subr.bf16.mxu0 %v3100_v3  ;;  %v3168_v0 = vld [vmem:[%s4621_s2 + $0x5e4] ss:$16 sps:$4 sm:$0xff]   ;;  %v3169_v3 = vld [vmem:[%s4621_s2 + $0x7e0] ss:$16 sps:$4 sm:$0xff]  }
  0x35   :  { %1917 = vmatprep.subr.bf16.mxu1 %v3102_v4  ;;  %v3174_v4 = vld [vmem:[%s4621_s2 + $0x5c4] ss:$16 sps:$4 sm:$0xff]   ;;  %v3172_v6 = vld [vmem:[%s4621_s2 + $0x5c0] ss:$16 sps:$4 sm:$0xff]  }
  0x36   :  { %v3177_v5 = vld [vmem:[%s4621_s2 + $0x7c4] ss:$16 sps:$4 sm:$0xff]   ;;  %v3175_v7 = vld [vmem:[%s4621_s2 + $0x7c0] ss:$16 sps:$4 sm:$0xff]  }
  0x37   :  { %1877 = vmatpush2.bf16.msra.mxu0 %v3104_v8  ;;  %v3180_v8 = vld [vmem:[%s4621_s2 + $0x5a4] ss:$16 sps:$4 sm:$0xff]   ;;  %v3178_v11 = vld [vmem:[%s4621_s2 + $0x5a0] ss:$16 sps:$4 sm:$0xff]  }
  0x38   :  { %1918 = vmatpush2.bf16.msra.mxu1 %v3105_v9  ;;  %1878 = vmatprep.subr.bf16.mxu0 %v3106_v12  ;;  %v3183_v9 = vld [vmem:[%s4621_s2 + $0x7a4] ss:$16 sps:$4 sm:$0xff]   ;;  %v3181_v12 = vld [vmem:[%s4621_s2 + $0x7a0] ss:$16 sps:$4 sm:$0xff]  }
  0x39   :  { %1919 = vmatprep.subr.bf16.mxu1 %v3108_v13  ;;  %v3186_v13 = vld [vmem:[%s4621_s2 + $0x584] ss:$16 sps:$4 sm:$0xff]   ;;  %v3196_v26 = vld [vmem:[%s4621_s2 + $0x540] ss:$16 sps:$4 sm:$0xff]  }
  0x3a   :  { %v3189_v15 = vld [vmem:[%s4621_s2 + $0x784] ss:$16 sps:$4 sm:$0xff]   ;;  %v3199_v27 = vld [vmem:[%s4621_s2 + $0x740] ss:$16 sps:$4 sm:$0xff]  }
  0x3b   :  { %1879 = vmatpush2.bf16.msra.mxu0 %v3110_v16  ;;  %v3184_v16 = vld [vmem:[%s4621_s2 + $0x580] ss:$16 sps:$4 sm:$0xff]  }
  0x3c   :  { %1920 = vmatpush2.bf16.msra.mxu1 %v3111_v17  ;;  %1880 = vmatprep.subr.bf16.mxu0 %v3112_v18  ;;  %v3187_v17 = vld [vmem:[%s4621_s2 + $0x780] ss:$16 sps:$4 sm:$0xff]   ;;  %v3192_v18 = vld [vmem:[%s4621_s2 + $0x564] ss:$16 sps:$4 sm:$0xff]  }
  0x3d   :  { %1921 = vmatprep.subr.bf16.mxu1 %v3114_v19  ;;  %v3195_v19 = vld [vmem:[%s4621_s2 + $0x764] ss:$16 sps:$4 sm:$0xff]  }
  0x3f   :  { %1881 = vmatpush2.bf16.msra.mxu0 %v3116_v22  ;;  %v3190_v22 = vld [vmem:[%s4621_s2 + $0x560] ss:$16 sps:$4 sm:$0xff]  }
  0x40   :  { %1922 = vmatpush2.bf16.msra.mxu1 %v3117_v23  ;;  %1932 = vmatprep.subr.bf16.mxu0 %v3120_v24  ;;  %v3193_v23 = vld [vmem:[%s4621_s2 + $0x760] ss:$16 sps:$4 sm:$0xff]   ;;  %v3198_v24 = vld [vmem:[%s4621_s2 + $0x544] ss:$16 sps:$4 sm:$0xff]  }
  0x41   :  { %1973 = vmatprep.subr.bf16.mxu1 %v3123_v25  ;;  %v3201_v25 = vld [vmem:[%s4621_s2 + $0x744] ss:$16 sps:$4 sm:$0xff]  }
  0x42   :  { %1883 = vmatmul.mubr.bf16.vlgmr.msra.gmra.mxu0 %v3789_v28 }
  0x43   :  { %1924 = vmatmul.mubr.bf16.vlgmr.msra.gmra.mxu1 %v3791_v29  ;;  %1933 = vmatpush1.bf16.msra.mxu0 %v3118_v30  ;;  %v3204_v30 = vld [vmem:[%s4621_s2 + $0x524] ss:$16 sps:$4 sm:$0xff]  }
  0x44   :  { %1974 = vmatpush1.bf16.msra.mxu1 %v3121_v31  ;;  %1934 = vmatprep.subr.bf16.mxu0 %v3126_v32  ;;  %v3207_v31 = vld [vmem:[%s4621_s2 + $0x724] ss:$16 sps:$4 sm:$0xff]   ;;  %v3202_v32 = vld [vmem:[%s4621_s2 + $0x520] ss:$16 sps:$4 sm:$0xff]  }
  0x45   :  { %1975 = vmatprep.subr.bf16.mxu1 %v3129_v33  ;;  %1964 = vmatprep.mubr.bf16.mxu0 %v3805_v34  ;;  %v3205_v33 = vld [vmem:[%s4621_s2 + $0x720] ss:$16 sps:$4 sm:$0xff]  }
  0x46   :  { %2005 = vmatprep.mubr.bf16.mxu1 %v3807_v35 }
  0x47   :  { %1935 = vmatpush1.bf16.msra.mxu0 %v3124_v36  ;;  %v3210_v36 = vld [vmem:[%s4621_s2 + $0x504] ss:$16 sps:$4 sm:$0xff]  }
  0x48   :  { %1976 = vmatpush1.bf16.msra.mxu1 %v3127_v37  ;;  %1936 = vmatprep.subr.bf16.mxu0 %v3132_v38  ;;  %v3213_v37 = vld [vmem:[%s4621_s2 + $0x704] ss:$16 sps:$4 sm:$0xff]   ;;  %v3208_v38 = vld [vmem:[%s4621_s2 + $0x500] ss:$16 sps:$4 sm:$0xff]  }
  0x49   :  { %1977 = vmatprep.subr.bf16.mxu1 %v3135_v39  ;;  %v3211_v39 = vld [vmem:[%s4621_s2 + $0x700] ss:$16 sps:$4 sm:$0xff]  }
  0x4b   :  { %1937 = vmatpush1.bf16.msra.mxu0 %v3130_v40  ;;  %v3216_v40 = vld [vmem:[%s4621_s2 + $0x8e4] ss:$16 sps:$4 sm:$0xff]  }
  0x4c   :  { %1978 = vmatpush1.bf16.msra.mxu1 %v3133_v41  ;;  %1938 = vmatprep.subr.bf16.mxu0 %v3138_v42  ;;  %v3219_v41 = vld [vmem:[%s4621_s2 + $0xec] ss:$16 sps:$4 sm:$0xff]   ;;  %v3995_v42 = vpack.c.bf16 %v3768_v20, %v3768_v20 }
  0x4d   :  { %1979 = vmatprep.subr.bf16.mxu1 %v3141_v43  ;;  %v3999_v43 = vpack.c.bf16 %v3771_v21, %v3771_v21  ;;  %v3225_v20 = vld [vmem:[%s4621_s2 + $0xcc] ss:$16 sps:$4 sm:$0xff]   ;;  %v3220_v21 = vld [vmem:[%s4621_s2 + $0x8c0] ss:$16 sps:$4 sm:$0xff]  }
  0x4f   :  { %1939 = vmatpush1.bf16.msra.mxu0 %v3136_v44  ;;  %v3214_v44 = vld [vmem:[%s4621_s2 + $0x8e0] ss:$16 sps:$4 sm:$0xff]  }
  0x50   :  { %1980 = vmatpush1.bf16.msra.mxu1 %v3139_v45  ;;  %1940 = vmatprep.subr.bf16.mxu0 %v3144_v46  ;;  %v3217_v45 = vld [vmem:[%s4621_s2 + $0xe8] ss:$16 sps:$4 sm:$0xff]   ;;  %v3222_v46 = vld [vmem:[%s4621_s2 + $0x8c4] ss:$16 sps:$4 sm:$0xff]  }
  0x51   :  { %1981 = vmatprep.subr.bf16.mxu1 %v3147_v47  ;;  %v3223_v47 = vld [vmem:[%s4621_s2 + $0xc8] ss:$16 sps:$4 sm:$0xff]  }
  0x53   :  { %1941 = vmatpush1.bf16.msra.mxu0 %v3142_v48  ;;  %v3228_v48 = vld [vmem:[%s4621_s2 + $0x8a4] ss:$16 sps:$4 sm:$0xff]  }
  0x54   :  { %1982 = vmatpush1.bf16.msra.mxu1 %v3145_v50  ;;  %1942 = vmatprep.subr.bf16.mxu0 %v3150_v51  ;;  %v3231_v50 = vld [vmem:[%s4621_s2 + $0xac] ss:$16 sps:$4 sm:$0xff]   ;;  %v3525_v51 = vmov 0  }
  0x55   :  { %1983 = vmatprep.subr.bf16.mxu1 %v3153_v52  ;;  %v3226_v52 = vld [vmem:[%s4621_s2 + $0x8a0] ss:$16 sps:$4 sm:$0xff]  }
  0x57   :  { %1943 = vmatpush1.bf16.msra.mxu0 %v3148_v53  ;;  %v3229_v53 = vld [vmem:[%s4621_s2 + $0xa8] ss:$16 sps:$4 sm:$0xff]  }
  0x58   :  { %1984 = vmatpush1.bf16.msra.mxu1 %v3151_v54  ;;  %1944 = vmatprep.subr.bf16.mxu0 %v3156_v55  ;;  %v3234_v54 = vld [vmem:[%s4621_s2 + $0x884] ss:$16 sps:$4 sm:$0xff]   ;;  %v3232_v55 = vld [vmem:[%s4621_s2 + $0x880] ss:$16 sps:$4 sm:$0xff]  }
  0x59   :  { %1985 = vmatprep.subr.bf16.mxu1 %v3159_v56  ;;  %v3235_v56 = vld [vmem:[%s4621_s2 + $0x88] ss:$16 sps:$4 sm:$0xff]  }
  0x5b   :  { %1945 = vmatpush1.bf16.msra.mxu0 %v3154_v58  ;;  %v3240_v58 = vld [vmem:[%s4621_s2 + $0x864] ss:$16 sps:$4 sm:$0xff]  }
  0x5c   :  { %1986 = vmatpush1.bf16.msra.mxu1 %v3157_v59  ;;  %1946 = vmatprep.subr.bf16.mxu0 %v3162_v60  ;;  %v3243_v59 = vld [vmem:[%s4621_s2 + $0x6c] ss:$16 sps:$4 sm:$0xff]   ;;  %v3238_v60 = vld [vmem:[%s4621_s2 + $0x860] ss:$16 sps:$4 sm:$0xff]  }
  0x5d   :  { %1987 = vmatprep.subr.bf16.mxu1 %v3165_v61  ;;  %v3241_v61 = vld [vmem:[%s4621_s2 + $0x68] ss:$16 sps:$4 sm:$0xff]  }
  0x5f   :  { %1947 = vmatpush1.bf16.msra.mxu0 %v3160_v62  ;;  %v3246_v62 = vld [vmem:[%s4621_s2 + $0x844] ss:$16 sps:$4 sm:$0xff]  }
  0x60   :  { %1988 = vmatpush1.bf16.msra.mxu1 %v3163_v63  ;;  %1948 = vmatprep.subr.bf16.mxu0 %v3168_v0  ;;  %v26_v63 = vld [vmem:[%s4619_s0 + $0x8] sm:$0x1] }
  0x61   :  { %1989 = vmatprep.subr.bf16.mxu1 %v3171_v1  ;;  %v31_v0 = vld [vmem:[%s4620_s1 + $0x8] sm:$0x1]  ;;  %v3249_v1 = vld [vmem:[%s4621_s2 + $0x4c] ss:$16 sps:$4 sm:$0xff]  }
  0x63   :  { %1949 = vmatpush2.bf16.msra.mxu0 %v3166_v2  ;;  %v3244_v2 = vld [vmem:[%s4621_s2 + $0x840] ss:$16 sps:$4 sm:$0xff]  }
  0x64   :  { %1990 = vmatpush2.bf16.msra.mxu1 %v3169_v3  ;;  %1950 = vmatprep.subr.bf16.mxu0 %v3174_v4  ;;  %v3247_v3 = vld [vmem:[%s4621_s2 + $0x48] ss:$16 sps:$4 sm:$0xff]   ;;  %v29_v4 = vunpack.c.l.bf16 %v26_v63 }
  0x65   :  { %1991 = vmatprep.subr.bf16.mxu1 %v3177_v5  ;;  %v34_v5 = vunpack.c.l.bf16 %v31_v0  ;;  %v3316_v63 = vld [vmem:[%s4621_s2 + $0x3c8] ss:$16 sps:$4 sm:$0xff]  }
  0x66   :  { %v3319_v0 = vld [vmem:[%s4621_s2 + $0x4c8] ss:$16 sps:$4 sm:$0xff]  }
  0x67   :  { %1951 = vmatpush2.bf16.msra.mxu0 %v3172_v6  ;;  %v3252_v6 = vld [vmem:[%s4621_s2 + $0x824] ss:$16 sps:$4 sm:$0xff]  }
  0x68   :  { %1992 = vmatpush2.bf16.msra.mxu1 %v3175_v7  ;;  %1952 = vmatprep.subr.bf16.mxu0 %v3180_v8  ;;  %v3255_v7 = vld [vmem:[%s4621_s2 + $0x2c] ss:$16 sps:$4 sm:$0xff]   ;;  %v3250_v8 = vld [vmem:[%s4621_s2 + $0x820] ss:$16 sps:$4 sm:$0xff]  }
  0x69   :  { %1993 = vmatprep.subr.bf16.mxu1 %v3183_v9  ;;  %v3253_v9 = vld [vmem:[%s4621_s2 + $0x28] ss:$16 sps:$4 sm:$0xff]  }
  0x6b   :  { %1953 = vmatpush2.bf16.msra.mxu0 %v3178_v11  ;;  %v37_v11 = vadd.f32 %v34_v5, %v29_v4  ;;  %v3330_v4 = vld [vmem:[%s4621_s2 + $0x38c] ss:$16 sps:$4 sm:$0xff]  }
  0x6c   :  { %1994 = vmatpush2.bf16.msra.mxu1 %v3181_v12  ;;  %1954 = vmatprep.subr.bf16.mxu0 %v3186_v13  ;;  %v3258_v12 = vld [vmem:[%s4621_s2 + $0x804] ss:$16 sps:$4 sm:$0xff]   ;;  %v3261_v13 = vld [vmem:[%s4621_s2 + $0xc] ss:$16 sps:$4 sm:$0xff]  }
  0x6d   :  { %1995 = vmatprep.subr.bf16.mxu1 %v3189_v15  ;;  %v3256_v15 = vld [vmem:[%s4621_s2 + $0x800] ss:$16 sps:$4 sm:$0xff]   ;;  %v3333_v5 = vld [vmem:[%s4621_s2 + $0x48c] ss:$16 sps:$4 sm:$0xff]  }
  0x6f   :  { %1955 = vmatpush2.bf16.msra.mxu0 %v3184_v16  ;;  %v3259_v16 = vld [vmem:[%s4621_s2 + $0x8] ss:$16 sps:$4 sm:$0xff]  }
  0x70   :  { %1996 = vmatpush2.bf16.msra.mxu1 %v3187_v17  ;;  %1956 = vmatprep.subr.bf16.mxu0 %v3192_v18  ;;  %v81_v17 = vrot.slane %v37_v11, %v3715_v57  ;;  %v3264_v18 = vld [vmem:[%s4621_s2 + $0x1ec] ss:$16 sps:$4 sm:$0xff]   ;;  %v3265_v57 = vld [vmem:[%s4621_s2 + $0x2e8] ss:$16 sps:$4 sm:$0xff]  }
  0x71   :  { %1997 = vmatprep.subr.bf16.mxu1 %v3195_v19  ;;  %v3267_v19 = vld [vmem:[%s4621_s2 + $0x2ec] ss:$16 sps:$4 sm:$0xff]   ;;  %v3337_v11 = vld [vmem:[%s4621_s2 + $0x468] ss:$16 sps:$4 sm:$0xff]  }
  0x73   :  { %1957 = vmatpush2.bf16.msra.mxu0 %v3190_v22  ;;  %v4108_v22 = vpack.c.bf16 %v81_v17, %v81_v17  ;;  %v3348_v17 = vld [vmem:[%s4621_s2 + $0x32c] ss:$16 sps:$4 sm:$0xff]  }
  0x74   :  { %1998 = vmatpush2.bf16.msra.mxu1 %v3193_v23  ;;  %1958 = vmatprep.subr.bf16.mxu0 %v3198_v24  ;;  %v3262_v23 = vld [vmem:[%s4621_s2 + $0x1e8] ss:$16 sps:$4 sm:$0xff]   ;;  %v3270_v24 = vld [vmem:[%s4621_s2 + $0x1cc] ss:$16 sps:$4 sm:$0xff]  }
  0x75   :  { %1999 = vmatprep.subr.bf16.mxu1 %v3201_v25  ;;  %v3273_v25 = vld [vmem:[%s4621_s2 + $0x2cc] ss:$16 sps:$4 sm:$0xff]  }
  0x77   :  { %1959 = vmatpush2.bf16.msra.mxu0 %v3196_v26  ;;  %v3268_v26 = vld [vmem:[%s4621_s2 + $0x1c8] ss:$16 sps:$4 sm:$0xff]  }
  0x78   :  { %2000 = vmatpush2.bf16.msra.mxu1 %v3199_v27  ;;  %1960 = vmatprep.subr.bf16.mxu0 %v3204_v30  ;;  %v3271_v27 = vld [vmem:[%s4621_s2 + $0x2c8] ss:$16 sps:$4 sm:$0xff]   ;;  %v3276_v30 = vld [vmem:[%s4621_s2 + $0x1ac] ss:$16 sps:$4 sm:$0xff]  }
  0x79   :  { %2001 = vmatprep.subr.bf16.mxu1 %v3207_v31  ;;  %v3279_v31 = vld [vmem:[%s4621_s2 + $0x2ac] ss:$16 sps:$4 sm:$0xff]  }
  0x7b   :  { %1961 = vmatpush2.bf16.msra.mxu0 %v3202_v32  ;;  %v3274_v32 = vld [vmem:[%s4621_s2 + $0x1a8] ss:$16 sps:$4 sm:$0xff]  }
  0x7c   :  { %2002 = vmatpush2.bf16.msra.mxu1 %v3205_v33  ;;  %1962 = vmatprep.subr.bf16.mxu0 %v3210_v36  ;;  %v3277_v33 = vld [vmem:[%s4621_s2 + $0x2a8] ss:$16 sps:$4 sm:$0xff]   ;;  %v3282_v36 = vld [vmem:[%s4621_s2 + $0x18c] ss:$16 sps:$4 sm:$0xff]  }
  0x7d   :  { %2003 = vmatprep.subr.bf16.mxu1 %v3213_v37  ;;  %v3280_v37 = vld [vmem:[%s4621_s2 + $0x188] ss:$16 sps:$4 sm:$0xff]  }
  0x7f   :  { %1963 = vmatpush2.bf16.msra.mxu0 %v3208_v38  ;;  %v3283_v38 = vld [vmem:[%s4621_s2 + $0x288] ss:$16 sps:$4 sm:$0xff]  }
  0x80   :  { %2004 = vmatpush2.bf16.msra.mxu1 %v3211_v39  ;;  %2014 = vmatprep.subr.bf16.mxu0 %v3216_v40  ;;  %v3288_v39 = vld [vmem:[%s4621_s2 + $0x16c] ss:$16 sps:$4 sm:$0xff]  }
  0x81   :  { %2055 = vmatprep.subr.bf16.mxu1 %v3219_v41  ;;  %v3291_v40 = vld [vmem:[%s4621_s2 + $0x26c] ss:$16 sps:$4 sm:$0xff]   ;;  %v3286_v41 = vld [vmem:[%s4621_s2 + $0x168] ss:$16 sps:$4 sm:$0xff]  }
  0x82   :  { %1965 = vmatmul.mubr.bf16.vlgmr.msra.gmra.mxu0 %v3995_v42 }
  0x83   :  { %2006 = vmatmul.mubr.bf16.vlgmr.msra.gmra.mxu1 %v3999_v43  ;;  %2015 = vmatpush1.bf16.msra.mxu0 %v3214_v44  ;;  %v3289_v44 = vld [vmem:[%s4621_s2 + $0x268] ss:$16 sps:$4 sm:$0xff]  }
  0x84   :  { %2056 = vmatpush1.bf16.msra.mxu1 %v3217_v45  ;;  %2016 = vmatprep.subr.bf16.mxu0 %v3222_v46  ;;  %v3294_v45 = vld [vmem:[%s4621_s2 + $0x14c] ss:$16 sps:$4 sm:$0xff]  }
  0x85   :  { %2057 = vmatprep.subr.bf16.mxu1 %v3225_v20  ;;  %2046 = vmatprep.mubr.bf16.mxu0 %v3525_v51  ;;  %v3297_v46 = vld [vmem:[%s4621_s2 + $0x24c] ss:$16 sps:$4 sm:$0xff]   ;;  %v3292_v20 = vld [vmem:[%s4621_s2 + $0x148] ss:$16 sps:$4 sm:$0xff]  }
  0x86   :  { %2087 = vmatprep.mubr.bf16.mxu1 %v3743_v10  ;;  %v3237_v10 = vld [vmem:[%s4621_s2 + $0x8c] ss:$16 sps:$4 sm:$0xff]  }
  0x87   :  { %2017 = vmatpush1.bf16.msra.mxu0 %v3220_v21  ;;  %v3295_v21 = vld [vmem:[%s4621_s2 + $0x248] ss:$16 sps:$4 sm:$0xff]  }
  0x88   :  { %2058 = vmatpush1.bf16.msra.mxu1 %v3223_v47  ;;  %2018 = vmatprep.subr.bf16.mxu0 %v3228_v48  ;;  %v3300_v47 = vld [vmem:[%s4621_s2 + $0x12c] ss:$16 sps:$4 sm:$0xff]  }
  0x89   :  { %2059 = vmatprep.subr.bf16.mxu1 %v3231_v50  ;;  %v3303_v48 = vld [vmem:[%s4621_s2 + $0x22c] ss:$16 sps:$4 sm:$0xff]   ;;  %v3298_v50 = vld [vmem:[%s4621_s2 + $0x128] ss:$16 sps:$4 sm:$0xff]  }
  0x8b   :  { %2019 = vmatpush1.bf16.msra.mxu0 %v3226_v52  ;;  %v3301_v52 = vld [vmem:[%s4621_s2 + $0x228] ss:$16 sps:$4 sm:$0xff]  }
  0x8c   :  { %2060 = vmatpush1.bf16.msra.mxu1 %v3229_v53  ;;  %2020 = vmatprep.subr.bf16.mxu0 %v3234_v54  ;;  %v3306_v53 = vld [vmem:[%s4621_s2 + $0x10c] ss:$16 sps:$4 sm:$0xff]  }
  0x8d   :  { %2061 = vmatprep.subr.bf16.mxu1 %v3237_v10  ;;  %v3309_v54 = vld [vmem:[%s4621_s2 + $0x20c] ss:$16 sps:$4 sm:$0xff]   ;;  %v3304_v10 = vld [vmem:[%s4621_s2 + $0x108] ss:$16 sps:$4 sm:$0xff]  }
  0x8f   :  { %2021 = vmatpush1.bf16.msra.mxu0 %v3232_v55  ;;  %v3307_v55 = vld [vmem:[%s4621_s2 + $0x208] ss:$16 sps:$4 sm:$0xff]  }
  0x90   :  { %2062 = vmatpush1.bf16.msra.mxu1 %v3235_v56  ;;  %2022 = vmatprep.subr.bf16.mxu0 %v3240_v58  ;;  %v3312_v56 = vld [vmem:[%s4621_s2 + $0x3ec] ss:$16 sps:$4 sm:$0xff]  }
  0x91   :  { %2063 = vmatprep.subr.bf16.mxu1 %v3243_v59  ;;  %v3315_v58 = vld [vmem:[%s4621_s2 + $0x4ec] ss:$16 sps:$4 sm:$0xff]   ;;  %v3310_v59 = vld [vmem:[%s4621_s2 + $0x3e8] ss:$16 sps:$4 sm:$0xff]  }
  0x93   :  { %2023 = vmatpush1.bf16.msra.mxu0 %v3238_v60  ;;  %v3313_v60 = vld [vmem:[%s4621_s2 + $0x4e8] ss:$16 sps:$4 sm:$0xff]  }
  0x94   :  { %2064 = vmatpush1.bf16.msra.mxu1 %v3241_v61  ;;  %2024 = vmatprep.subr.bf16.mxu0 %v3246_v62  ;;  %v3318_v61 = vld [vmem:[%s4621_s2 + $0x3cc] ss:$16 sps:$4 sm:$0xff]  }
  0x95   :  { %2065 = vmatprep.subr.bf16.mxu1 %v3249_v1  ;;  %v3321_v62 = vld [vmem:[%s4621_s2 + $0x4cc] ss:$16 sps:$4 sm:$0xff]  }
  0x96   :  { %v3324_v1 = vld [vmem:[%s4621_s2 + $0x3ac] ss:$16 sps:$4 sm:$0xff]  }
  0x97   :  { %2025 = vmatpush1.bf16.msra.mxu0 %v3244_v2  ;;  %v3327_v2 = vld [vmem:[%s4621_s2 + $0x4ac] ss:$16 sps:$4 sm:$0xff]  }
  0x98   :  { %2066 = vmatpush1.bf16.msra.mxu1 %v3247_v3  ;;  %2026 = vmatprep.subr.bf16.mxu0 %v3252_v6  ;;  %v3322_v3 = vld [vmem:[%s4621_s2 + $0x3a8] ss:$16 sps:$4 sm:$0xff]  }
  0x99   :  { %2067 = vmatprep.subr.bf16.mxu1 %v3255_v7  ;;  %v3328_v6 = vld [vmem:[%s4621_s2 + $0x388] ss:$16 sps:$4 sm:$0xff]   ;;  %v3336_v7 = vld [vmem:[%s4621_s2 + $0x36c] ss:$16 sps:$4 sm:$0xff]  }
  0x9b   :  { %2027 = vmatpush1.bf16.msra.mxu0 %v3250_v8  ;;  %v3339_v8 = vld [vmem:[%s4621_s2 + $0x46c] ss:$16 sps:$4 sm:$0xff]  }
  0x9c   :  { %2068 = vmatpush1.bf16.msra.mxu1 %v3253_v9  ;;  %2028 = vmatprep.subr.bf16.mxu0 %v3258_v12  ;;  %v3334_v9 = vld [vmem:[%s4621_s2 + $0x368] ss:$16 sps:$4 sm:$0xff]   ;;  %v3342_v12 = vld [vmem:[%s4621_s2 + $0x34c] ss:$16 sps:$4 sm:$0xff]  }
  0x9d   :  { %2069 = vmatprep.subr.bf16.mxu1 %v3261_v13  ;;  %v3345_v13 = vld [vmem:[%s4621_s2 + $0x44c] ss:$16 sps:$4 sm:$0xff]  }
  0x9f   :  { %2029 = vmatpush1.bf16.msra.mxu0 %v3256_v15  ;;  %v3340_v15 = vld [vmem:[%s4621_s2 + $0x348] ss:$16 sps:$4 sm:$0xff]  }
  0xa0   :  { %2070 = vmatpush1.bf16.msra.mxu1 %v3259_v16  ;;  %2096 = vmatprep.subr.bf16.mxu0 %v3267_v19  ;;  %v3343_v16 = vld [vmem:[%s4621_s2 + $0x448] ss:$16 sps:$4 sm:$0xff]  }
  0xa1   :  { %2071 = vmatprep.subr.bf16.mxu1 %v3264_v18  ;;  %v3351_v18 = vld [vmem:[%s4621_s2 + $0x42c] ss:$16 sps:$4 sm:$0xff]  }
  0xa2   :  { %2047 = vmatmul.mubr.bf16.vlgmr.msra.gmra.mxu0 %v4108_v22 }
  0xa3   :  { %2097 = vmatpush1.bf16.msra.mxu0 %v3265_v57  ;;  %2128 = vmatprep.mubr.bf16.mxu0 %v3752_v14  ;;  %v3285_v14 = vld [vmem:[%s4621_s2 + $0x28c] ss:$16 sps:$4 sm:$0xff]  }
  0xa4   :  { %2072 = vmatpush2.bf16.msra.mxu1 %v3262_v23  ;;  %2098 = vmatprep.subr.bf16.mxu0 %v3273_v25 }
  0xa5   :  { %2073 = vmatprep.subr.bf16.mxu1 %v3270_v24 }
  0xa7   :  { %2099 = vmatpush1.bf16.msra.mxu0 %v3271_v27 }
  0xa8   :  { %2074 = vmatpush2.bf16.msra.mxu1 %v3268_v26  ;;  %2100 = vmatprep.subr.bf16.mxu0 %v3279_v31 }
  0xa9   :  { %2075 = vmatprep.subr.bf16.mxu1 %v3276_v30 }
  0xab   :  { %2101 = vmatpush1.bf16.msra.mxu0 %v3277_v33 }
  0xac   :  { %2076 = vmatpush2.bf16.msra.mxu1 %v3274_v32  ;;  %2102 = vmatprep.subr.bf16.mxu0 %v3285_v14 }
  0xad   :  { %2077 = vmatprep.subr.bf16.mxu1 %v3282_v36 }
  0xaf   :  { %2103 = vmatpush1.bf16.msra.mxu0 %v3283_v38 }
  0xb0   :  { %2078 = vmatpush2.bf16.msra.mxu1 %v3280_v37  ;;  %2104 = vmatprep.subr.bf16.mxu0 %v3291_v40 }
  0xb1   :  { %2079 = vmatprep.subr.bf16.mxu1 %v3288_v39 }
  0xb3   :  { %2105 = vmatpush1.bf16.msra.mxu0 %v3289_v44 }
  0xb4   :  { %2080 = vmatpush2.bf16.msra.mxu1 %v3286_v41  ;;  %2106 = vmatprep.subr.bf16.mxu0 %v3297_v46 }
  0xb5   :  { %2081 = vmatprep.subr.bf16.mxu1 %v3294_v45 }
  0xb7   :  { %2107 = vmatpush1.bf16.msra.mxu0 %v3295_v21 }
  0xb8   :  { %2082 = vmatpush2.bf16.msra.mxu1 %v3292_v20  ;;  %2108 = vmatprep.subr.bf16.mxu0 %v3303_v48 }
  0xb9   :  { %2083 = vmatprep.subr.bf16.mxu1 %v3300_v47 }
  0xbb   :  { %2109 = vmatpush1.bf16.msra.mxu0 %v3301_v52 }
  0xbc   :  { %2084 = vmatpush2.bf16.msra.mxu1 %v3298_v50  ;;  %2110 = vmatprep.subr.bf16.mxu0 %v3309_v54 }
  0xbd   :  { %2085 = vmatprep.subr.bf16.mxu1 %v3306_v53 }
  0xbf   :  { %2111 = vmatpush1.bf16.msra.mxu0 %v3307_v55 }
  0xc0   :  { %2086 = vmatpush2.bf16.msra.mxu1 %v3304_v10  ;;  %2112 = vmatprep.subr.bf16.mxu0 %v3312_v56 }
  0xc1   :  { %2137 = vmatprep.subr.bf16.mxu1 %v3315_v58 }
  0xc3   :  { %2088 = vmatmul.mubr.bf16.vlgmr.msra.gmra.mxu1 %v3789_v28  ;;  %2113 = vmatpush2.bf16.msra.mxu0 %v3310_v59  ;;  %v3325_v28 = vld [vmem:[%s4621_s2 + $0x4a8] ss:$16 sps:$4 sm:$0xff]  }
  0xc4   :  { %2138 = vmatpush1.bf16.msra.mxu1 %v3313_v60  ;;  %2114 = vmatprep.subr.bf16.mxu0 %v3318_v61 }
  0xc5   :  { %2139 = vmatprep.subr.bf16.mxu1 %v3321_v62  ;;  %2169 = vmatprep.mubr.bf16.mxu1 %v3805_v34  ;;  %v3331_v34 = vld [vmem:[%s4621_s2 + $0x488] ss:$16 sps:$4 sm:$0xff]  }
  0xc7   :  { %2115 = vmatpush2.bf16.msra.mxu0 %v3316_v63 }
  0xc8   :  { %2140 = vmatpush1.bf16.msra.mxu1 %v3319_v0  ;;  %2116 = vmatprep.subr.bf16.mxu0 %v3324_v1 }
  0xc9   :  { %2141 = vmatprep.subr.bf16.mxu1 %v3327_v2 }
  0xcb   :  { %2117 = vmatpush2.bf16.msra.mxu0 %v3322_v3 }
  0xcc   :  { %2142 = vmatpush1.bf16.msra.mxu1 %v3325_v28  ;;  %2118 = vmatprep.subr.bf16.mxu0 %v3330_v4 }
  0xcd   :  { %2143 = vmatprep.subr.bf16.mxu1 %v3333_v5 }
  0xcf   :  { %2119 = vmatpush2.bf16.msra.mxu0 %v3328_v6 }
  0xd0   :  { %2144 = vmatpush1.bf16.msra.mxu1 %v3331_v34  ;;  %2120 = vmatprep.subr.bf16.mxu0 %v3336_v7 }
  0xd1   :  { %2145 = vmatprep.subr.bf16.mxu1 %v3339_v8 }
  0xd3   :  { %2121 = vmatpush2.bf16.msra.mxu0 %v3334_v9 }
  0xd4   :  { %2146 = vmatpush1.bf16.msra.mxu1 %v3337_v11  ;;  %2122 = vmatprep.subr.bf16.mxu0 %v3342_v12 }
  0xd5   :  { %2147 = vmatprep.subr.bf16.mxu1 %v3345_v13 }
  0xd6   :  { %11 = vsyncpa [#allocation3], 0  ;;  %v3346_v19 = vld [vmem:[%s4621_s2 + $0x328] ss:$16 sps:$4 sm:$0xff]   ;;  %v3354_v57 = vld [vmem:[%s4621_s2 + $0x30c] ss:$16 sps:$4 sm:$0xff]  }
  0xd7   :  { %2123 = vmatpush2.bf16.msra.mxu0 %v3340_v15  ;;  %v3349_v23 = vld [vmem:[%s4621_s2 + $0x428] ss:$16 sps:$4 sm:$0xff]   ;;  %v3357_v24 = vld [vmem:[%s4621_s2 + $0x40c] ss:$16 sps:$4 sm:$0xff]   ;;  %v392_v62 = vsub.s32 0, %v3697_v49  ;;  %v396_v2 = vsub.s32 1, %v3697_v49 }
  0xd8   :  { %2148 = vmatpush1.bf16.msra.mxu1 %v3343_v16  ;;  %2124 = vmatprep.subr.bf16.mxu0 %v3348_v17  ;;  %v3352_v25 = vld [vmem:[%s4621_s2 + $0x308] ss:$16 sps:$4 sm:$0xff]   ;;  %v3360_v27 = vld [vmem:[%s4621_s2 + $0x5ec] ss:$16 sps:$4 sm:$0xff]   ;;  %v4402_v63 = vld [vmem:[%s4622_s3] sm:$0xf] }
  0xd9   :  { %2149 = vmatprep.subr.bf16.mxu1 %v3351_v18  ;;  %v3355_v26 = vld [vmem:[%s4621_s2 + $0x408] ss:$16 sps:$4 sm:$0xff]   ;;  %v3363_v30 = vld [vmem:[%s4621_s2 + $0x6ec] ss:$16 sps:$4 sm:$0xff]   ;;  %v393_v3 = vrot.slane %v4402_v63, %v392_v62  ;;  %v397_v34 = vrot.slane %v4402_v63, %v396_v2  ;;  %v3468_v62 = vld [vmem:[%s4623_s4 + $0x40] sm:$0xff]   ;;  %s3526_s14 = smov [#allocation2]  }
  0xda   :  { %v3358_v31 = vld [vmem:[%s4621_s2 + $0x5e8] ss:$16 sps:$4 sm:$0xff]   ;;  %v3366_v33 = vld [vmem:[%s4621_s2 + $0x5cc] ss:$16 sps:$4 sm:$0xff]   ;;  %s2642_s15 = sshll.u32 %s3526_s14, 4  ;;  %s2643_s15 = int_to_ptr.vmem [resolvable:$true] %s2642_s15 }
  0xdb   :  { %2125 = vmatpush2.bf16.msra.mxu0 %v3346_v19  ;;  %v3361_v32 = vld [vmem:[%s4621_s2 + $0x6e8] ss:$16 sps:$4 sm:$0xff]   ;;  %v3369_v36 = vld [vmem:[%s4621_s2 + $0x6cc] ss:$16 sps:$4 sm:$0xff]   ;;  %s3502_s16 = scalar_lea.vmem %s2643_s15, 32  ;;  %p3507_p1 = scmp.lt.s32.totalorder %s2643_s15, %s2643_s15 }
  0xdc   :  { %2150 = vmatpush1.bf16.msra.mxu1 %v3349_v23  ;;  %2126 = vmatprep.subr.bf16.mxu0 %v3354_v57  ;;  %v3364_v14 = vld [vmem:[%s4621_s2 + $0x5c8] ss:$16 sps:$4 sm:$0xff]   ;;  %v3372_v38 = vld [vmem:[%s4621_s2 + $0x5ac] ss:$16 sps:$4 sm:$0xff]   ;;  %p3503_p0 = scmp.ne.s32.totalorder %s2643_s15, %s3502_s16  ;;  %p3508_p2 = scmp.lt.s32.totalorder %s3502_s16, %s3502_s16 }
  0xdd   :  { %2151 = vmatprep.subr.bf16.mxu1 %v3357_v24  ;;  %v3367_v37 = vld [vmem:[%s4621_s2 + $0x6c8] ss:$16 sps:$4 sm:$0xff]   ;;  %v3378_v41 = vld [vmem:[%s4621_s2 + $0x58c] ss:$16 sps:$4 sm:$0xff]  }
  0xde   :  { %v3370_v39 = vld [vmem:[%s4621_s2 + $0x5a8] ss:$16 sps:$4 sm:$0xff]   ;;  %v3384_v46 = vld [vmem:[%s4621_s2 + $0x56c] ss:$16 sps:$4 sm:$0xff]   ;;  %p3509_p3 = por %p3508_p2, %p3507_p1 }
  0xdf   :  { %2127 = vmatpush2.bf16.msra.mxu0 %v3352_v25  ;;  %v3373_v40 = vld [vmem:[%s4621_s2 + $0x6a8] ss:$16 sps:$4 sm:$0xff]   ;;  %v3387_v20 = vld [vmem:[%s4621_s2 + $0x66c] ss:$16 sps:$4 sm:$0xff]  }
  0xe0   :  { %2152 = vmatpush1.bf16.msra.mxu1 %v3355_v26  ;;  %2178 = vmatprep.subr.bf16.mxu0 %v3363_v30  ;;  %v3376_v44 = vld [vmem:[%s4621_s2 + $0x588] ss:$16 sps:$4 sm:$0xff]   ;;  %v3390_v48 = vld [vmem:[%s4621_s2 + $0x54c] ss:$16 sps:$4 sm:$0xff]   ;;  %p3510_p4 = pnand %p3509_p3, %p3503_p0 }
  0xe1   :  { %2153 = vmatprep.subr.bf16.mxu1 %v3360_v27  ;;  %v3379_v45 = vld [vmem:[%s4621_s2 + $0x688] ss:$16 sps:$4 sm:$0xff]   ;;  %v3393_v50 = vld [vmem:[%s4621_s2 + $0x64c] ss:$16 sps:$4 sm:$0xff]  }
  0xe2   :  { %2129 = vmatmul.mubr.bf16.vlgmr.msra.gmra.mxu0 %v3791_v29  ;;  %v3375_v29 = vld [vmem:[%s4621_s2 + $0x6ac] ss:$16 sps:$4 sm:$0xff]   ;;  %v3382_v21 = vld [vmem:[%s4621_s2 + $0x568] ss:$16 sps:$4 sm:$0xff]  }
  0xe3   :  { %2179 = vmatpush1.bf16.msra.mxu0 %v3361_v32  ;;  %2210 = vmatprep.mubr.bf16.mxu0 %v3807_v35  ;;  %v3381_v35 = vld [vmem:[%s4621_s2 + $0x68c] ss:$16 sps:$4 sm:$0xff]   ;;  %v3385_v47 = vld [vmem:[%s4621_s2 + $0x668] ss:$16 sps:$4 sm:$0xff]  }
  0xe4   :  { %2154 = vmatpush2.bf16.msra.mxu1 %v3358_v31  ;;  %2180 = vmatprep.subr.bf16.mxu0 %v3369_v36  ;;  %v3388_v52 = vld [vmem:[%s4621_s2 + $0x548] ss:$16 sps:$4 sm:$0xff]   ;;  %v3396_v54 = vld [vmem:[%s4621_s2 + $0x52c] ss:$16 sps:$4 sm:$0xff]  }
  0xe5   :  { %2155 = vmatprep.subr.bf16.mxu1 %v3366_v33  ;;  %v3391_v53 = vld [vmem:[%s4621_s2 + $0x648] ss:$16 sps:$4 sm:$0xff]   ;;  %v3399_v10 = vld [vmem:[%s4621_s2 + $0x62c] ss:$16 sps:$4 sm:$0xff]  }
  0xe6   :  { %v3394_v55 = vld [vmem:[%s4621_s2 + $0x528] ss:$16 sps:$4 sm:$0xff]   ;;  %v3402_v58 = vld [vmem:[%s4621_s2 + $0x50c] ss:$16 sps:$4 sm:$0xff]  }
  0xe7   :  { %2181 = vmatpush1.bf16.msra.mxu0 %v3367_v37  ;;  %v3397_v56 = vld [vmem:[%s4621_s2 + $0x628] ss:$16 sps:$4 sm:$0xff]   ;;  %v3405_v59 = vld [vmem:[%s4621_s2 + $0x60c] ss:$16 sps:$4 sm:$0xff]  }
  0xe8   :  { %2156 = vmatpush2.bf16.msra.mxu1 %v3364_v14  ;;  %2182 = vmatprep.subr.bf16.mxu0 %v3375_v29  ;;  %v3400_v60 = vld [vmem:[%s4621_s2 + $0x508] ss:$16 sps:$4 sm:$0xff]   ;;  %v3408_v0 = vld [vmem:[%s4621_s2 + $0x7ec] ss:$16 sps:$4 sm:$0xff]  }
  0xe9   :  { %2157 = vmatprep.subr.bf16.mxu1 %v3372_v38  ;;  %v3403_v61 = vld [vmem:[%s4621_s2 + $0x608] ss:$16 sps:$4 sm:$0xff]   ;;  %v3411_v1 = vld [vmem:[%s4621_s2 + $0x8ec] ss:$16 sps:$4 sm:$0xff]  }
  0xea   :  { %v3406_v28 = vld [vmem:[%s4621_s2 + $0x7e8] ss:$16 sps:$4 sm:$0xff]   ;;  %v3414_v5 = vld [vmem:[%s4621_s2 + $0x7cc] ss:$16 sps:$4 sm:$0xff]  }
  0xeb   :  { %2183 = vmatpush1.bf16.msra.mxu0 %v3373_v40  ;;  %v3409_v4 = vld [vmem:[%s4621_s2 + $0x8e8] ss:$16 sps:$4 sm:$0xff]   ;;  %v3417_v6 = vld [vmem:[%s4621_s2 + $0x8cc] ss:$16 sps:$4 sm:$0xff]  }
  0xec   :  { %2158 = vmatpush2.bf16.msra.mxu1 %v3370_v39  ;;  %2184 = vmatprep.subr.bf16.mxu0 %v3381_v35  ;;  %v3412_v11 = vld [vmem:[%s4621_s2 + $0x7c8] ss:$16 sps:$4 sm:$0xff]   ;;  %v3420_v16 = vld [vmem:[%s4621_s2 + $0x7ac] ss:$16 sps:$4 sm:$0xff]  }
  0xed   :  { %2159 = vmatprep.subr.bf16.mxu1 %v3378_v41  ;;  %v3415_v12 = vld [vmem:[%s4621_s2 + $0x8c8] ss:$16 sps:$4 sm:$0xff]   ;;  %v3429_v30 = vld [vmem:[%s4621_s2 + $0x88c] ss:$16 sps:$4 sm:$0xff]  }
  0xee   :  { %v3418_v24 = vld [vmem:[%s4621_s2 + $0x7a8] ss:$16 sps:$4 sm:$0xff]   ;;  %v3432_v33 = vld [vmem:[%s4621_s2 + $0x76c] ss:$16 sps:$4 sm:$0xff]  }
  0xef   :  { %2185 = vmatpush1.bf16.msra.mxu0 %v3379_v45  ;;  %v3421_v25 = vld [vmem:[%s4621_s2 + $0x8a8] ss:$16 sps:$4 sm:$0xff]   ;;  %v3435_v36 = vld [vmem:[%s4621_s2 + $0x86c] ss:$16 sps:$4 sm:$0xff]  }
  0xf0   :  { %2160 = vmatpush2.bf16.msra.mxu1 %v3376_v44  ;;  %2186 = vmatprep.subr.bf16.mxu0 %v3387_v20  ;;  %v3424_v31 = vld [vmem:[%s4621_s2 + $0x788] ss:$16 sps:$4 sm:$0xff]   ;;  %v3438_v38 = vld [vmem:[%s4621_s2 + $0x74c] ss:$16 sps:$4 sm:$0xff]  }
  0xf1   :  { %2161 = vmatprep.subr.bf16.mxu1 %v3384_v46  ;;  %v3427_v32 = vld [vmem:[%s4621_s2 + $0x888] ss:$16 sps:$4 sm:$0xff]   ;;  %v3441_v29 = vld [vmem:[%s4621_s2 + $0x84c] ss:$16 sps:$4 sm:$0xff]  }
  0xf2   :  { %v3430_v14 = vld [vmem:[%s4621_s2 + $0x768] ss:$16 sps:$4 sm:$0xff]   ;;  %v3444_v41 = vld [vmem:[%s4621_s2 + $0x72c] ss:$16 sps:$4 sm:$0xff]  }
  0xf3   :  { %2187 = vmatpush1.bf16.msra.mxu0 %v3385_v47  ;;  %v3433_v37 = vld [vmem:[%s4621_s2 + $0x868] ss:$16 sps:$4 sm:$0xff]   ;;  %v3447_v35 = vld [vmem:[%s4621_s2 + $0x82c] ss:$16 sps:$4 sm:$0xff]  }
  0xf4   :  { %2162 = vmatpush2.bf16.msra.mxu1 %v3382_v21  ;;  %2188 = vmatprep.subr.bf16.mxu0 %v3393_v50  ;;  %v3436_v39 = vld [vmem:[%s4621_s2 + $0x748] ss:$16 sps:$4 sm:$0xff]   ;;  %v3450_v46 = vld [vmem:[%s4621_s2 + $0x70c] ss:$16 sps:$4 sm:$0xff]  }
  0xf5   :  { %2163 = vmatprep.subr.bf16.mxu1 %v3390_v48  ;;  %v3439_v40 = vld [vmem:[%s4621_s2 + $0x848] ss:$16 sps:$4 sm:$0xff]   ;;  %v3453_v20 = vld [vmem:[%s4621_s2 + $0x80c] ss:$16 sps:$4 sm:$0xff]  }
  0xf6   :  { %v3442_v44 = vld [vmem:[%s4621_s2 + $0x728] ss:$16 sps:$4 sm:$0xff]  }
  0xf7   :  { %2189 = vmatpush1.bf16.msra.mxu0 %v3391_v53  ;;  %v3445_v45 = vld [vmem:[%s4621_s2 + $0x828] ss:$16 sps:$4 sm:$0xff]   ;;  %v3457_v53 = vld [vmem:[%s4623_s4 + $0x30] sm:$0xff]  }
  0xf8   :  { %2164 = vmatpush2.bf16.msra.mxu1 %v3388_v52  ;;  %2190 = vmatprep.subr.bf16.mxu0 %v3399_v10  ;;  %v3448_v21 = vld [vmem:[%s4621_s2 + $0x708] ss:$16 sps:$4 sm:$0xff]   ;;  %v3456_v52 = vld [vmem:[%s4623_s4 + $0x70] sm:$0xff]  }
  0xf9   :  { %2165 = vmatprep.subr.bf16.mxu1 %v3396_v54  ;;  %v3451_v47 = vld [vmem:[%s4621_s2 + $0x808] ss:$16 sps:$4 sm:$0xff]  }
  0xfa   :  { %v3454_v48 = vld [vmem:[%s4623_s4 + $0x78] sm:$0xff]   ;;  %v3458_v54 = vld [vmem:[%s4623_s4 + $0x68] sm:$0xff]  }
  0xfb   :  { %2191 = vmatpush1.bf16.msra.mxu0 %v3397_v56  ;;  %v3455_v50 = vld [vmem:[%s4623_s4 + $0x38] sm:$0xff]   ;;  %v3459_v10 = vld [vmem:[%s4623_s4 + $0x28] sm:$0xff]  }
  0xfc   :  { %2166 = vmatpush2.bf16.msra.mxu1 %v3394_v55  ;;  %2192 = vmatprep.subr.bf16.mxu0 %v3405_v59  ;;  %v3462_v55 = vld [vmem:[%s4623_s4 + $0x58] sm:$0xff]   ;;  %v3465_v59 = vld [vmem:[%s4623_s4 + $0x10] sm:$0xff]  }
  0xfd   :  { %2167 = vmatprep.subr.bf16.mxu1 %v3402_v58  ;;  %v3463_v56 = vld [vmem:[%s4623_s4 + $0x18] sm:$0xff]   ;;  %v3464_v58 = vld [vmem:[%s4623_s4 + $0x50] sm:$0xff]  }
  0xff   :  { %2193 = vmatpush1.bf16.msra.mxu0 %v3403_v61  ;;  %v3467_v61 = vld [vmem:[%s4623_s4 + $0x8] sm:$0xff]  }
 0x100   :  { %2168 = vmatpush2.bf16.msra.mxu1 %v3400_v60  ;;  %2194 = vmatprep.subr.bf16.mxu0 %v3408_v0  ;;  %v3466_v60 = vld [vmem:[%s4623_s4 + $0x48] sm:$0xff]   ;;  %v3469_v0 = vld [vmem:[%s4623_s4] sm:$0xff]  }
 0x101   :  { %2219 = vmatprep.subr.bf16.mxu1 %v3411_v1 }
 0x102   :  { %v1884_v7 = vpop.f32.mrf.mxu0 }
 0x103   :  { %v1925_v8 = vpop.f32.mrf.mxu1  ;;  %2170 = vmatmul.mubr.bf16.vlgmr.msra.gmra.mxu1 %v3995_v42  ;;  %v1885_v9 = vadd.f32 %v1884_v7, %v393_v3  ;;  %2195 = vmatpush2.bf16.msra.mxu0 %v3406_v28  ;;  %v3423_v42 = vld [vmem:[%s4621_s2 + $0x8ac] ss:$16 sps:$4 sm:$0xff]  }
 0x104   :  { %2220 = vmatpush1.bf16.msra.mxu1 %v3409_v4  ;;  %v1886_v13 = vpop.f32.mrf.mxu0  ;;  %2196 = vmatprep.subr.bf16.mxu0 %v3414_v5 }
 0x105   :  { %v1927_v15 = vpop.f32.mrf.mxu1  ;;  %2221 = vmatprep.subr.bf16.mxu1 %v3417_v6  ;;  %v4438_v17 = vadd.f32 %v1925_v8, %v1885_v9  ;;  %v1887_v18 = vadd.f32 %v1886_v13, %v397_v34  ;;  %2251 = vmatprep.mubr.bf16.mxu1 %v3525_v51  ;;  %v3426_v51 = vld [vmem:[%s4621_s2 + $0x78c] ss:$16 sps:$4 sm:$0xff]  }
 0x106   :  { %v1888_v19 = vpop.f32.mrf.mxu0 }
 0x107   :  { %v1929_v23 = vpop.f32.mrf.mxu1  ;;  %v4441_v57 = vadd.f32 %v1927_v15, %v1887_v18  ;;  %2197 = vmatpush2.bf16.msra.mxu0 %v3412_v11 }
 0x108   :  { %2222 = vmatpush1.bf16.msra.mxu1 %v3415_v12  ;;  %v1889_v26 = vpop.f32.mrf.mxu0  ;;  %2198 = vmatprep.subr.bf16.mxu0 %v3420_v16 }
 0x109   :  { %v1930_v27 = vpop.f32.mrf.mxu1  ;;  %2223 = vmatprep.subr.bf16.mxu1 %v3423_v42 }
 0x10a   :  { %v3474_v27 = vld [vmem:[%s4623_s4 + $0xe8] sm:$0xff]  }
 0x10b   :  { %2199 = vmatpush2.bf16.msra.mxu0 %v3418_v24  ;;  %v3470_v24 = vld [vmem:[%s4623_s4 + $0xf8] sm:$0xff]  }
 0x10c   :  { %2224 = vmatpush1.bf16.msra.mxu1 %v3421_v25  ;;  %2200 = vmatprep.subr.bf16.mxu0 %v3426_v51  ;;  %v3473_v25 = vld [vmem:[%s4623_s4 + $0xb0] sm:$0xff]  }
 0x10d   :  { %2225 = vmatprep.subr.bf16.mxu1 %v3429_v30  ;;  %v3475_v30 = vld [vmem:[%s4623_s4 + $0xa8] sm:$0xff]  }
 0x10f   :  { %2201 = vmatpush2.bf16.msra.mxu0 %v3424_v31 }
 0x110   :  { %2226 = vmatpush1.bf16.msra.mxu1 %v3427_v32  ;;  %2202 = vmatprep.subr.bf16.mxu0 %v3432_v33  ;;  %v3476_v33 = vld [vmem:[%s4623_s4 + $0xe0] sm:$0xff]  }
 0x111   :  { %2227 = vmatprep.subr.bf16.mxu1 %v3435_v36  ;;  %v3477_v36 = vld [vmem:[%s4623_s4 + $0xa0] sm:$0xff]  }
 0x113   :  { %2203 = vmatpush2.bf16.msra.mxu0 %v3430_v14  ;;  %v3478_v14 = vld [vmem:[%s4623_s4 + $0xd8] sm:$0xff]  }
 0x114   :  { %2228 = vmatpush1.bf16.msra.mxu1 %v3433_v37  ;;  %2204 = vmatprep.subr.bf16.mxu0 %v3438_v38  ;;  %v3479_v37 = vld [vmem:[%s4623_s4 + $0x98] sm:$0xff]   ;;  %v3480_v38 = vld [vmem:[%s4623_s4 + $0xd0] sm:$0xff]  }
 0x115   :  { %2229 = vmatprep.subr.bf16.mxu1 %v3441_v29  ;;  %v3481_v29 = vld [vmem:[%s4623_s4 + $0x90] sm:$0xff]  }
 0x117   :  { %2205 = vmatpush2.bf16.msra.mxu0 %v3436_v39 }
 0x118   :  { %2230 = vmatpush1.bf16.msra.mxu1 %v3439_v40  ;;  %2206 = vmatprep.subr.bf16.mxu0 %v3444_v41 }
 0x119   :  { %2231 = vmatprep.subr.bf16.mxu1 %v3447_v35  ;;  %v3482_v35 = vld [vmem:[%s4623_s4 + $0xc8] sm:$0xff]  }
 0x11b   :  { %2207 = vmatpush2.bf16.msra.mxu0 %v3442_v44  ;;  %v3483_v44 = vld [vmem:[%s4623_s4 + $0x88] sm:$0xff]  }
 0x11c   :  { %2232 = vmatpush1.bf16.msra.mxu1 %v3445_v45  ;;  %2208 = vmatprep.subr.bf16.mxu0 %v3450_v46 }
 0x11d   :  { %2233 = vmatprep.subr.bf16.mxu1 %v3453_v20 }
 0x11f   :  { %2209 = vmatpush2.bf16.msra.mxu0 %v3448_v21 }
 0x120   :  { %2234 = vmatpush1.bf16.msra.mxu1 %v3451_v47  ;;  %2975 = vmatprep.subr.bf16.mxu0 %v3454_v48  ;;  %v3484_v48 = vld [vmem:[%s4623_s4 + $0xc0] sm:$0xff]  }
 0x121   :  { %2997 = vmatprep.subr.bf16.mxu1 %v3470_v24 }
 0x122   :  { %2211 = vmatmul.mubr.bf16.vlgmr.msra.gmra.mxu0 %v3999_v43  ;;  %v3460_v43 = vld [vmem:[%s4623_s4 + $0x60] sm:$0xff]  }
 0x123   :  { %2252 = vmatmul.mubr.bf16.vlgmr.msra.gmra.mxu1 %v4108_v22  ;;  %2976 = vmatpush3.bf16.msra.mxu0 %v3455_v50  ;;  %v3461_v22 = vld [vmem:[%s4623_s4 + $0x20] sm:$0xff]  }
 0x124   :  { %2977 = vmatprep.subr.bf16.mxu0 %v3456_v52  ;;  %v3485_v52 = vld [vmem:[%s4623_s4 + $0x80] sm:$0xff]  }
 0x127   :  { %2978 = vmatpush3.bf16.msra.mxu0 %v3457_v53 }
 0x128   :  { %2979 = vmatprep.subr.bf16.mxu0 %v3458_v54 }
 0x12b   :  { %2980 = vmatpush3.bf16.msra.mxu0 %v3459_v10 }
 0x12c   :  { %2981 = vmatprep.subr.bf16.mxu0 %v3460_v43 }
 0x12f   :  { %2982 = vmatpush3.bf16.msra.mxu0 %v3461_v22 }
 0x130   :  { %2983 = vmatprep.subr.bf16.mxu0 %v3462_v55 }
 0x133   :  { %2984 = vmatpush3.bf16.msra.mxu0 %v3463_v56 }
 0x134   :  { %2985 = vmatprep.subr.bf16.mxu0 %v3464_v58 }
 0x137   :  { %2986 = vmatpush3.bf16.msra.mxu0 %v3465_v59 }
 0x138   :  { %2987 = vmatprep.subr.bf16.mxu0 %v3466_v60  ;;  %v400_v60 = vsub.s32 2, %v3697_v49 }
 0x13b   :  { %2988 = vmatpush3.bf16.msra.mxu0 %v3467_v61  ;;  %v404_v61 = vsub.s32 3, %v3697_v49 }
 0x13c   :  { %2989 = vmatprep.subr.bf16.mxu0 %v3468_v62  ;;  %v401_v62 = vrot.slane %v4402_v63, %v400_v60 }
 0x13f   :  { %2990 = vmatpush3.bf16.msra.mxu0 %v3469_v0  ;;  %v405_v0 = vrot.slane %v4402_v63, %v404_v61 }
 0x142   :  { %v1966_v1 = vpop.f32.mrf.mxu0 }
 0x143   :  { %v2007_v2 = vpop.f32.mrf.mxu1  ;;  %v1967_v7 = vadd.f32 %v1966_v1, %v4438_v17  ;;  %v3471_v17 = vld [vmem:[%s4623_s4 + $0xb8] sm:$0xff]  }
 0x144   :  { %v1968_v3 = vpop.f32.mrf.mxu0  ;;  %2998 = vmatpush3.bf16.msra.mxu1 %v3471_v17 }
 0x145   :  { %v2009_v28 = vpop.f32.mrf.mxu1  ;;  %v1969_v8 = vadd.f32 %v1968_v3, %v4441_v57  ;;  %v2008_v9 = vadd.f32 %v2007_v2, %v1967_v7  ;;  %v3472_v57 = vld [vmem:[%s4623_s4 + $0xf0] sm:$0xff]  }
 0x146   :  { %v1970_v4 = vpop.f32.mrf.mxu0  ;;  %2999 = vmatprep.subr.bf16.mxu1 %v3472_v57 }
 0x147   :  { %v2011_v5 = vpop.f32.mrf.mxu1  ;;  %v2010_v12 = vadd.f32 %v2009_v28, %v1969_v8 }
 0x148   :  { %v1971_v6 = vpop.f32.mrf.mxu0  ;;  %3000 = vmatpush3.bf16.msra.mxu1 %v3473_v25 }
 0x149   :  { %v2012_v34 = vpop.f32.mrf.mxu1  ;;  %3001 = vmatprep.subr.bf16.mxu1 %v3474_v27 }
 0x14c   :  { %3002 = vmatpush3.bf16.msra.mxu1 %v3475_v30 }
 0x14d   :  { %3003 = vmatprep.subr.bf16.mxu1 %v3476_v33 }
 0x150   :  { %3004 = vmatpush3.bf16.msra.mxu1 %v3477_v36 }
 0x151   :  { %3005 = vmatprep.subr.bf16.mxu1 %v3478_v14 }
 0x154   :  { %3006 = vmatpush3.bf16.msra.mxu1 %v3479_v37  ;;  %v2942_v37 = vld [vmem:[%s4624_s5] ss:$0 sm:$0xff] }
 0x155   :  { %3007 = vmatprep.subr.bf16.mxu1 %v3480_v38 }
 0x158   :  { %3008 = vmatpush3.bf16.msra.mxu1 %v3481_v29 }
 0x159   :  { %3009 = vmatprep.subr.bf16.mxu1 %v3482_v35 }
 0x15c   :  { %3010 = vmatpush3.bf16.msra.mxu1 %v3483_v44 }
 0x15d   :  { %3011 = vmatprep.subr.bf16.mxu1 %v3484_v48 }
 0x160   :  { %3012 = vmatpush3.bf16.msra.mxu1 %v3485_v52 }
 0x162   :  { %v2048_v11 = vpop.f32.mrf.mxu0 }
 0x163   :  { %v2049_v13 = vadd.f32 %v2048_v11, %v2008_v9 }
 0x164   :  { %v2050_v15 = vpop.f32.mrf.mxu0 }
 0x165   :  { %v2938_v16 = vmul.f32 -1.442695, %v2049_v13  ;;  %v2051_v42 = vadd.f32 %v2050_v15, %v2010_v12 }
 0x166   :  { %v2052_v18 = vpop.f32.mrf.mxu0 }
 0x167   :  { %3486 = vpow2.f32 %v2938_v16  ;;  %v2939_v19 = vmul.f32 -1.442695, %v2051_v42 }
 0x168   :  { %v2053_v23 = vpop.f32.mrf.mxu0 }
 0x169   :  { %3488 = vpow2.f32 %v2939_v19 }
 0x174   :  { %v3487_v26 = vpop.eup %3486 }
 0x175   :  { %v2272_v51 = vadd.f32 1.0, %v3487_v26 }
 0x176   :  { %v3489_v31 = vpop.eup %3488 }
 0x177   :  { %3490 = vrcp.f32 %v2272_v51  ;;  %v2273_v32 = vadd.f32 1.0, %v3489_v31 }
 0x179   :  { %3492 = vrcp.f32 %v2273_v32 }
 0x183   :  { %v2089_v39 = vpop.f32.mrf.mxu1 }
 0x184   :  { %v3491_v40 = vpop.eup %3490  ;;  %v2090_v1 = vadd.f32 %v2089_v39, %v401_v62 }
 0x185   :  { %v2091_v41 = vpop.f32.mrf.mxu1  ;;  %v2284_v46 = vmul.f32 %v3491_v40, %v2049_v13 }
 0x186   :  { %v3493_v45 = vpop.eup %3492  ;;  %v2092_v2 = vadd.f32 %v2091_v41, %v405_v0 }
 0x187   :  { %v2093_v20 = vpop.f32.mrf.mxu1  ;;  %v2285_v21 = vmul.f32 %v3493_v45, %v2051_v42  ;;  %v2288_v53 = vpack.c.bf16 %v2284_v46, %v2284_v46 }
 0x189   :  { %v2094_v47 = vpop.f32.mrf.mxu1  ;;  %v2289_v50 = vpack.c.bf16 %v2285_v21, %v2285_v21 }
 0x18b   :  { %2587 = vmatprep.mubr.bf16.mxu0 %v2289_v50 }
 0x18c   :  { %2588 = vmatmul.mubr.bf16.vlgmr.msra.gmra.mxu0 %v2288_v53 }
 0x1a2   :  { %v2130_v54 = vpop.f32.mrf.mxu0 }
 0x1a3   :  { %v2131_v3 = vadd.f32 %v2130_v54, %v2090_v1 }
 0x1a4   :  { %v2132_v10 = vpop.f32.mrf.mxu0 }
 0x1a5   :  { %v2133_v28 = vadd.f32 %v2132_v10, %v2092_v2 }
 0x1a6   :  { %v2134_v43 = vpop.f32.mrf.mxu0 }
 0x1a8   :  { %v2135_v22 = vpop.f32.mrf.mxu0 }
 0x1c3   :  { %v2171_v55 = vpop.f32.mrf.mxu1 }
 0x1c4   :  { %v2172_v4 = vadd.f32 %v2171_v55, %v2131_v3 }
 0x1c5   :  { %v2173_v56 = vpop.f32.mrf.mxu1 }
 0x1c6   :  { %v2174_v34 = vadd.f32 %v2173_v56, %v2133_v28 }
 0x1c7   :  { %v2175_v58 = vpop.f32.mrf.mxu1 }
 0x1c9   :  { %v2176_v59 = vpop.f32.mrf.mxu1 }
 0x1e2   :  { %v2212_v5 = vpop.f32.mrf.mxu0 }
 0x1e3   :  { %v2253_v6 = vpop.f32.mrf.mxu1  ;;  %v2213_v7 = vadd.f32 %v2212_v5, %v2172_v4 }
 0x1e4   :  { %v2214_v8 = vpop.f32.mrf.mxu0 }
 0x1e5   :  { %v2255_v9 = vpop.f32.mrf.mxu1  ;;  %v2254_v11 = vadd.f32 %v2253_v6, %v2213_v7  ;;  %v2215_v12 = vadd.f32 %v2214_v8, %v2174_v34 }
 0x1e6   :  { %v2216_v13 = vpop.f32.mrf.mxu0 }
 0x1e7   :  { %v2257_v15 = vpop.f32.mrf.mxu1  ;;  %v2940_v49 = vmul.f32 -1.442695, %v2254_v11  ;;  %v2256_v16 = vadd.f32 %v2255_v9, %v2215_v12 }
 0x1e8   :  { %v2217_v42 = vpop.f32.mrf.mxu0 }
 0x1e9   :  { %v2258_v18 = vpop.f32.mrf.mxu1  ;;  %3494 = vpow2.f32 %v2940_v49  ;;  %v2941_v63 = vmul.f32 -1.442695, %v2256_v16 }
 0x1eb   :  { %3496 = vpow2.f32 %v2941_v63 }
 0x1f6   :  { %v3495_v19 = vpop.eup %3494 }
 0x1f7   :  { %v2274_v23 = vadd.f32 1.0, %v3495_v19 }
 0x1f8   :  { %v3497_v24 = vpop.eup %3496 }
 0x1f9   :  { %3498 = vrcp.f32 %v2274_v23  ;;  %v2275_v17 = vadd.f32 1.0, %v3497_v24 }
 0x1fb   :  { %3500 = vrcp.f32 %v2275_v17 }
 0x206   :  { %v3499_v57 = vpop.eup %3498 }
 0x207   :  { %v2286_v26 = vmul.f32 %v3499_v57, %v2254_v11 }
 0x208   :  { %v3501_v25 = vpop.eup %3500 }
 0x209   :  { %v2287_v27 = vmul.f32 %v3501_v25, %v2256_v16  ;;  %v2290_v30 = vpack.c.bf16 %v2286_v26, %v2286_v26 }
 0x20b   :  { %v2291_v51 = vpack.c.bf16 %v2287_v27, %v2287_v27 }
 0x20d   :  { %2627 = vmatprep.mubr.bf16.mxu1 %v2291_v51 }
 0x20e   :  { %2628 = vmatmul.mubr.bf16.vlgmr.msra.gmra.mxu1 %v2290_v30 }
 0x24c   :  { %v2991_v31 = vpop.f32.mrf.mxu0 }
 0x24e   :  { %v2992_v32 = vpop.f32.mrf.mxu0 }
 0x24f   :  { %v2993_v33 = vadd.f32 %v2992_v32, %v2991_v31 }
 0x250   :  { %v2994_v36 = vpop.f32.mrf.mxu0 }
 0x251   :  { %v2590_v39 = vadd.f32 %v2993_v33, %v2942_v37 }
 0x252   :  { %v2995_v14 = vpop.f32.mrf.mxu0 }
 0x2ce   :  { %v3013_v38 = vpop.f32.mrf.mxu1 }
 0x2d0   :  { %v3014_v29 = vpop.f32.mrf.mxu1 }
 0x2d1   :  { %v3015_v40 = vadd.f32 %v3014_v29, %v3013_v38 }
 0x2d2   :  { %v3016_v41 = vpop.f32.mrf.mxu1 }
 0x2d3   :  { %v2630_v35 = vadd.f32 %v3015_v40, %v2590_v39 }
 0x2d4   :  { %v3017_v44 = vpop.f32.mrf.mxu1 }
 0x2d5   :  { %2635 = vst [vmem:[#allocation2] sm:$0x3] %v2630_v35 }
 0x2d6   :  { %3513 = shalt.err (!%p3510_p4)
}
 0x2d7   :  { %2645 = dma.vmem_to_hbm [thread:$0]  %s2643_s15, 32, %s4625_s6, [#allocation3]  }
 0x2d8   :  { %3522 = dma.done.wait [#allocation3], 32  }
 0x2d9   :  { %3523 = vsyncadd [#allocation3], 4294967264 }
 0x2da   :  { %2649 = vsyncpa [#allocation3], 1 }

</bundles_post_ra>
